<compile_context>
chip_gen: v7x
topology: tpu7x:2x2x1
jax: 0.10.0
libtpu: 0.0.40
codegen_flags: <defaults>
</compile_context>

<pallas_src>
import functools

import jax
import jax.numpy as jnp
from jax.experimental import pallas as pl
from jax.experimental.pallas import tpu as pltpu

# ----------------------------------------------------------------------------
# "env_config" constants (consistent with the module's hard-coded 220 / 6500 dims)
# ----------------------------------------------------------------------------
N_FRAMES = 1
MAX_VISIBLE_OBJECTS = 10         # 13 * 10  = 130
MAX_VISIBLE_ROAD_POINTS = 500    # 13 * 500 = 6500
MAX_VISIBLE_TRAFFIC_LIGHTS = 7   # 12 * 7   = 84
MAX_VISIBLE_STOP_SIGNS = 2       # 3 * 2    = 6   -> 130 + 6 + 84 = 220

INPUT_DIM_EGO = 10 * N_FRAMES            # 10
INPUT_DIM_ROAD_OBJECTS = 220 * N_FRAMES  # 220
INPUT_DIM_ROAD_GRAPH = 6500 * N_FRAMES   # 6500

ARCH_EGO_STATE = [8]
ARCH_ROAD_OBJECTS = [64]
ARCH_ROAD_GRAPH = [128, 64]
LAST_LAYER_DIM_PI = 64
LAST_LAYER_DIM_VF = 64
LN_EPS = 1e-5
SHARED_NET_INPUT_DIM = ARCH_EGO_STATE[-1] + ARCH_ROAD_OBJECTS[-1] + ARCH_ROAD_GRAPH[-1]  # 136

# flattened-observation split points (verbatim from _unflatten_obs)
# TODO(synk): these *END formulas multiply an accumulated offset by N_FRAMES, which is only
# correct for N_FRAMES == 1 — kept verbatim to match the reference module.
ROAD_OBJECTS_END = 13 * MAX_VISIBLE_OBJECTS * N_FRAMES                           # 130
ROAD_POINTS_END = (ROAD_OBJECTS_END + 13 * MAX_VISIBLE_ROAD_POINTS) * N_FRAMES   # 6630
TL_END = (ROAD_POINTS_END + 12 * MAX_VISIBLE_TRAFFIC_LIGHTS) * N_FRAMES          # 6714
STOP_SIGN_END = (TL_END + 3 * MAX_VISIBLE_STOP_SIGNS) * N_FRAMES                 # 6720
FEATURE_DIM = INPUT_DIM_EGO + STOP_SIGN_END                                      # 6730

# absolute column ranges inside the flat observation
EGO_COLS = (0, INPUT_DIM_EGO)                                              # [0, 10)
RO_COLS = (INPUT_DIM_EGO, INPUT_DIM_EGO + ROAD_OBJECTS_END)                # [10, 140)
RG_COLS = (INPUT_DIM_EGO + ROAD_OBJECTS_END, INPUT_DIM_EGO + ROAD_POINTS_END)  # [140, 6640)
TL_COLS = (INPUT_DIM_EGO + ROAD_POINTS_END, INPUT_DIM_EGO + TL_END)        # [6640, 6724)
SS_COLS = (INPUT_DIM_EGO + TL_END, INPUT_DIM_EGO + STOP_SIGN_END)          # [6724, 6730)

# kernel-side K windows (all starts are 128-aligned; zero weight rows mask unused cols)
EGO_K = 128                        # obs[:, 0:128]     superset of ego cols
HEAD_K = 256                       # obs[:, 0:256]     superset of road-object cols [10,140)
RG_K = 6656                        # obs[:, 0:6656]    superset of road-graph cols [140,6640)
TAIL_START = 6528                  # 51*128
TAIL_K = FEATURE_DIM - TAIL_START  # 202               covers TL + stop-sign cols

OUT_WIDTH = LAST_LAYER_DIM_PI + LAST_LAYER_DIM_VF  # 128 (lane-dense output slab)

# (bias | gamma | beta) slab layout: [ego_pi,ego_vf | ro_pi,ro_vf | rg1_pi,rg1_vf | rg2_pi,rg2_vf | out]
_P_EGO, _P_RO, _P_RG1, _P_RG2, _P_OUT = 0, 16, 144, 400, 528
SLAB_W = 592


def _round_up(x, m):
    return ((x + m - 1) // m) * m


# ----------------------------------------------------------------------------
# Fused forward kernel: both paths (actor + critic) + shared out layer.
# ----------------------------------------------------------------------------
def _fused_forward_kernel(obs_ref, w_rg1_ref, w_ego_ref, w_roh_ref, w_rot_ref,
                          w_rg2_ref, w_out_ref, scal_ref, out_ref, *, act):
    f32 = jnp.float32
    bf16 = jnp.bfloat16

    def ln_act(y, off, n):
        # Linear bias + LayerNorm (biased variance, like nn.LayerNorm) + activation, in f32.
        y = y + scal_ref[0:1, off:off + n]
        mean = jnp.mean(y, axis=-1, keepdims=True)
        var = jnp.mean(jnp.square(y - mean), axis=-1, keepdims=True)
        y = (y - mean) * jax.lax.rsqrt(var + LN_EPS)
        y = y * scal_ref[1:2, off:off + n] + scal_ref[2:3, off:off + n]
        return jnp.tanh(y) if act == "tanh" else jnp.maximum(y, 0.0)

    # Single HBM read of the raw f32 observation tile; bf16 copy for the MXU.
    x = obs_ref[...].astype(bf16)                                       # (Bt, 6730)

    # Fused (pi|vf along N) first-layer matmuls; f32 accumulation on the MXU.
    y_rg1 = jnp.dot(x[:, :RG_K], w_rg1_ref[...],
                    preferred_element_type=f32)                         # (Bt, 256)
    y_ego = jnp.dot(x[:, :EGO_K], w_ego_ref[...],
                    preferred_element_type=f32)                         # (Bt, 16)
    y_ro = (jnp.dot(x[:, :HEAD_K], w_roh_ref[...], preferred_element_type=f32)
            + jnp.dot(x[:, TAIL_START:], w_rot_ref[...],
                      preferred_element_type=f32))                      # (Bt, 128)

    e_pi = ln_act(y_ego[:, :8], _P_EGO, 8)
    e_vf = ln_act(y_ego[:, 8:16], _P_EGO + 8, 8)
    o_pi = ln_act(y_ro[:, :64], _P_RO, 64)
    o_vf = ln_act(y_ro[:, 64:128], _P_RO + 64, 64)
    g1_pi = ln_act(y_rg1[:, :128], _P_RG1, 128)
    g1_vf = ln_act(y_rg1[:, 128:256], _P_RG1 + 128, 128)

    # Second road-graph layer (per-path weights).
    g2_pi = ln_act(jnp.dot(g1_pi.astype(bf16), w_rg2_ref[0],
                           preferred_element_type=f32), _P_RG2, 64)
    g2_vf = ln_act(jnp.dot(g1_vf.astype(bf16), w_rg2_ref[1],
                           preferred_element_type=f32), _P_RG2 + 64, 64)

    # Shared out layer (reference forward_critic also uses policy_out_layer): run once
    # with pi and vf stacked along the batch (M) axis; the 136-row weight is row-split so
    # no feature concat is needed.
    e2 = jnp.concatenate([e_pi, e_vf], axis=0).astype(bf16)             # (2*Bt, 8)
    o2 = jnp.concatenate([o_pi, o_vf], axis=0).astype(bf16)             # (2*Bt, 64)
    g2 = jnp.concatenate([g2_pi, g2_vf], axis=0).astype(bf16)           # (2*Bt, 64)
    y = (jnp.dot(e2, w_out_ref[0:8, :].astype(bf16), preferred_element_type=f32)
         + jnp.dot(o2, w_out_ref[8:72, :].astype(bf16), preferred_element_type=f32)
         + jnp.dot(g2, w_out_ref[72:136, :].astype(bf16), preferred_element_type=f32))
    y = ln_act(y, _P_OUT, 64)                                           # (2*Bt, 64)

    bt = out_ref.shape[0]
    out_ref[:, :LAST_LAYER_DIM_PI] = y[:bt].astype(out_ref.dtype)       # latent_pi
    out_ref[:, LAST_LAYER_DIM_PI:] = y[bt:].astype(out_ref.dtype)       # latent_vf


# ----------------------------------------------------------------------------
# Parameters: logical (PyTorch-style init) + packing into kernel-ready arrays.
# ----------------------------------------------------------------------------
def init_params(key):
    ks = jax.random.split(key, 9)

    def lin(k, din, dout):
        kw, kb = jax.random.split(k)
        bound = 1.0 / float(din) ** 0.5
        w = jax.random.uniform(kw, (din, dout), jnp.float32, -bound, bound)
        b = jax.random.uniform(kb, (dout,), jnp.float32, -bound, bound)
        return w, b

    dims = (("ego", INPUT_DIM_EGO, ARCH_EGO_STATE[0]),
            ("ro", INPUT_DIM_ROAD_OBJECTS, ARCH_ROAD_OBJECTS[0]),
            ("rg1", INPUT_DIM_ROAD_GRAPH, ARCH_ROAD_GRAPH[0]),
            ("rg2", ARCH_ROAD_GRAPH[0], ARCH_ROAD_GRAPH[1]))
    p = {}
    for pre, base in (("pi", 0), ("vf", 4)):
        for j, (name, din, dout) in enumerate(dims):
            w, b = lin(ks[base + j], din, dout)
            p[f"{pre}_{name}_w"] = w
            p[f"{pre}_{name}_b"] = b
            p[f"{pre}_{name}_g"] = jnp.ones((dout,), jnp.float32)       # LayerNorm weight
            p[f"{pre}_{name}_beta"] = jnp.zeros((dout,), jnp.float32)   # LayerNorm bias
    w, b = lin(ks[8], SHARED_NET_INPUT_DIM, LAST_LAYER_DIM_PI)
    p["out_w"], p["out_b"] = w, b
    p["out_g"] = jnp.ones((LAST_LAYER_DIM_PI,), jnp.float32)
    p["out_beta"] = jnp.zeros((LAST_LAYER_DIM_PI,), jnp.float32)
    # TODO(synk): the reference also builds val_out_layer, but its forward never uses it
    # (forward_critic reuses policy_out_layer), so only one out layer is created.
    # TODO(synk): non-empty arch_shared_net (extra hidden layers in the out net) is not
    # implemented; the module default arch_shared_net=[] is what is reproduced.
    return p


def pack_params(p):
    """Pack logical params into kernel-ready fused / zero-embedded arrays."""
    bf16, f32 = jnp.bfloat16, jnp.float32

    def fuse_n(a, b):
        return jnp.concatenate([a, b], axis=1)

    # ego: obs cols [0,10) zero-embedded into a 128-row block, pi|vf fused along N.
    w_ego = jnp.zeros((EGO_K, 2 * ARCH_EGO_STATE[0]), f32)
    w_ego = w_ego.at[:INPUT_DIM_EGO].set(fuse_n(p["pi_ego_w"], p["vf_ego_w"]))

    # road objects: input row order is [road_objects(130), stop_signs(6), traffic_lights(84)].
    ro_f = fuse_n(p["pi_ro_w"], p["vf_ro_w"])                            # (220, 128)
    w_ro_head = jnp.zeros((HEAD_K, 2 * ARCH_ROAD_OBJECTS[0]), f32)
    w_ro_head = w_ro_head.at[RO_COLS[0]:RO_COLS[1]].set(ro_f[:ROAD_OBJECTS_END])
    w_ro_tail = jnp.zeros((TAIL_K, 2 * ARCH_ROAD_OBJECTS[0]), f32)
    w_ro_tail = w_ro_tail.at[TL_COLS[0] - TAIL_START:TL_COLS[1] - TAIL_START].set(
        ro_f[ROAD_OBJECTS_END + 6:])                                     # traffic lights
    w_ro_tail = w_ro_tail.at[SS_COLS[0] - TAIL_START:SS_COLS[1] - TAIL_START].set(
        ro_f[ROAD_OBJECTS_END:ROAD_OBJECTS_END + 6])                     # stop signs

    # road graph layer 1: obs cols [140,6640) zero-embedded into 6656 (128-aligned) rows.
    w_rg1 = jnp.zeros((RG_K, 2 * ARCH_ROAD_GRAPH[0]), f32)
    w_rg1 = w_rg1.at[RG_COLS[0]:RG_COLS[1]].set(fuse_n(p["pi_rg1_w"], p["vf_rg1_w"]))

    # road graph layer 2: per-path weights on a leading axis.
    w_rg2 = jnp.stack([p["pi_rg2_w"], p["vf_rg2_w"]])                    # (2, 128, 64)

    # bias / gamma / beta slab, laid out to match the fused (pi|vf) activations.
    def slab_row(suffix):
        fields = []
        for name in ("ego", "ro", "rg1", "rg2"):
            fields.append(p[f"pi_{name}_{suffix}"])
            fields.append(p[f"vf_{name}_{suffix}"])
        fields.append(p[f"out_{suffix}"])
        return jnp.concatenate(fields)

    scal = jnp.stack([slab_row("b"), slab_row("g"), slab_row("beta")])   # (3, 592)
    assert scal.shape == (3, SLAB_W)

    return {
        "w_rg1": w_rg1.astype(bf16),
        "w_ego": w_ego.astype(bf16),
        "w_ro_head": w_ro_head.astype(bf16),
        "w_ro_tail": w_ro_tail.astype(bf16),
        "w_rg2": w_rg2.astype(bf16),
        "w_out": p["out_w"].astype(f32),   # small; kept f32, row-sliced + cast in-kernel
        "scal": scal.astype(f32),
    }


# ----------------------------------------------------------------------------
# Pure-JAX f32 reference of the module forward (for the correctness check).
# ----------------------------------------------------------------------------
def reference_forward(features, p, act="tanh"):
    act_fn = jnp.tanh if act == "tanh" else (lambda v: jnp.maximum(v, 0.0))

    def layer(x, w, b, g, beta):
        y = x @ w + b
        m = jnp.mean(y, axis=-1, keepdims=True)
        v = jnp.mean(jnp.square(y - m), axis=-1, keepdims=True)
        y = (y - m) * jax.lax.rsqrt(v + LN_EPS)
        return act_fn(y * g + beta)

    ego = features[:, :INPUT_DIM_EGO]
    vis = features[:, INPUT_DIM_EGO:]
    ro = vis[:, :ROAD_OBJECTS_END]
    rp = vis[:, ROAD_OBJECTS_END:ROAD_POINTS_END]
    tl = vis[:, ROAD_POINTS_END:TL_END]
    ss = vis[:, TL_END:STOP_SIGN_END]
    ro_cat = jnp.concatenate([ro, ss, tl], axis=1)

    def path(pre):
        e = layer(ego, p[f"{pre}_ego_w"], p[f"{pre}_ego_b"], p[f"{pre}_ego_g"], p[f"{pre}_ego_beta"])
        o = layer(ro_cat, p[f"{pre}_ro_w"], p[f"{pre}_ro_b"], p[f"{pre}_ro_g"], p[f"{pre}_ro_beta"])
        g1 = layer(rp, p[f"{pre}_rg1_w"], p[f"{pre}_rg1_b"], p[f"{pre}_rg1_g"], p[f"{pre}_rg1_beta"])
        g2 = layer(g1, p[f"{pre}_rg2_w"], p[f"{pre}_rg2_b"], p[f"{pre}_rg2_g"], p[f"{pre}_rg2_beta"])
        cat = jnp.concatenate([e, o, g2], axis=1)
        # NOTE: the reference forward_critic also uses policy_out_layer.
        return layer(cat, p["out_w"], p["out_b"], p["out_g"], p["out_beta"])

    return path("pi"), path("vf")


# ----------------------------------------------------------------------------
# Forward pass: ONE fused pallas_call on the raw flat observation.
# ----------------------------------------------------------------------------
def forward(features, packed, act="tanh"):
    features = features.astype(jnp.float32)
    B = features.shape[0]
    if B == 0:
        z = jnp.zeros((0, LAST_LAYER_DIM_PI), jnp.float32)
        return z, z

    # Batch tiling: minimal padding (Pallas masks the partial tail block, so no jnp.pad
    # copy of the big input), <=256 rows per tile, and >=2 grid steps for batches >=64 so
    # both v7x TensorCores get work.
    n_tiles = pl.cdiv(B, 256)
    if n_tiles == 1 and B >= 64:
        n_tiles = 2
    if n_tiles == 1:
        b_tile = B                                   # block == full batch dim: always legal
    else:
        b_tile = _round_up(pl.cdiv(B, n_tiles), 8)
        n_tiles = pl.cdiv(B, b_tile)

    def const_spec(a):
        # full-array block, constant index map -> stays VMEM-resident across grid steps
        return pl.BlockSpec(a.shape, lambda i, _nd=a.ndim: (0,) * _nd)

    w_rg1, w_ego = packed["w_rg1"], packed["w_ego"]
    w_roh, w_rot = packed["w_ro_head"], packed["w_ro_tail"]
    w_rg2, w_out, scal = packed["w_rg2"], packed["w_out"], packed["scal"]

    out = pl.pallas_call(
        functools.partial(_fused_forward_kernel, act=act),
        out_shape=jax.ShapeDtypeStruct((B, OUT_WIDTH), jnp.float32),
        grid=(n_tiles,),
        in_specs=[
            pl.BlockSpec((b_tile, FEATURE_DIM), lambda i: (i, 0)),
            const_spec(w_rg1), const_spec(w_ego), const_spec(w_roh),
            const_spec(w_rot), const_spec(w_rg2), const_spec(w_out),
            const_spec(scal),
        ],
        out_specs=pl.BlockSpec((b_tile, OUT_WIDTH), lambda i: (i, 0)),
        compiler_params=pltpu.CompilerParams(
            dimension_semantics=("parallel",),
            vmem_limit_bytes=40 * 1024 * 1024,
        ),
    )(features, w_rg1, w_ego, w_roh, w_rot, w_rg2, w_out, scal)

    return out[:, :LAST_LAYER_DIM_PI], out[:, LAST_LAYER_DIM_PI:]


if __name__ == "__main__":
    key = jax.random.PRNGKey(0)
    k_param, k_feat = jax.random.split(key)

    params = init_params(k_param)
    packed = pack_params(params)

    batch = 2
    features = jax.random.normal(k_feat, (batch, FEATURE_DIM), dtype=jnp.float32)

    latent_pi, latent_vf = jax.jit(forward)(features, packed)
    jax.block_until_ready((latent_pi, latent_vf))

    assert latent_pi.shape == (batch, LAST_LAYER_DIM_PI)
    assert latent_vf.shape == (batch, LAST_LAYER_DIM_VF)
    assert bool(jnp.all(jnp.isfinite(latent_pi))) and bool(jnp.all(jnp.isfinite(latent_vf)))
    # outputs are post-tanh
    assert bool(jnp.all(jnp.abs(latent_pi) <= 1.0)) and bool(jnp.all(jnp.abs(latent_vf) <= 1.0))

    # Compare against the pure-JAX f32 reference (kernel uses bf16 matmuls -> loose tol).
    ref_pi, ref_vf = reference_forward(features, params)
    err = max(float(jnp.max(jnp.abs(latent_pi - ref_pi))),
              float(jnp.max(jnp.abs(latent_vf - ref_vf))))
    assert err < 0.08, f"kernel/reference mismatch: max abs err {err}"

    print("KERNEL_OK")
</pallas_src>

<mosaic_0001>
module attributes {stable_mosaic.version = 11 : i64} {
  func.func @_fused_forward_kernel(%arg0: i32, %arg1: memref<2x6730xf32, #tpu.memory_space<vmem>>, %arg2: memref<6656x256xbf16, #tpu.memory_space<vmem>>, %arg3: memref<128x16xbf16, #tpu.memory_space<vmem>>, %arg4: memref<256x128xbf16, #tpu.memory_space<vmem>>, %arg5: memref<202x128xbf16, #tpu.memory_space<vmem>>, %arg6: memref<2x128x64xbf16, #tpu.memory_space<vmem>>, %arg7: memref<136x64xf32, #tpu.memory_space<vmem>>, %arg8: memref<3x592xf32, #tpu.memory_space<vmem>>, %arg9: memref<2x128xf32, #tpu.memory_space<vmem>>) attributes {dimension_semantics = [#tpu.dimension_semantics<parallel>], iteration_bounds = array<i64: 1>, scalar_prefetch = 0 : i64, scratch_operands = 0 : i64, tpu.core_type = #tpu.core_type<tc>, window_params = [{transform_indices = @transform_0, window_bounds = array<i64: 2, 6730>}, {pipeline_mode = #tpu.pipeline_mode<synchronous>, transform_indices = @transform_1, window_bounds = array<i64: 6656, 256>}, {pipeline_mode = #tpu.pipeline_mode<synchronous>, transform_indices = @transform_2, window_bounds = array<i64: 128, 16>}, {pipeline_mode = #tpu.pipeline_mode<synchronous>, transform_indices = @transform_3, window_bounds = array<i64: 256, 128>}, {pipeline_mode = #tpu.pipeline_mode<synchronous>, transform_indices = @transform_4, window_bounds = array<i64: 202, 128>}, {pipeline_mode = #tpu.pipeline_mode<synchronous>, transform_indices = @transform_5, window_bounds = array<i64: 2, 128, 64>}, {pipeline_mode = #tpu.pipeline_mode<synchronous>, transform_indices = @transform_6, window_bounds = array<i64: 136, 64>}, {pipeline_mode = #tpu.pipeline_mode<synchronous>, transform_indices = @transform_7, window_bounds = array<i64: 3, 592>}, {transform_indices = @transform_8, window_bounds = array<i64: 2, 128>}]} {
    %c0 = arith.constant 0 : index
    %c0_0 = arith.constant 0 : index
    %0 = vector.load %arg1[%c0, %c0_0] : memref<2x6730xf32, #tpu.memory_space<vmem>>, vector<2x6730xf32>
    %1 = arith.truncf %0 : vector<2x6730xf32> to vector<2x6730xbf16>
    %2 = vector.extract_strided_slice %1 {offsets = [0, 0], sizes = [2, 6656], strides = [1, 1]} : vector<2x6730xbf16> to vector<2x6656xbf16>
    %c0_1 = arith.constant 0 : index
    %c0_2 = arith.constant 0 : index
    %3 = vector.load %arg2[%c0_1, %c0_2] : memref<6656x256xbf16, #tpu.memory_space<vmem>>, vector<6656x256xbf16>
    %cst = arith.constant dense<0.000000e+00> : vector<2x256xf32>
    %4 = tpu.matmul %2, %3, %cst {dimension_numbers = #tpu.dot_dimension_numbers<[1], [0], [0], [1], [0, 0, 1, 1], [], []>} : vector<2x6656xbf16>, vector<6656x256xbf16>, vector<2x256xf32> -> vector<2x256xf32>
    %5 = vector.extract_strided_slice %1 {offsets = [0, 0], sizes = [2, 128], strides = [1, 1]} : vector<2x6730xbf16> to vector<2x128xbf16>
    %c0_3 = arith.constant 0 : index
    %c0_4 = arith.constant 0 : index
    %6 = vector.load %arg3[%c0_3, %c0_4] : memref<128x16xbf16, #tpu.memory_space<vmem>>, vector<128x16xbf16>
    %cst_5 = arith.constant dense<0.000000e+00> : vector<2x16xf32>
    %7 = tpu.matmul %5, %6, %cst_5 {dimension_numbers = #tpu.dot_dimension_numbers<[1], [0], [0], [1], [0, 0, 1, 1], [], []>} : vector<2x128xbf16>, vector<128x16xbf16>, vector<2x16xf32> -> vector<2x16xf32>
    %8 = vector.extract_strided_slice %1 {offsets = [0, 0], sizes = [2, 256], strides = [1, 1]} : vector<2x6730xbf16> to vector<2x256xbf16>
    %c0_6 = arith.constant 0 : index
    %c0_7 = arith.constant 0 : index
    %9 = vector.load %arg4[%c0_6, %c0_7] : memref<256x128xbf16, #tpu.memory_space<vmem>>, vector<256x128xbf16>
    %cst_8 = arith.constant dense<0.000000e+00> : vector<2x128xf32>
    %10 = tpu.matmul %8, %9, %cst_8 {dimension_numbers = #tpu.dot_dimension_numbers<[1], [0], [0], [1], [0, 0, 1, 1], [], []>} : vector<2x256xbf16>, vector<256x128xbf16>, vector<2x128xf32> -> vector<2x128xf32>
    %11 = vector.extract_strided_slice %1 {offsets = [0, 6528], sizes = [2, 202], strides = [1, 1]} : vector<2x6730xbf16> to vector<2x202xbf16>
    %c0_9 = arith.constant 0 : index
    %c0_10 = arith.constant 0 : index
    %12 = vector.load %arg5[%c0_9, %c0_10] : memref<202x128xbf16, #tpu.memory_space<vmem>>, vector<202x128xbf16>
    %cst_11 = arith.constant dense<0.000000e+00> : vector<2x128xf32>
    %13 = tpu.matmul %11, %12, %cst_11 {dimension_numbers = #tpu.dot_dimension_numbers<[1], [0], [0], [1], [0, 0, 1, 1], [], []>} : vector<2x202xbf16>, vector<202x128xbf16>, vector<2x128xf32> -> vector<2x128xf32>
    %14 = arith.addf %10, %13 : vector<2x128xf32>
    %15 = vector.extract_strided_slice %7 {offsets = [0, 0], sizes = [2, 8], strides = [1, 1]} : vector<2x16xf32> to vector<2x8xf32>
    %c0_12 = arith.constant 0 : index
    %c0_13 = arith.constant 0 : index
    %16 = vector.load %arg8[%c0_12, %c0_13] : memref<3x592xf32, #tpu.memory_space<vmem>>, vector<1x8xf32>
    %17 = vector.broadcast %16 : vector<1x8xf32> to vector<2x8xf32>
    %18 = arith.addf %15, %17 : vector<2x8xf32>
    %cst_14 = arith.constant dense<0.000000e+00> : vector<2xf32>
    %19 = vector.multi_reduction <add>, %18, %cst_14 [1] : vector<2x8xf32> to vector<2xf32>
    %20 = vector.shape_cast %19 : vector<2xf32> to vector<2x1xf32>
    %cst_15 = arith.constant 8.000000e+00 : f32
    %21 = vector.broadcast %cst_15 : f32 to vector<2x1xf32>
    %22 = arith.divf %20, %21 : vector<2x1xf32>
    %23 = vector.broadcast %22 : vector<2x1xf32> to vector<2x8xf32>
    %24 = arith.subf %18, %23 : vector<2x8xf32>
    %25 = arith.mulf %24, %24 : vector<2x8xf32>
    %cst_16 = arith.constant dense<0.000000e+00> : vector<2xf32>
    %26 = vector.multi_reduction <add>, %25, %cst_16 [1] : vector<2x8xf32> to vector<2xf32>
    %27 = vector.shape_cast %26 : vector<2xf32> to vector<2x1xf32>
    %cst_17 = arith.constant 8.000000e+00 : f32
    %28 = vector.broadcast %cst_17 : f32 to vector<2x1xf32>
    %29 = arith.divf %27, %28 : vector<2x1xf32>
    %30 = vector.broadcast %22 : vector<2x1xf32> to vector<2x8xf32>
    %31 = arith.subf %18, %30 : vector<2x8xf32>
    %cst_18 = arith.constant 9.99999974E-6 : f32
    %32 = vector.broadcast %cst_18 : f32 to vector<2x1xf32>
    %33 = arith.addf %29, %32 : vector<2x1xf32>
    %34 = math.rsqrt %33 : vector<2x1xf32>
    %35 = vector.broadcast %34 : vector<2x1xf32> to vector<2x8xf32>
    %36 = arith.mulf %31, %35 : vector<2x8xf32>
    %c1 = arith.constant 1 : index
    %c0_19 = arith.constant 0 : index
    %37 = vector.load %arg8[%c1, %c0_19] : memref<3x592xf32, #tpu.memory_space<vmem>>, vector<1x8xf32>
    %38 = vector.broadcast %37 : vector<1x8xf32> to vector<2x8xf32>
    %39 = arith.mulf %36, %38 : vector<2x8xf32>
    %c2 = arith.constant 2 : index
    %c0_20 = arith.constant 0 : index
    %40 = vector.load %arg8[%c2, %c0_20] : memref<3x592xf32, #tpu.memory_space<vmem>>, vector<1x8xf32>
    %41 = vector.broadcast %40 : vector<1x8xf32> to vector<2x8xf32>
    %42 = arith.addf %39, %41 : vector<2x8xf32>
    %43 = math.tanh %42 : vector<2x8xf32>
    %44 = vector.extract_strided_slice %7 {offsets = [0, 8], sizes = [2, 8], strides = [1, 1]} : vector<2x16xf32> to vector<2x8xf32>
    %c0_21 = arith.constant 0 : index
    %c8 = arith.constant 8 : index
    %45 = vector.load %arg8[%c0_21, %c8] : memref<3x592xf32, #tpu.memory_space<vmem>>, vector<1x8xf32>
    %46 = vector.broadcast %45 : vector<1x8xf32> to vector<2x8xf32>
    %47 = arith.addf %44, %46 : vector<2x8xf32>
    %cst_22 = arith.constant dense<0.000000e+00> : vector<2xf32>
    %48 = vector.multi_reduction <add>, %47, %cst_22 [1] : vector<2x8xf32> to vector<2xf32>
    %49 = vector.shape_cast %48 : vector<2xf32> to vector<2x1xf32>
    %cst_23 = arith.constant 8.000000e+00 : f32
    %50 = vector.broadcast %cst_23 : f32 to vector<2x1xf32>
    %51 = arith.divf %49, %50 : vector<2x1xf32>
    %52 = vector.broadcast %51 : vector<2x1xf32> to vector<2x8xf32>
    %53 = arith.subf %47, %52 : vector<2x8xf32>
    %54 = arith.mulf %53, %53 : vector<2x8xf32>
    %cst_24 = arith.constant dense<0.000000e+00> : vector<2xf32>
    %55 = vector.multi_reduction <add>, %54, %cst_24 [1] : vector<2x8xf32> to vector<2xf32>
    %56 = vector.shape_cast %55 : vector<2xf32> to vector<2x1xf32>
    %cst_25 = arith.constant 8.000000e+00 : f32
    %57 = vector.broadcast %cst_25 : f32 to vector<2x1xf32>
    %58 = arith.divf %56, %57 : vector<2x1xf32>
    %59 = vector.broadcast %51 : vector<2x1xf32> to vector<2x8xf32>
    %60 = arith.subf %47, %59 : vector<2x8xf32>
    %cst_26 = arith.constant 9.99999974E-6 : f32
    %61 = vector.broadcast %cst_26 : f32 to vector<2x1xf32>
    %62 = arith.addf %58, %61 : vector<2x1xf32>
    %63 = math.rsqrt %62 : vector<2x1xf32>
    %64 = vector.broadcast %63 : vector<2x1xf32> to vector<2x8xf32>
    %65 = arith.mulf %60, %64 : vector<2x8xf32>
    %c1_27 = arith.constant 1 : index
    %c8_28 = arith.constant 8 : index
    %66 = vector.load %arg8[%c1_27, %c8_28] : memref<3x592xf32, #tpu.memory_space<vmem>>, vector<1x8xf32>
    %67 = vector.broadcast %66 : vector<1x8xf32> to vector<2x8xf32>
    %68 = arith.mulf %65, %67 : vector<2x8xf32>
    %c2_29 = arith.constant 2 : index
    %c8_30 = arith.constant 8 : index
    %69 = vector.load %arg8[%c2_29, %c8_30] : memref<3x592xf32, #tpu.memory_space<vmem>>, vector<1x8xf32>
    %70 = vector.broadcast %69 : vector<1x8xf32> to vector<2x8xf32>
    %71 = arith.addf %68, %70 : vector<2x8xf32>
    %72 = math.tanh %71 : vector<2x8xf32>
    %73 = vector.extract_strided_slice %14 {offsets = [0, 0], sizes = [2, 64], strides = [1, 1]} : vector<2x128xf32> to vector<2x64xf32>
    %c0_31 = arith.constant 0 : index
    %c16 = arith.constant 16 : index
    %74 = vector.load %arg8[%c0_31, %c16] : memref<3x592xf32, #tpu.memory_space<vmem>>, vector<1x64xf32>
    %75 = vector.broadcast %74 : vector<1x64xf32> to vector<2x64xf32>
    %76 = arith.addf %73, %75 : vector<2x64xf32>
    %cst_32 = arith.constant dense<0.000000e+00> : vector<2xf32>
    %77 = vector.multi_reduction <add>, %76, %cst_32 [1] : vector<2x64xf32> to vector<2xf32>
    %78 = vector.shape_cast %77 : vector<2xf32> to vector<2x1xf32>
    %cst_33 = arith.constant 6.400000e+01 : f32
    %79 = vector.broadcast %cst_33 : f32 to vector<2x1xf32>
    %80 = arith.divf %78, %79 : vector<2x1xf32>
    %81 = vector.broadcast %80 : vector<2x1xf32> to vector<2x64xf32>
    %82 = arith.subf %76, %81 : vector<2x64xf32>
    %83 = arith.mulf %82, %82 : vector<2x64xf32>
    %cst_34 = arith.constant dense<0.000000e+00> : vector<2xf32>
    %84 = vector.multi_reduction <add>, %83, %cst_34 [1] : vector<2x64xf32> to vector<2xf32>
    %85 = vector.shape_cast %84 : vector<2xf32> to vector<2x1xf32>
    %cst_35 = arith.constant 6.400000e+01 : f32
    %86 = vector.broadcast %cst_35 : f32 to vector<2x1xf32>
    %87 = arith.divf %85, %86 : vector<2x1xf32>
    %88 = vector.broadcast %80 : vector<2x1xf32> to vector<2x64xf32>
    %89 = arith.subf %76, %88 : vector<2x64xf32>
    %cst_36 = arith.constant 9.99999974E-6 : f32
    %90 = vector.broadcast %cst_36 : f32 to vector<2x1xf32>
    %91 = arith.addf %87, %90 : vector<2x1xf32>
    %92 = math.rsqrt %91 : vector<2x1xf32>
    %93 = vector.broadcast %92 : vector<2x1xf32> to vector<2x64xf32>
    %94 = arith.mulf %89, %93 : vector<2x64xf32>
    %c1_37 = arith.constant 1 : index
    %c16_38 = arith.constant 16 : index
    %95 = vector.load %arg8[%c1_37, %c16_38] : memref<3x592xf32, #tpu.memory_space<vmem>>, vector<1x64xf32>
    %96 = vector.broadcast %95 : vector<1x64xf32> to vector<2x64xf32>
    %97 = arith.mulf %94, %96 : vector<2x64xf32>
    %c2_39 = arith.constant 2 : index
    %c16_40 = arith.constant 16 : index
    %98 = vector.load %arg8[%c2_39, %c16_40] : memref<3x592xf32, #tpu.memory_space<vmem>>, vector<1x64xf32>
    %99 = vector.broadcast %98 : vector<1x64xf32> to vector<2x64xf32>
    %100 = arith.addf %97, %99 : vector<2x64xf32>
    %101 = math.tanh %100 : vector<2x64xf32>
    %102 = vector.extract_strided_slice %14 {offsets = [0, 64], sizes = [2, 64], strides = [1, 1]} : vector<2x128xf32> to vector<2x64xf32>
    %c0_41 = arith.constant 0 : index
    %c80 = arith.constant 80 : index
    %103 = vector.load %arg8[%c0_41, %c80] : memref<3x592xf32, #tpu.memory_space<vmem>>, vector<1x64xf32>
    %104 = vector.broadcast %103 : vector<1x64xf32> to vector<2x64xf32>
    %105 = arith.addf %102, %104 : vector<2x64xf32>
    %cst_42 = arith.constant dense<0.000000e+00> : vector<2xf32>
    %106 = vector.multi_reduction <add>, %105, %cst_42 [1] : vector<2x64xf32> to vector<2xf32>
    %107 = vector.shape_cast %106 : vector<2xf32> to vector<2x1xf32>
    %cst_43 = arith.constant 6.400000e+01 : f32
    %108 = vector.broadcast %cst_43 : f32 to vector<2x1xf32>
    %109 = arith.divf %107, %108 : vector<2x1xf32>
    %110 = vector.broadcast %109 : vector<2x1xf32> to vector<2x64xf32>
    %111 = arith.subf %105, %110 : vector<2x64xf32>
    %112 = arith.mulf %111, %111 : vector<2x64xf32>
    %cst_44 = arith.constant dense<0.000000e+00> : vector<2xf32>
    %113 = vector.multi_reduction <add>, %112, %cst_44 [1] : vector<2x64xf32> to vector<2xf32>
    %114 = vector.shape_cast %113 : vector<2xf32> to vector<2x1xf32>
    %cst_45 = arith.constant 6.400000e+01 : f32
    %115 = vector.broadcast %cst_45 : f32 to vector<2x1xf32>
    %116 = arith.divf %114, %115 : vector<2x1xf32>
    %117 = vector.broadcast %109 : vector<2x1xf32> to vector<2x64xf32>
    %118 = arith.subf %105, %117 : vector<2x64xf32>
    %cst_46 = arith.constant 9.99999974E-6 : f32
    %119 = vector.broadcast %cst_46 : f32 to vector<2x1xf32>
    %120 = arith.addf %116, %119 : vector<2x1xf32>
    %121 = math.rsqrt %120 : vector<2x1xf32>
    %122 = vector.broadcast %121 : vector<2x1xf32> to vector<2x64xf32>
    %123 = arith.mulf %118, %122 : vector<2x64xf32>
    %c1_47 = arith.constant 1 : index
    %c80_48 = arith.constant 80 : index
    %124 = vector.load %arg8[%c1_47, %c80_48] : memref<3x592xf32, #tpu.memory_space<vmem>>, vector<1x64xf32>
    %125 = vector.broadcast %124 : vector<1x64xf32> to vector<2x64xf32>
    %126 = arith.mulf %123, %125 : vector<2x64xf32>
    %c2_49 = arith.constant 2 : index
    %c80_50 = arith.constant 80 : index
    %127 = vector.load %arg8[%c2_49, %c80_50] : memref<3x592xf32, #tpu.memory_space<vmem>>, vector<1x64xf32>
    %128 = vector.broadcast %127 : vector<1x64xf32> to vector<2x64xf32>
    %129 = arith.addf %126, %128 : vector<2x64xf32>
    %130 = math.tanh %129 : vector<2x64xf32>
    %131 = vector.extract_strided_slice %4 {offsets = [0, 0], sizes = [2, 128], strides = [1, 1]} : vector<2x256xf32> to vector<2x128xf32>
    %c0_51 = arith.constant 0 : index
    %c144 = arith.constant 144 : index
    %132 = vector.load %arg8[%c0_51, %c144] : memref<3x592xf32, #tpu.memory_space<vmem>>, vector<1x128xf32>
    %133 = vector.broadcast %132 : vector<1x128xf32> to vector<2x128xf32>
    %134 = arith.addf %131, %133 : vector<2x128xf32>
    %cst_52 = arith.constant dense<0.000000e+00> : vector<2xf32>
    %135 = vector.multi_reduction <add>, %134, %cst_52 [1] : vector<2x128xf32> to vector<2xf32>
    %136 = vector.shape_cast %135 : vector<2xf32> to vector<2x1xf32>
    %cst_53 = arith.constant 1.280000e+02 : f32
    %137 = vector.broadcast %cst_53 : f32 to vector<2x1xf32>
    %138 = arith.divf %136, %137 : vector<2x1xf32>
    %139 = vector.broadcast %138 : vector<2x1xf32> to vector<2x128xf32>
    %140 = arith.subf %134, %139 : vector<2x128xf32>
    %141 = arith.mulf %140, %140 : vector<2x128xf32>
    %cst_54 = arith.constant dense<0.000000e+00> : vector<2xf32>
    %142 = vector.multi_reduction <add>, %141, %cst_54 [1] : vector<2x128xf32> to vector<2xf32>
    %143 = vector.shape_cast %142 : vector<2xf32> to vector<2x1xf32>
    %cst_55 = arith.constant 1.280000e+02 : f32
    %144 = vector.broadcast %cst_55 : f32 to vector<2x1xf32>
    %145 = arith.divf %143, %144 : vector<2x1xf32>
    %146 = vector.broadcast %138 : vector<2x1xf32> to vector<2x128xf32>
    %147 = arith.subf %134, %146 : vector<2x128xf32>
    %cst_56 = arith.constant 9.99999974E-6 : f32
    %148 = vector.broadcast %cst_56 : f32 to vector<2x1xf32>
    %149 = arith.addf %145, %148 : vector<2x1xf32>
    %150 = math.rsqrt %149 : vector<2x1xf32>
    %151 = vector.broadcast %150 : vector<2x1xf32> to vector<2x128xf32>
    %152 = arith.mulf %147, %151 : vector<2x128xf32>
    %c1_57 = arith.constant 1 : index
    %c144_58 = arith.constant 144 : index
    %153 = vector.load %arg8[%c1_57, %c144_58] : memref<3x592xf32, #tpu.memory_space<vmem>>, vector<1x128xf32>
    %154 = vector.broadcast %153 : vector<1x128xf32> to vector<2x128xf32>
    %155 = arith.mulf %152, %154 : vector<2x128xf32>
    %c2_59 = arith.constant 2 : index
    %c144_60 = arith.constant 144 : index
    %156 = vector.load %arg8[%c2_59, %c144_60] : memref<3x592xf32, #tpu.memory_space<vmem>>, vector<1x128xf32>
    %157 = vector.broadcast %156 : vector<1x128xf32> to vector<2x128xf32>
    %158 = arith.addf %155, %157 : vector<2x128xf32>
    %159 = math.tanh %158 : vector<2x128xf32>
    %160 = vector.extract_strided_slice %4 {offsets = [0, 128], sizes = [2, 128], strides = [1, 1]} : vector<2x256xf32> to vector<2x128xf32>
    %c0_61 = arith.constant 0 : index
    %c272 = arith.constant 272 : index
    %161 = vector.load %arg8[%c0_61, %c272] : memref<3x592xf32, #tpu.memory_space<vmem>>, vector<1x128xf32>
    %162 = vector.broadcast %161 : vector<1x128xf32> to vector<2x128xf32>
    %163 = arith.addf %160, %162 : vector<2x128xf32>
    %cst_62 = arith.constant dense<0.000000e+00> : vector<2xf32>
    %164 = vector.multi_reduction <add>, %163, %cst_62 [1] : vector<2x128xf32> to vector<2xf32>
    %165 = vector.shape_cast %164 : vector<2xf32> to vector<2x1xf32>
    %cst_63 = arith.constant 1.280000e+02 : f32
    %166 = vector.broadcast %cst_63 : f32 to vector<2x1xf32>
    %167 = arith.divf %165, %166 : vector<2x1xf32>
    %168 = vector.broadcast %167 : vector<2x1xf32> to vector<2x128xf32>
    %169 = arith.subf %163, %168 : vector<2x128xf32>
    %170 = arith.mulf %169, %169 : vector<2x128xf32>
    %cst_64 = arith.constant dense<0.000000e+00> : vector<2xf32>
    %171 = vector.multi_reduction <add>, %170, %cst_64 [1] : vector<2x128xf32> to vector<2xf32>
    %172 = vector.shape_cast %171 : vector<2xf32> to vector<2x1xf32>
    %cst_65 = arith.constant 1.280000e+02 : f32
    %173 = vector.broadcast %cst_65 : f32 to vector<2x1xf32>
    %174 = arith.divf %172, %173 : vector<2x1xf32>
    %175 = vector.broadcast %167 : vector<2x1xf32> to vector<2x128xf32>
    %176 = arith.subf %163, %175 : vector<2x128xf32>
    %cst_66 = arith.constant 9.99999974E-6 : f32
    %177 = vector.broadcast %cst_66 : f32 to vector<2x1xf32>
    %178 = arith.addf %174, %177 : vector<2x1xf32>
    %179 = math.rsqrt %178 : vector<2x1xf32>
    %180 = vector.broadcast %179 : vector<2x1xf32> to vector<2x128xf32>
    %181 = arith.mulf %176, %180 : vector<2x128xf32>
    %c1_67 = arith.constant 1 : index
    %c272_68 = arith.constant 272 : index
    %182 = vector.load %arg8[%c1_67, %c272_68] : memref<3x592xf32, #tpu.memory_space<vmem>>, vector<1x128xf32>
    %183 = vector.broadcast %182 : vector<1x128xf32> to vector<2x128xf32>
    %184 = arith.mulf %181, %183 : vector<2x128xf32>
    %c2_69 = arith.constant 2 : index
    %c272_70 = arith.constant 272 : index
    %185 = vector.load %arg8[%c2_69, %c272_70] : memref<3x592xf32, #tpu.memory_space<vmem>>, vector<1x128xf32>
    %186 = vector.broadcast %185 : vector<1x128xf32> to vector<2x128xf32>
    %187 = arith.addf %184, %186 : vector<2x128xf32>
    %188 = math.tanh %187 : vector<2x128xf32>
    %189 = arith.truncf %159 : vector<2x128xf32> to vector<2x128xbf16>
    %c0_71 = arith.constant 0 : index
    %c0_72 = arith.constant 0 : index
    %c0_73 = arith.constant 0 : index
    %190 = vector.load %arg6[%c0_71, %c0_72, %c0_73] : memref<2x128x64xbf16, #tpu.memory_space<vmem>>, vector<1x128x64xbf16>
    %191 = vector.shape_cast %190 : vector<1x128x64xbf16> to vector<128x64xbf16>
    %cst_74 = arith.constant dense<0.000000e+00> : vector<2x64xf32>
    %192 = tpu.matmul %189, %191, %cst_74 {dimension_numbers = #tpu.dot_dimension_numbers<[1], [0], [0], [1], [0, 0, 1, 1], [], []>} : vector<2x128xbf16>, vector<128x64xbf16>, vector<2x64xf32> -> vector<2x64xf32>
    %c0_75 = arith.constant 0 : index
    %c400 = arith.constant 400 : index
    %193 = vector.load %arg8[%c0_75, %c400] : memref<3x592xf32, #tpu.memory_space<vmem>>, vector<1x64xf32>
    %194 = vector.broadcast %193 : vector<1x64xf32> to vector<2x64xf32>
    %195 = arith.addf %192, %194 : vector<2x64xf32>
    %cst_76 = arith.constant dense<0.000000e+00> : vector<2xf32>
    %196 = vector.multi_reduction <add>, %195, %cst_76 [1] : vector<2x64xf32> to vector<2xf32>
    %197 = vector.shape_cast %196 : vector<2xf32> to vector<2x1xf32>
    %cst_77 = arith.constant 6.400000e+01 : f32
    %198 = vector.broadcast %cst_77 : f32 to vector<2x1xf32>
    %199 = arith.divf %197, %198 : vector<2x1xf32>
    %200 = vector.broadcast %199 : vector<2x1xf32> to vector<2x64xf32>
    %201 = arith.subf %195, %200 : vector<2x64xf32>
    %202 = arith.mulf %201, %201 : vector<2x64xf32>
    %cst_78 = arith.constant dense<0.000000e+00> : vector<2xf32>
    %203 = vector.multi_reduction <add>, %202, %cst_78 [1] : vector<2x64xf32> to vector<2xf32>
    %204 = vector.shape_cast %203 : vector<2xf32> to vector<2x1xf32>
    %cst_79 = arith.constant 6.400000e+01 : f32
    %205 = vector.broadcast %cst_79 : f32 to vector<2x1xf32>
    %206 = arith.divf %204, %205 : vector<2x1xf32>
    %207 = vector.broadcast %199 : vector<2x1xf32> to vector<2x64xf32>
    %208 = arith.subf %195, %207 : vector<2x64xf32>
    %cst_80 = arith.constant 9.99999974E-6 : f32
    %209 = vector.broadcast %cst_80 : f32 to vector<2x1xf32>
    %210 = arith.addf %206, %209 : vector<2x1xf32>
    %211 = math.rsqrt %210 : vector<2x1xf32>
    %212 = vector.broadcast %211 : vector<2x1xf32> to vector<2x64xf32>
    %213 = arith.mulf %208, %212 : vector<2x64xf32>
    %c1_81 = arith.constant 1 : index
    %c400_82 = arith.constant 400 : index
    %214 = vector.load %arg8[%c1_81, %c400_82] : memref<3x592xf32, #tpu.memory_space<vmem>>, vector<1x64xf32>
    %215 = vector.broadcast %214 : vector<1x64xf32> to vector<2x64xf32>
    %216 = arith.mulf %213, %215 : vector<2x64xf32>
    %c2_83 = arith.constant 2 : index
    %c400_84 = arith.constant 400 : index
    %217 = vector.load %arg8[%c2_83, %c400_84] : memref<3x592xf32, #tpu.memory_space<vmem>>, vector<1x64xf32>
    %218 = vector.broadcast %217 : vector<1x64xf32> to vector<2x64xf32>
    %219 = arith.addf %216, %218 : vector<2x64xf32>
    %220 = math.tanh %219 : vector<2x64xf32>
    %221 = arith.truncf %188 : vector<2x128xf32> to vector<2x128xbf16>
    %c1_85 = arith.constant 1 : index
    %c0_86 = arith.constant 0 : index
    %c0_87 = arith.constant 0 : index
    %222 = vector.load %arg6[%c1_85, %c0_86, %c0_87] : memref<2x128x64xbf16, #tpu.memory_space<vmem>>, vector<1x128x64xbf16>
    %223 = vector.shape_cast %222 : vector<1x128x64xbf16> to vector<128x64xbf16>
    %cst_88 = arith.constant dense<0.000000e+00> : vector<2x64xf32>
    %224 = tpu.matmul %221, %223, %cst_88 {dimension_numbers = #tpu.dot_dimension_numbers<[1], [0], [0], [1], [0, 0, 1, 1], [], []>} : vector<2x128xbf16>, vector<128x64xbf16>, vector<2x64xf32> -> vector<2x64xf32>
    %c0_89 = arith.constant 0 : index
    %c464 = arith.constant 464 : index
    %225 = vector.load %arg8[%c0_89, %c464] : memref<3x592xf32, #tpu.memory_space<vmem>>, vector<1x64xf32>
    %226 = vector.broadcast %225 : vector<1x64xf32> to vector<2x64xf32>
    %227 = arith.addf %224, %226 : vector<2x64xf32>
    %cst_90 = arith.constant dense<0.000000e+00> : vector<2xf32>
    %228 = vector.multi_reduction <add>, %227, %cst_90 [1] : vector<2x64xf32> to vector<2xf32>
    %229 = vector.shape_cast %228 : vector<2xf32> to vector<2x1xf32>
    %cst_91 = arith.constant 6.400000e+01 : f32
    %230 = vector.broadcast %cst_91 : f32 to vector<2x1xf32>
    %231 = arith.divf %229, %230 : vector<2x1xf32>
    %232 = vector.broadcast %231 : vector<2x1xf32> to vector<2x64xf32>
    %233 = arith.subf %227, %232 : vector<2x64xf32>
    %234 = arith.mulf %233, %233 : vector<2x64xf32>
    %cst_92 = arith.constant dense<0.000000e+00> : vector<2xf32>
    %235 = vector.multi_reduction <add>, %234, %cst_92 [1] : vector<2x64xf32> to vector<2xf32>
    %236 = vector.shape_cast %235 : vector<2xf32> to vector<2x1xf32>
    %cst_93 = arith.constant 6.400000e+01 : f32
    %237 = vector.broadcast %cst_93 : f32 to vector<2x1xf32>
    %238 = arith.divf %236, %237 : vector<2x1xf32>
    %239 = vector.broadcast %231 : vector<2x1xf32> to vector<2x64xf32>
    %240 = arith.subf %227, %239 : vector<2x64xf32>
    %cst_94 = arith.constant 9.99999974E-6 : f32
    %241 = vector.broadcast %cst_94 : f32 to vector<2x1xf32>
    %242 = arith.addf %238, %241 : vector<2x1xf32>
    %243 = math.rsqrt %242 : vector<2x1xf32>
    %244 = vector.broadcast %243 : vector<2x1xf32> to vector<2x64xf32>
    %245 = arith.mulf %240, %244 : vector<2x64xf32>
    %c1_95 = arith.constant 1 : index
    %c464_96 = arith.constant 464 : index
    %246 = vector.load %arg8[%c1_95, %c464_96] : memref<3x592xf32, #tpu.memory_space<vmem>>, vector<1x64xf32>
    %247 = vector.broadcast %246 : vector<1x64xf32> to vector<2x64xf32>
    %248 = arith.mulf %245, %247 : vector<2x64xf32>
    %c2_97 = arith.constant 2 : index
    %c464_98 = arith.constant 464 : index
    %249 = vector.load %arg8[%c2_97, %c464_98] : memref<3x592xf32, #tpu.memory_space<vmem>>, vector<1x64xf32>
    %250 = vector.broadcast %249 : vector<1x64xf32> to vector<2x64xf32>
    %251 = arith.addf %248, %250 : vector<2x64xf32>
    %252 = math.tanh %251 : vector<2x64xf32>
    %253 = tpu.concatenate %43, %72 in 0 : vector<2x8xf32>, vector<2x8xf32> -> vector<4x8xf32>
    %254 = arith.truncf %253 : vector<4x8xf32> to vector<4x8xbf16>
    %255 = tpu.concatenate %101, %130 in 0 : vector<2x64xf32>, vector<2x64xf32> -> vector<4x64xf32>
    %256 = arith.truncf %255 : vector<4x64xf32> to vector<4x64xbf16>
    %257 = tpu.concatenate %220, %252 in 0 : vector<2x64xf32>, vector<2x64xf32> -> vector<4x64xf32>
    %258 = arith.truncf %257 : vector<4x64xf32> to vector<4x64xbf16>
    %c0_99 = arith.constant 0 : index
    %c0_100 = arith.constant 0 : index
    %259 = vector.load %arg7[%c0_99, %c0_100] : memref<136x64xf32, #tpu.memory_space<vmem>>, vector<8x64xf32>
    %260 = arith.truncf %259 : vector<8x64xf32> to vector<8x64xbf16>
    %cst_101 = arith.constant dense<0.000000e+00> : vector<4x64xf32>
    %261 = tpu.matmul %254, %260, %cst_101 {dimension_numbers = #tpu.dot_dimension_numbers<[1], [0], [0], [1], [0, 0, 1, 1], [], []>} : vector<4x8xbf16>, vector<8x64xbf16>, vector<4x64xf32> -> vector<4x64xf32>
    %c8_102 = arith.constant 8 : index
    %c0_103 = arith.constant 0 : index
    %262 = vector.load %arg7[%c8_102, %c0_103] : memref<136x64xf32, #tpu.memory_space<vmem>>, vector<64x64xf32>
    %263 = arith.truncf %262 : vector<64x64xf32> to vector<64x64xbf16>
    %cst_104 = arith.constant dense<0.000000e+00> : vector<4x64xf32>
    %264 = tpu.matmul %256, %263, %cst_104 {dimension_numbers = #tpu.dot_dimension_numbers<[1], [0], [0], [1], [0, 0, 1, 1], [], []>} : vector<4x64xbf16>, vector<64x64xbf16>, vector<4x64xf32> -> vector<4x64xf32>
    %265 = arith.addf %261, %264 : vector<4x64xf32>
    %c72 = arith.constant 72 : index
    %c0_105 = arith.constant 0 : index
    %266 = vector.load %arg7[%c72, %c0_105] : memref<136x64xf32, #tpu.memory_space<vmem>>, vector<64x64xf32>
    %267 = arith.truncf %266 : vector<64x64xf32> to vector<64x64xbf16>
    %cst_106 = arith.constant dense<0.000000e+00> : vector<4x64xf32>
    %268 = tpu.matmul %258, %267, %cst_106 {dimension_numbers = #tpu.dot_dimension_numbers<[1], [0], [0], [1], [0, 0, 1, 1], [], []>} : vector<4x64xbf16>, vector<64x64xbf16>, vector<4x64xf32> -> vector<4x64xf32>
    %269 = arith.addf %265, %268 : vector<4x64xf32>
    %c0_107 = arith.constant 0 : index
    %c528 = arith.constant 528 : index
    %270 = vector.load %arg8[%c0_107, %c528] : memref<3x592xf32, #tpu.memory_space<vmem>>, vector<1x64xf32>
    %271 = vector.broadcast %270 : vector<1x64xf32> to vector<4x64xf32>
    %272 = arith.addf %269, %271 : vector<4x64xf32>
    %cst_108 = arith.constant dense<0.000000e+00> : vector<4xf32>
    %273 = vector.multi_reduction <add>, %272, %cst_108 [1] : vector<4x64xf32> to vector<4xf32>
    %274 = vector.shape_cast %273 : vector<4xf32> to vector<4x1xf32>
    %cst_109 = arith.constant 6.400000e+01 : f32
    %275 = vector.broadcast %cst_109 : f32 to vector<4x1xf32>
    %276 = arith.divf %274, %275 : vector<4x1xf32>
    %277 = vector.broadcast %276 : vector<4x1xf32> to vector<4x64xf32>
    %278 = arith.subf %272, %277 : vector<4x64xf32>
    %279 = arith.mulf %278, %278 : vector<4x64xf32>
    %cst_110 = arith.constant dense<0.000000e+00> : vector<4xf32>
    %280 = vector.multi_reduction <add>, %279, %cst_110 [1] : vector<4x64xf32> to vector<4xf32>
    %281 = vector.shape_cast %280 : vector<4xf32> to vector<4x1xf32>
    %cst_111 = arith.constant 6.400000e+01 : f32
    %282 = vector.broadcast %cst_111 : f32 to vector<4x1xf32>
    %283 = arith.divf %281, %282 : vector<4x1xf32>
    %284 = vector.broadcast %276 : vector<4x1xf32> to vector<4x64xf32>
    %285 = arith.subf %272, %284 : vector<4x64xf32>
    %cst_112 = arith.constant 9.99999974E-6 : f32
    %286 = vector.broadcast %cst_112 : f32 to vector<4x1xf32>
    %287 = arith.addf %283, %286 : vector<4x1xf32>
    %288 = math.rsqrt %287 : vector<4x1xf32>
    %289 = vector.broadcast %288 : vector<4x1xf32> to vector<4x64xf32>
    %290 = arith.mulf %285, %289 : vector<4x64xf32>
    %c1_113 = arith.constant 1 : index
    %c528_114 = arith.constant 528 : index
    %291 = vector.load %arg8[%c1_113, %c528_114] : memref<3x592xf32, #tpu.memory_space<vmem>>, vector<1x64xf32>
    %292 = vector.broadcast %291 : vector<1x64xf32> to vector<4x64xf32>
    %293 = arith.mulf %290, %292 : vector<4x64xf32>
    %c2_115 = arith.constant 2 : index
    %c528_116 = arith.constant 528 : index
    %294 = vector.load %arg8[%c2_115, %c528_116] : memref<3x592xf32, #tpu.memory_space<vmem>>, vector<1x64xf32>
    %295 = vector.broadcast %294 : vector<1x64xf32> to vector<4x64xf32>
    %296 = arith.addf %293, %295 : vector<4x64xf32>
    %297 = math.tanh %296 : vector<4x64xf32>
    %298 = vector.extract_strided_slice %297 {offsets = [0, 0], sizes = [2, 64], strides = [1, 1]} : vector<4x64xf32> to vector<2x64xf32>
    %c0_117 = arith.constant 0 : index
    %c0_118 = arith.constant 0 : index
    %299 = vector.load %arg9[%c0_117, %c0_118] : memref<2x128xf32, #tpu.memory_space<vmem>>, vector<2x64xf32>
    tpu.vector_store %arg9[%c0_117, %c0_118], %298 {strides = array<i32>} : memref<2x128xf32, #tpu.memory_space<vmem>>, vector<2x64xf32>,
    %300 = vector.extract_strided_slice %297 {offsets = [2, 0], sizes = [2, 64], strides = [1, 1]} : vector<4x64xf32> to vector<2x64xf32>
    %c0_119 = arith.constant 0 : index
    %c64 = arith.constant 64 : index
    %301 = vector.load %arg9[%c0_119, %c64] : memref<2x128xf32, #tpu.memory_space<vmem>>, vector<2x64xf32>
    tpu.vector_store %arg9[%c0_119, %c64], %300 {strides = array<i32>} : memref<2x128xf32, #tpu.memory_space<vmem>>, vector<2x64xf32>,
    return
  }
  func.func @transform_0(%arg0: i32) -> (i32, i32) {
    %c0_i32 = arith.constant 0 : i32
    %c0_i32_0 = arith.constant 0 : i32
    return %arg0, %c0_i32 : i32, i32
  }
  func.func @transform_1(%arg0: i32) -> (i32, i32) {
    %c0_i32 = arith.constant 0 : i32
    %c0_i32_0 = arith.constant 0 : i32
    %c0_i32_1 = arith.constant 0 : i32
    return %c0_i32, %c0_i32_0 : i32, i32
  }
  func.func @transform_2(%arg0: i32) -> (i32, i32) {
    %c0_i32 = arith.constant 0 : i32
    %c0_i32_0 = arith.constant 0 : i32
    %c0_i32_1 = arith.constant 0 : i32
    return %c0_i32, %c0_i32_0 : i32, i32
  }
  func.func @transform_3(%arg0: i32) -> (i32, i32) {
    %c0_i32 = arith.constant 0 : i32
    %c0_i32_0 = arith.constant 0 : i32
    %c0_i32_1 = arith.constant 0 : i32
    return %c0_i32, %c0_i32_0 : i32, i32
  }
  func.func @transform_4(%arg0: i32) -> (i32, i32) {
    %c0_i32 = arith.constant 0 : i32
    %c0_i32_0 = arith.constant 0 : i32
    %c0_i32_1 = arith.constant 0 : i32
    return %c0_i32, %c0_i32_0 : i32, i32
  }
  func.func @transform_5(%arg0: i32) -> (i32, i32, i32) {
    %c0_i32 = arith.constant 0 : i32
    %c0_i32_0 = arith.constant 0 : i32
    %c0_i32_1 = arith.constant 0 : i32
    %c0_i32_2 = arith.constant 0 : i32
    return %c0_i32, %c0_i32_0, %c0_i32_1 : i32, i32, i32
  }
  func.func @transform_6(%arg0: i32) -> (i32, i32) {
    %c0_i32 = arith.constant 0 : i32
    %c0_i32_0 = arith.constant 0 : i32
    %c0_i32_1 = arith.constant 0 : i32
    return %c0_i32, %c0_i32_0 : i32, i32
  }
  func.func @transform_7(%arg0: i32) -> (i32, i32) {
    %c0_i32 = arith.constant 0 : i32
    %c0_i32_0 = arith.constant 0 : i32
    %c0_i32_1 = arith.constant 0 : i32
    return %c0_i32, %c0_i32_0 : i32, i32
  }
  func.func @transform_8(%arg0: i32) -> (i32, i32) {
    %c0_i32 = arith.constant 0 : i32
    %c0_i32_0 = arith.constant 0 : i32
    return %arg0, %c0_i32 : i32, i32
  }
}

</mosaic_0001>

<bundles_post_ra>
// kernel: forward.1
= control target key start
LH: loop header
LB: loop body
LE: loop exit
PB: predicated region body
PF: predicated region fallthrough
CT: control target
= control target key end

     0   :  { %13 = vsyncpa [#allocation3], 0  ;;  %s11258_s0 = inlined_call_operand.hbm [shape: f32[2,6730], index: 0, kind: input, shape index: {}]   ;;  %s11259_s1 = inlined_call_operand.hbm [shape: bf16[6656,256], index: 1, kind: input, shape index: {}]   ;;  %s11260_s2 = inlined_call_operand.vmem [shape: bf16[128,16], index: 2, kind: input, shape index: {}]   ;;  %s11261_s3 = inlined_call_operand.hbm [shape: bf16[256,128], index: 3, kind: input, shape index: {}]   ;;  %s11262_s4 = inlined_call_operand.hbm [shape: bf16[202,128], index: 4, kind: input, shape index: {}]   ;;  %s11263_s5 = inlined_call_operand.vmem [shape: bf16[2,128,64], index: 5, kind: input, shape index: {}]   ;;  %s11264_s6 = inlined_call_operand.vmem [shape: f32[136,64], index: 6, kind: input, shape index: {}]   ;;  %s11265_s7 = inlined_call_operand.hbm [shape: f32[3,592], index: 7, kind: input, shape index: {}]   ;;  %s11266_s8 = inlined_call_operand.vmem [shape: f32[2,128], index: 8, kind: output, shape index: {}]  }
   0x1   :  { %14 = vsyncpa [#allocation5], 0 }
   0x2   :  { %15 = vsyncpa [#allocation8], 0  ;;  %s10483_s27 = smov [#allocation4]   ;;  %s10367_s9 = scalar_lea.hbm %s11259_s1, 106496 }
   0x3   :  { %s31_s28 = sshll.u32 %s10483_s27, 4  ;;  %p10368_p0 = scmp.ne.s32.totalorder %s11259_s1, %s10367_s9  ;;  %s32_s28 = int_to_ptr.vmem [resolvable:$true] %s31_s28 }
   0x4   :  { %p10371_p1 = scmp.lt.u32.totalorder %s10367_s9, %s11259_s1 }
   0x6   :  { %p10373_p2 = pnand %p10371_p1, %p10368_p0 }
   0x8   :  { %10376 = shalt.err (!%p10373_p2)
}
   0x9   :  { %s10377_s14 = scalar_lea.vmem %s32_s28, 106496  ;;  %p10382_p4 = scmp.lt.s32.totalorder %s32_s28, %s32_s28 }
   0xa   :  { %p10378_p3 = scmp.ne.s32.totalorder %s32_s28, %s10377_s14  ;;  %p10383_p5 = scmp.lt.s32.totalorder %s10377_s14, %s10377_s14 }
   0xc   :  { %p10384_p6 = por %p10383_p5, %p10382_p4 }
   0xe   :  { %p10385_p7 = pnand %p10384_p6, %p10378_p3 }
  0x10   :  { %10388 = shalt.err (!%p10385_p7)
}
  0x11   :  { %s10484_s15 = smov 128   ;;  %s10485_s16 = smov 8  }
  0x12   :  { %37 = dma.hbm_to_vmem [thread:$0]  %s11259_s1, 106496, %s32_s28, [#allocation5], %s10484_s15, %s10484_s15, %s10485_s16  }
  0x13   :  { %s10486_s19 = smov [#allocation7]   ;;  %s10487_s21 = smov [#allocation2]  }
  0x14   :  { %s57_s20 = sshll.u32 %s10486_s19, 4  ;;  %s22_s22 = sshll.u32 %s10487_s21, 4  ;;  %s58_s20 = int_to_ptr.vmem [resolvable:$true] %s57_s20  ;;  %s23_s22 = int_to_ptr.vmem [resolvable:$true] %s22_s22 }
  0x15   :  { %s10389_s25 = scalar_lea.hbm %s11262_s4, 1664 }
  0x16   :  { %p10390_p8 = scmp.ne.s32.totalorder %s11262_s4, %s10389_s25  ;;  %p10393_p9 = scmp.lt.u32.totalorder %s10389_s25, %s11262_s4 }
  0x18   :  { %p10395_p10 = pnand %p10393_p9, %p10390_p8 }
  0x1a   :  { %10398 = shalt.err (!%p10395_p10)
}
  0x1b   :  { %s10399_s1 = scalar_lea.vmem %s58_s20, 1664  ;;  %p10404_p12 = scmp.lt.s32.totalorder %s58_s20, %s58_s20 }
  0x1c   :  { %p10400_p11 = scmp.ne.s32.totalorder %s58_s20, %s10399_s1  ;;  %p10405_p13 = scmp.lt.s32.totalorder %s10399_s1, %s10399_s1 }
  0x1e   :  { %p10406_p0 = por %p10405_p13, %p10404_p12 }
  0x20   :  { %p10407_p1 = pnand %p10406_p0, %p10400_p11 }
  0x22   :  { %10410 = shalt.err (!%p10407_p1)
}
  0x23   :  { %s10488_s28 = smov 64   ;;  %s10489_s9 = smov 4  }
  0x24   :  { %63 = dma.hbm_to_vmem [thread:$0]  %s11262_s4, 1664, %s58_s20, [#allocation8], %s10488_s28, %s10488_s28, %s10489_s9  }
  0x25   :  { %s10411_s14 = scalar_lea.hbm %s11258_s0, 1696 }
  0x26   :  { %p10412_p2 = scmp.ne.s32.totalorder %s11258_s0, %s10411_s14  ;;  %p10415_p3 = scmp.lt.u32.totalorder %s10411_s14, %s11258_s0 }
  0x28   :  { %p10417_p4 = pnand %p10415_p3, %p10412_p2 }
  0x2a   :  { %10420 = shalt.err (!%p10417_p4)
}
  0x2b   :  { %s10421_s19 = scalar_lea.vmem %s23_s22, 1696  ;;  %p10426_p6 = scmp.lt.s32.totalorder %s23_s22, %s23_s22 }
  0x2c   :  { %p10422_p5 = scmp.ne.s32.totalorder %s23_s22, %s10421_s19  ;;  %p10427_p7 = scmp.lt.s32.totalorder %s10421_s19, %s10421_s19 }
  0x2e   :  { %p10428_p8 = por %p10427_p7, %p10426_p6 }
  0x30   :  { %p10429_p9 = pnand %p10428_p8, %p10422_p5 }
  0x32   :  { %10432 = shalt.err (!%p10429_p9)
}
  0x33   :  { %25 = dma.hbm_to_vmem [thread:$0]  %s11258_s0, 1696, %s23_s22, [#allocation3]  }
  0x34   :  { %s10490_s21 = smov [#allocation6]   ;;  %s10491_s24 = smov [#allocation9]  }
  0x35   :  { %s45_s23 = sshll.u32 %s10490_s21, 4  ;;  %s74_s25 = sshll.u32 %s10491_s24, 4  ;;  %s46_s23 = int_to_ptr.vmem [resolvable:$true] %s45_s23  ;;  %s75_s25 = int_to_ptr.vmem [resolvable:$true] %s74_s25 }
  0x36   :  { %s10433_s29 = scalar_lea.hbm %s11261_s3, 2048 }
  0x37   :  { %p10434_p10 = scmp.ne.s32.totalorder %s11261_s3, %s10433_s29  ;;  %p10437_p11 = scmp.lt.u32.totalorder %s10433_s29, %s11261_s3 }
  0x39   :  { %p10439_p12 = pnand %p10437_p11, %p10434_p10 }
  0x3b   :  { %10442 = shalt.err (!%p10439_p12)
}
  0x3c   :  { %s10443_s0 = scalar_lea.vmem %s46_s23, 2048  ;;  %p10448_p0 = scmp.lt.s32.totalorder %s46_s23, %s46_s23 }
  0x3d   :  { %p10444_p13 = scmp.ne.s32.totalorder %s46_s23, %s10443_s0  ;;  %p10449_p1 = scmp.lt.s32.totalorder %s10443_s0, %s10443_s0 }
  0x3f   :  { %p10450_p2 = por %p10449_p1, %p10448_p0 }
  0x41   :  { %p10451_p3 = pnand %p10450_p2, %p10444_p13 }
  0x43   :  { %10454 = shalt.err (!%p10451_p3)
}
  0x44   :  { %51 = dma.hbm_to_vmem [thread:$0]  %s11261_s3, 2048, %s46_s23, [#allocation5], %s10488_s28, %s10488_s28, %s10489_s9  }
  0x45   :  { %s10455_s15 = scalar_lea.hbm %s11265_s7, 320 }
  0x46   :  { %p10456_p4 = scmp.ne.s32.totalorder %s11265_s7, %s10455_s15  ;;  %p10459_p5 = scmp.lt.u32.totalorder %s10455_s15, %s11265_s7 }
  0x48   :  { %p10461_p6 = pnand %p10459_p5, %p10456_p4 }
  0x4a   :  { %10464 = shalt.err (!%p10461_p6)
}
  0x4b   :  { %s10465_s4 = scalar_lea.vmem %s75_s25, 320  ;;  %p10470_p8 = scmp.lt.s32.totalorder %s75_s25, %s75_s25 }
  0x4c   :  { %p10466_p7 = scmp.ne.s32.totalorder %s75_s25, %s10465_s4  ;;  %p10471_p9 = scmp.lt.s32.totalorder %s10465_s4, %s10465_s4 }
  0x4e   :  { %p10472_p10 = por %p10471_p9, %p10470_p8 }
  0x50   :  { %p10473_p11 = pnand %p10472_p10, %p10466_p7 }
  0x52   :  { %10476 = shalt.err (!%p10473_p11)
}
  0x53   :  { %77 = dma.hbm_to_vmem [thread:$0]  %s11265_s7, 320, %s75_s25, [#allocation8]  }
  0x54   :  { %10477 = dma.done.wait [#allocation3], 1696  }
  0x55   :  { %10478 = vsyncadd [#allocation3], 4294965600 }
  0x56   :  { %10479 = dma.done.wait [#allocation5], 108544  }
  0x57   :  { %10480 = vsyncadd [#allocation5], 4294858752 }
  0x58   :  { %10481 = dma.done.wait [#allocation8], 1984  }
  0x59   :  { %10482 = vsyncadd [#allocation8], 4294965312  ;;  %v9017_v0 = vld [vmem:[#allocation4 + $0x4] ss:$8 sps:$4 sm:$0xff]   ;;  %v9021_v2 = vld [vmem:[#allocation4] ss:$8 sps:$4 sm:$0xff]   ;;  %v126_v38 = vlaneseq }
  0x5a   :  { %v9019_v1 = vld [vmem:[#allocation4 + $0x104] ss:$8 sps:$4 sm:$0xff]   ;;  %5448 = vmatprep.subr.bf16.mxu0 %v9017_v0  ;;  %v9022_v3 = vld [vmem:[#allocation4 + $0x100] ss:$8 sps:$4 sm:$0xff]   ;;  %v9023_v4 = vld [vmem:[#allocation4 + $0x14] ss:$8 sps:$4 sm:$0xff]  }
  0x5b   :  { %5489 = vmatprep.subr.bf16.mxu1 %v9019_v1  ;;  %5449 = vmatpush1.bf16.msra.mxu0 %v9021_v2  ;;  %v9025_v5 = vld [vmem:[#allocation4 + $0x114] ss:$8 sps:$4 sm:$0xff]   ;;  %v9027_v6 = vld [vmem:[#allocation4 + $0x10] ss:$8 sps:$4 sm:$0xff]   ;;  %v9029_v8 = vld [vmem:[#allocation4 + $0x24] ss:$8 sps:$4 sm:$0xff]  }
  0x5c   :  { %5490 = vmatpush1.bf16.msra.mxu1 %v9022_v3  ;;  %5450 = vmatprep.subr.bf16.mxu0 %v9023_v4  ;;  %v9028_v7 = vld [vmem:[#allocation4 + $0x110] ss:$8 sps:$4 sm:$0xff]   ;;  %v9031_v9 = vld [vmem:[#allocation4 + $0x124] ss:$8 sps:$4 sm:$0xff]   ;;  %v9033_v10 = vld [vmem:[#allocation4 + $0x20] ss:$8 sps:$4 sm:$0xff]  }
  0x5d   :  { %5491 = vmatprep.subr.bf16.mxu1 %v9025_v5  ;;  %v9034_v11 = vld [vmem:[#allocation4 + $0x120] ss:$8 sps:$4 sm:$0xff]   ;;  %v9035_v12 = vld [vmem:[#allocation4 + $0x34] ss:$8 sps:$4 sm:$0xff]   ;;  %v9039_v14 = vld [vmem:[#allocation4 + $0x30] ss:$8 sps:$4 sm:$0xff]  }
  0x5e   :  { %v9037_v13 = vld [vmem:[#allocation4 + $0x134] ss:$8 sps:$4 sm:$0xff]   ;;  %v9040_v15 = vld [vmem:[#allocation4 + $0x130] ss:$8 sps:$4 sm:$0xff]   ;;  %v9041_v16 = vld [vmem:[#allocation4 + $0x44] ss:$8 sps:$4 sm:$0xff]  }
  0x5f   :  { %5451 = vmatpush1.bf16.msra.mxu0 %v9027_v6  ;;  %v9043_v17 = vld [vmem:[#allocation4 + $0x144] ss:$8 sps:$4 sm:$0xff]   ;;  %v9045_v18 = vld [vmem:[#allocation4 + $0x40] ss:$8 sps:$4 sm:$0xff]   ;;  %v9047_v20 = vld [vmem:[#allocation4 + $0x54] ss:$8 sps:$4 sm:$0xff]  }
  0x60   :  { %5492 = vmatpush1.bf16.msra.mxu1 %v9028_v7  ;;  %5452 = vmatprep.subr.bf16.mxu0 %v9029_v8  ;;  %v9046_v19 = vld [vmem:[#allocation4 + $0x140] ss:$8 sps:$4 sm:$0xff]   ;;  %v9049_v21 = vld [vmem:[#allocation4 + $0x154] ss:$8 sps:$4 sm:$0xff]   ;;  %v9051_v22 = vld [vmem:[#allocation4 + $0x50] ss:$8 sps:$4 sm:$0xff]  }
  0x61   :  { %5493 = vmatprep.subr.bf16.mxu1 %v9031_v9  ;;  %v9052_v23 = vld [vmem:[#allocation4 + $0x150] ss:$8 sps:$4 sm:$0xff]   ;;  %v9053_v24 = vld [vmem:[#allocation4 + $0x64] ss:$8 sps:$4 sm:$0xff]   ;;  %v9057_v26 = vld [vmem:[#allocation4 + $0x60] ss:$8 sps:$4 sm:$0xff]  }
  0x62   :  { %v9055_v25 = vld [vmem:[#allocation4 + $0x164] ss:$8 sps:$4 sm:$0xff]   ;;  %v9058_v27 = vld [vmem:[#allocation4 + $0x160] ss:$8 sps:$4 sm:$0xff]   ;;  %v9059_v28 = vld [vmem:[#allocation4 + $0x74] ss:$8 sps:$4 sm:$0xff]  }
  0x63   :  { %5453 = vmatpush1.bf16.msra.mxu0 %v9033_v10  ;;  %v9061_v29 = vld [vmem:[#allocation4 + $0x174] ss:$8 sps:$4 sm:$0xff]   ;;  %v9063_v30 = vld [vmem:[#allocation4 + $0x70] ss:$8 sps:$4 sm:$0xff]   ;;  %v9065_v32 = vld [vmem:[#allocation4 + $0x84] ss:$8 sps:$4 sm:$0xff]  }
  0x64   :  { %5494 = vmatpush1.bf16.msra.mxu1 %v9034_v11  ;;  %5454 = vmatprep.subr.bf16.mxu0 %v9035_v12  ;;  %v9064_v31 = vld [vmem:[#allocation4 + $0x170] ss:$8 sps:$4 sm:$0xff]   ;;  %v9067_v33 = vld [vmem:[#allocation4 + $0x184] ss:$8 sps:$4 sm:$0xff]   ;;  %v9069_v34 = vld [vmem:[#allocation4 + $0x80] ss:$8 sps:$4 sm:$0xff]  }
  0x65   :  { %5495 = vmatprep.subr.bf16.mxu1 %v9037_v13  ;;  %v9070_v35 = vld [vmem:[#allocation4 + $0x180] ss:$8 sps:$4 sm:$0xff]   ;;  %v10492_v36 = vmov 1983009808   ;;  %v9071_v39 = vld [vmem:[#allocation4 + $0x94] ss:$8 sps:$4 sm:$0xff]  }
  0x66   :  { %v124_v37 = vunpack.c.l.s4 %v10492_v36  ;;  %v9073_v40 = vld [vmem:[#allocation4 + $0x194] ss:$8 sps:$4 sm:$0xff]   ;;  %v9075_v41 = vld [vmem:[#allocation4 + $0x90] ss:$8 sps:$4 sm:$0xff]   ;;  %v10610_v43 = vshrl.u32 %v126_v38, 7  ;;  %s10493_s7 = smov 112  }
  0x67   :  { %5455 = vmatpush1.bf16.msra.mxu0 %v9039_v14  ;;  %v9076_v44 = vld [vmem:[#allocation4 + $0x190] ss:$8 sps:$4 sm:$0xff]   ;;  %v9077_v45 = vld [vmem:[#allocation4 + $0xa4] ss:$8 sps:$4 sm:$0xff]   ;;  %v9081_v47 = vld [vmem:[#allocation4 + $0xa0] ss:$8 sps:$4 sm:$0xff]  }
  0x68   :  { %5496 = vmatpush1.bf16.msra.mxu1 %v9040_v15  ;;  %5456 = vmatprep.subr.bf16.mxu0 %v9041_v16  ;;  %v125_v42 = vunpack.c.0.s8 %v124_v37  ;;  %v9079_v46 = vld [vmem:[#allocation4 + $0x1a4] ss:$8 sps:$4 sm:$0xff]   ;;  %v9082_v48 = vld [vmem:[#allocation4 + $0x1a0] ss:$8 sps:$4 sm:$0xff]   ;;  %v9083_v50 = vld [vmem:[#allocation4 + $0xb4] ss:$8 sps:$4 sm:$0xff]  }
  0x69   :  { %5497 = vmatprep.subr.bf16.mxu1 %v9043_v17  ;;  %v9085_v51 = vld [vmem:[#allocation4 + $0x1b4] ss:$8 sps:$4 sm:$0xff]   ;;  %v9087_v53 = vld [vmem:[#allocation4 + $0xb0] ss:$8 sps:$4 sm:$0xff]   ;;  %v9089_v57 = vld [vmem:[#allocation4 + $0xc4] ss:$8 sps:$4 sm:$0xff]  }
  0x6a   :  { %v10613_v49 = vsub.s32 %v125_v42, %v10610_v43  ;;  %v94_v52 = vld [vmem:[#allocation2] sm:$0xff]  ;;  %v9091_v58 = vld [vmem:[#allocation4 + $0x1c4] ss:$8 sps:$4 sm:$0xff]   ;;  %v9093_v61 = vld [vmem:[#allocation4 + $0xc0] ss:$8 sps:$4 sm:$0xff]   ;;  %vm10495_vm0 = vmmov 0  }
  0x6b   :  { %5457 = vmatpush1.bf16.msra.mxu0 %v9045_v18  ;;  %v122_v55 = vcombine.high %v94_v52, %v94_v52  ;;  %v9088_v56 = vld [vmem:[#allocation4 + $0x1b0] ss:$8 sps:$4 sm:$0xff]   ;;  %v9094_v0 = vld [vmem:[#allocation4 + $0x1c0] ss:$8 sps:$4 sm:$0xff]   ;;  %v9095_v1 = vld [vmem:[#allocation4 + $0xd4] ss:$8 sps:$4 sm:$0xff]  }
  0x6c   :  { %5498 = vmatpush1.bf16.msra.mxu1 %v9046_v19  ;;  %5458 = vmatprep.subr.bf16.mxu0 %v9047_v20  ;;  %v129_v54 = vrot.slane %v94_v52, %v10613_v49  ;;  %v9097_v2 = vld [vmem:[#allocation4 + $0x1d4] ss:$8 sps:$4 sm:$0xff]   ;;  %v9099_v4 = vld [vmem:[#allocation4 + $0xd0] ss:$8 sps:$4 sm:$0xff]   ;;  %v9101_v6 = vld [vmem:[#allocation4 + $0xe4] ss:$8 sps:$4 sm:$0xff]  }
  0x6d   :  { %5499 = vmatprep.subr.bf16.mxu1 %v9049_v21  ;;  %v136_v60 = vrot.slane %v122_v55, %v10613_v49  ;;  %v9100_v5 = vld [vmem:[#allocation4 + $0x1d0] ss:$8 sps:$4 sm:$0xff]   ;;  %v9103_v7 = vld [vmem:[#allocation4 + $0x1e4] ss:$8 sps:$4 sm:$0xff]   ;;  %v9105_v8 = vld [vmem:[#allocation4 + $0xe0] ss:$8 sps:$4 sm:$0xff]  }
  0x6e   :  { %v137_v59 = vcombine.high %v129_v54, %v129_v54  ;;  %v9106_v9 = vld [vmem:[#allocation4 + $0x1e0] ss:$8 sps:$4 sm:$0xff]   ;;  %v9107_v10 = vld [vmem:[#allocation4 + $0xf4] ss:$8 sps:$4 sm:$0xff]   ;;  %v9111_v12 = vld [vmem:[#allocation4 + $0xf0] ss:$8 sps:$4 sm:$0xff]   ;;  %v10620_v16 = vpack.c.bf16 %v129_v54, %v129_v54 }
  0x6f   :  { %5459 = vmatpush1.bf16.msra.mxu0 %v9051_v22  ;;  %v138_v63 = vcombine.high %v136_v60, %v136_v60  ;;  %v9109_v11 = vld [vmem:[#allocation4 + $0x1f4] ss:$8 sps:$4 sm:$0xff]   ;;  %v9112_v13 = vld [vmem:[#allocation4 + $0x1f0] ss:$8 sps:$4 sm:$0xff]   ;;  %v9116_v14 = vld [vmem:[#allocation4 + $0x204] ss:$8 sps:$4 sm:$0xff]   ;;  %v405_v17 = vpack.c.bf16 %v136_v60, %v136_v60 }
  0x70   :  { %5500 = vmatpush1.bf16.msra.mxu1 %v9052_v23  ;;  %5460 = vmatprep.subr.bf16.mxu0 %v9053_v24  ;;  %v10617_v62 = vpack.c.bf16 %v137_v59, %v137_v59  ;;  %v9119_v15 = vld [vmem:[#allocation4 + $0x304] ss:$8 sps:$4 sm:$0xff]   ;;  %v9114_v18 = vld [vmem:[#allocation4 + $0x200] ss:$8 sps:$4 sm:$0xff]   ;;  %v9122_v20 = vld [vmem:[#allocation4 + $0x214] ss:$8 sps:$4 sm:$0xff]  }
  0x71   :  { %5501 = vmatprep.subr.bf16.mxu1 %v9055_v25  ;;  %v406_v3 = vpack.c.bf16 %v138_v63, %v138_v63  ;;  %v9117_v19 = vld [vmem:[#allocation4 + $0x300] ss:$8 sps:$4 sm:$0xff]   ;;  %v9125_v21 = vld [vmem:[#allocation4 + $0x314] ss:$8 sps:$4 sm:$0xff]   ;;  %v9120_v22 = vld [vmem:[#allocation4 + $0x210] ss:$8 sps:$4 sm:$0xff]  }
  0x72   :  { %5480 = vmatprep.mubr.bf16.mxu0 %v10617_v62  ;;  %v9123_v23 = vld [vmem:[#allocation4 + $0x310] ss:$8 sps:$4 sm:$0xff]   ;;  %v9128_v24 = vld [vmem:[#allocation4 + $0x224] ss:$8 sps:$4 sm:$0xff]   ;;  %v9146_v36 = vld [vmem:[#allocation4 + $0x254] ss:$8 sps:$4 sm:$0xff]  }
  0x73   :  { %5461 = vmatpush1.bf16.msra.mxu0 %v9057_v26  ;;  %5521 = vmatprep.mubr.bf16.mxu1 %v406_v3  ;;  %v9131_v25 = vld [vmem:[#allocation4 + $0x324] ss:$8 sps:$4 sm:$0xff]   ;;  %v9126_v26 = vld [vmem:[#allocation4 + $0x220] ss:$8 sps:$4 sm:$0xff]   ;;  %v9149_v37 = vld [vmem:[#allocation4 + $0x354] ss:$8 sps:$4 sm:$0xff]  }
  0x74   :  { %5502 = vmatpush1.bf16.msra.mxu1 %v9058_v27  ;;  %5462 = vmatprep.subr.bf16.mxu0 %v9059_v28  ;;  %v9129_v27 = vld [vmem:[#allocation4 + $0x320] ss:$8 sps:$4 sm:$0xff]   ;;  %v9134_v28 = vld [vmem:[#allocation4 + $0x234] ss:$8 sps:$4 sm:$0xff]   ;;  %v9144_v38 = vld [vmem:[#allocation4 + $0x250] ss:$8 sps:$4 sm:$0xff]  }
  0x75   :  { %5503 = vmatprep.subr.bf16.mxu1 %v9061_v29  ;;  %v9137_v29 = vld [vmem:[#allocation4 + $0x334] ss:$8 sps:$4 sm:$0xff]   ;;  %v9156_v55 = vld [vmem:[#allocation4 + $0x270] ss:$8 sps:$4 sm:$0xff]   ;;  %v9167_v59 = vld [vmem:[#allocation4 + $0x384] ss:$8 sps:$4 sm:$0xff]  }
  0x76   :  { %v95_v42 = vld [vmem:[#allocation2 + $0x8] sm:$0xff]  ;;  %vm6753_vm1 = vcmask 605184   ;;  %vm6757_vm2 = vcmask 1044480   ;;  %vm7052_vm3 = vcmask 916480   ;;  %vm7165_vm4 = vcmask 1041408   ;;  %s10498_s22 = smov 48  }
  0x77   :  { %5463 = vmatpush1.bf16.msra.mxu0 %v9063_v30  ;;  %v9132_v30 = vld [vmem:[#allocation4 + $0x230] ss:$8 sps:$4 sm:$0xff]   ;;  %v9161_v52 = vld [vmem:[#allocation4 + $0x374] ss:$8 sps:$4 sm:$0xff]   ;;  %v9162_v60 = vld [vmem:[#allocation4 + $0x280] ss:$8 sps:$4 sm:$0xff]  }
  0x78   :  { %5504 = vmatpush1.bf16.msra.mxu1 %v9064_v31  ;;  %5464 = vmatprep.subr.bf16.mxu0 %v9065_v32  ;;  %v9135_v31 = vld [vmem:[#allocation4 + $0x330] ss:$8 sps:$4 sm:$0xff]   ;;  %v9140_v32 = vld [vmem:[#allocation4 + $0x244] ss:$8 sps:$4 sm:$0xff]   ;;  %v9170_v63 = vld [vmem:[#allocation4 + $0x294] ss:$8 sps:$4 sm:$0xff]  }
  0x79   :  { %5505 = vmatprep.subr.bf16.mxu1 %v9067_v33  ;;  %v9143_v33 = vld [vmem:[#allocation4 + $0x344] ss:$8 sps:$4 sm:$0xff]   ;;  %vm6943_vm5 = vcmask 58368   ;;  %vm7000_vm6 = vcmask 517120   ;;  %vm7580_vm7 = vcmask 392192   ;;  %vm7776_vm8 = vcmask 1043456  }
  0x7a   :  { %v9176_v3 = vld [vmem:[#allocation4 + $0x2a4] ss:$8 sps:$4 sm:$0xff]   ;;  %vm7728_vm9 = vcmask 523264   ;;  %vm7772_vm10 = vcmask 64512   ;;  %vm7886_vm11 = vcmask 519168   ;;  %vm7926_vm12 = vcmask 1043970  }
  0x7b   :  { %5465 = vmatpush1.bf16.msra.mxu0 %v9069_v34  ;;  %v9138_v34 = vld [vmem:[#allocation4 + $0x240] ss:$8 sps:$4 sm:$0xff]  }
  0x7c   :  { %5506 = vmatpush1.bf16.msra.mxu1 %v9070_v35  ;;  %5466 = vmatprep.subr.bf16.mxu0 %v9071_v39  ;;  %v9141_v35 = vld [vmem:[#allocation4 + $0x340] ss:$8 sps:$4 sm:$0xff]   ;;  %v9147_v39 = vld [vmem:[#allocation4 + $0x350] ss:$8 sps:$4 sm:$0xff]  }
  0x7d   :  { %5507 = vmatprep.subr.bf16.mxu1 %v9073_v40  ;;  %v9152_v40 = vld [vmem:[#allocation4 + $0x264] ss:$8 sps:$4 sm:$0xff]  }
  0x7f   :  { %5467 = vmatpush1.bf16.msra.mxu0 %v9075_v41  ;;  %v9155_v41 = vld [vmem:[#allocation4 + $0x364] ss:$8 sps:$4 sm:$0xff]  }
  0x80   :  { %5508 = vmatpush1.bf16.msra.mxu1 %v9076_v44  ;;  %5468 = vmatprep.subr.bf16.mxu0 %v9077_v45  ;;  %v10624_v44 = vrot.slane %v95_v42, %v10613_v49  ;;  %v139_v45 = vcombine.high %v95_v42, %v95_v42  ;;  %v9220_v42 = vld [vmem:[#allocation4 + $0x510] ss:$8 sps:$4 sm:$0xff]  }
  0x81   :  { %5509 = vmatprep.subr.bf16.mxu1 %v9079_v46  ;;  %v9150_v46 = vld [vmem:[#allocation4 + $0x260] ss:$8 sps:$4 sm:$0xff]  }
  0x83   :  { %5469 = vmatpush1.bf16.msra.mxu0 %v9081_v47  ;;  %v9153_v47 = vld [vmem:[#allocation4 + $0x360] ss:$8 sps:$4 sm:$0xff]  }
  0x84   :  { %5510 = vmatpush1.bf16.msra.mxu1 %v9082_v48  ;;  %5470 = vmatprep.subr.bf16.mxu0 %v9083_v50  ;;  %v154_v48 = vcombine.high %v10624_v44, %v10624_v44  ;;  %v10629_v50 = vrot.slane %v139_v45, %v10613_v49  ;;  %v9228_v45 = vld [vmem:[#allocation4 + $0x524] ss:$8 sps:$4 sm:$0xff]  }
  0x85   :  { %5511 = vmatprep.subr.bf16.mxu1 %v9085_v51  ;;  %v9158_v51 = vld [vmem:[#allocation4 + $0x274] ss:$8 sps:$4 sm:$0xff]  }
  0x86   :  { %v155_v54 = vcombine.high %v10629_v50, %v10629_v50 }
  0x87   :  { %5471 = vmatpush1.bf16.msra.mxu0 %v9087_v53  ;;  %v408_v53 = vpack.c.bf16 %v154_v48, %v154_v48  ;;  %v9223_v48 = vld [vmem:[#allocation4 + $0x420] ss:$8 sps:$4 sm:$0xff]  }
  0x88   :  { %5512 = vmatpush1.bf16.msra.mxu1 %v9088_v56  ;;  %5472 = vmatprep.subr.bf16.mxu0 %v9089_v57  ;;  %v9159_v56 = vld [vmem:[#allocation4 + $0x370] ss:$8 sps:$4 sm:$0xff]   ;;  %v410_v57 = vpack.c.bf16 %v155_v54, %v155_v54 }
  0x89   :  { %5513 = vmatprep.subr.bf16.mxu1 %v9091_v58  ;;  %v9164_v58 = vld [vmem:[#allocation4 + $0x284] ss:$8 sps:$4 sm:$0xff]   ;;  %v9229_v54 = vld [vmem:[#allocation4 + $0x430] ss:$8 sps:$4 sm:$0xff]  }
  0x8b   :  { %5473 = vmatpush1.bf16.msra.mxu0 %v9093_v61  ;;  %v9165_v61 = vld [vmem:[#allocation4 + $0x380] ss:$8 sps:$4 sm:$0xff]  }
  0x8c   :  { %5514 = vmatpush1.bf16.msra.mxu1 %v9094_v0  ;;  %5474 = vmatprep.subr.bf16.mxu0 %v9095_v1  ;;  %v9173_v0 = vld [vmem:[#allocation4 + $0x394] ss:$8 sps:$4 sm:$0xff]   ;;  %v9168_v1 = vld [vmem:[#allocation4 + $0x290] ss:$8 sps:$4 sm:$0xff]  }
  0x8d   :  { %5515 = vmatprep.subr.bf16.mxu1 %v9097_v2  ;;  %v9171_v2 = vld [vmem:[#allocation4 + $0x390] ss:$8 sps:$4 sm:$0xff]  }
  0x8f   :  { %5475 = vmatpush1.bf16.msra.mxu0 %v9099_v4  ;;  %v9179_v4 = vld [vmem:[#allocation4 + $0x3a4] ss:$8 sps:$4 sm:$0xff]  }
  0x90   :  { %5516 = vmatpush1.bf16.msra.mxu1 %v9100_v5  ;;  %5476 = vmatprep.subr.bf16.mxu0 %v9101_v6  ;;  %v9174_v5 = vld [vmem:[#allocation4 + $0x2a0] ss:$8 sps:$4 sm:$0xff]  }
  0x91   :  { %5517 = vmatprep.subr.bf16.mxu1 %v9103_v7  ;;  %v9177_v6 = vld [vmem:[#allocation4 + $0x3a0] ss:$8 sps:$4 sm:$0xff]   ;;  %v9182_v7 = vld [vmem:[#allocation4 + $0x2b4] ss:$8 sps:$4 sm:$0xff]  }
  0x93   :  { %5477 = vmatpush1.bf16.msra.mxu0 %v9105_v8  ;;  %v9185_v8 = vld [vmem:[#allocation4 + $0x3b4] ss:$8 sps:$4 sm:$0xff]  }
  0x94   :  { %5518 = vmatpush1.bf16.msra.mxu1 %v9106_v9  ;;  %5478 = vmatprep.subr.bf16.mxu0 %v9107_v10  ;;  %v9180_v9 = vld [vmem:[#allocation4 + $0x2b0] ss:$8 sps:$4 sm:$0xff]  }
  0x95   :  { %5519 = vmatprep.subr.bf16.mxu1 %v9109_v11  ;;  %v9183_v10 = vld [vmem:[#allocation4 + $0x3b0] ss:$8 sps:$4 sm:$0xff]   ;;  %v9188_v11 = vld [vmem:[#allocation4 + $0x2c4] ss:$8 sps:$4 sm:$0xff]  }
  0x97   :  { %5479 = vmatpush1.bf16.msra.mxu0 %v9111_v12  ;;  %v9191_v12 = vld [vmem:[#allocation4 + $0x3c4] ss:$8 sps:$4 sm:$0xff]  }
  0x98   :  { %5520 = vmatpush1.bf16.msra.mxu1 %v9112_v13  ;;  %5530 = vmatprep.subr.bf16.mxu0 %v9116_v14  ;;  %v9186_v13 = vld [vmem:[#allocation4 + $0x2c0] ss:$8 sps:$4 sm:$0xff]  }
  0x99   :  { %5571 = vmatprep.subr.bf16.mxu1 %v9119_v15  ;;  %v9189_v14 = vld [vmem:[#allocation4 + $0x3c0] ss:$8 sps:$4 sm:$0xff]   ;;  %v9194_v15 = vld [vmem:[#allocation4 + $0x2d4] ss:$8 sps:$4 sm:$0xff]  }
  0x9a   :  { %5481 = vmatmul.mubr.bf16.vlgmr.msra.gmra.mrb[0].mxu0 %v10620_v16 }
  0x9b   :  { %5522 = vmatmul.mubr.bf16.vlgmr.msra.gmra.mrb[0].mxu1 %v405_v17  ;;  %5531 = vmatpush1.bf16.msra.mxu0 %v9114_v18  ;;  %v9197_v17 = vld [vmem:[#allocation4 + $0x3d4] ss:$8 sps:$4 sm:$0xff]   ;;  %v9192_v18 = vld [vmem:[#allocation4 + $0x2d0] ss:$8 sps:$4 sm:$0xff]  }
  0x9c   :  { %5572 = vmatpush1.bf16.msra.mxu1 %v9117_v19  ;;  %5532 = vmatprep.subr.bf16.mxu0 %v9122_v20  ;;  %v9195_v19 = vld [vmem:[#allocation4 + $0x3d0] ss:$8 sps:$4 sm:$0xff]   ;;  %v9200_v20 = vld [vmem:[#allocation4 + $0x2e4] ss:$8 sps:$4 sm:$0xff]  }
  0x9d   :  { %5573 = vmatprep.subr.bf16.mxu1 %v9125_v21  ;;  %5562 = vmatprep.mubr.bf16.mxu0 %v408_v53  ;;  %v9203_v21 = vld [vmem:[#allocation4 + $0x3e4] ss:$8 sps:$4 sm:$0xff]   ;;  %v9234_v53 = vld [vmem:[#allocation4 + $0x534] ss:$8 sps:$4 sm:$0xff]  }
  0x9e   :  { %5603 = vmatprep.mubr.bf16.mxu1 %v410_v57  ;;  %v9240_v57 = vld [vmem:[#allocation4 + $0x544] ss:$8 sps:$4 sm:$0xff]  }
  0x9f   :  { %5533 = vmatpush1.bf16.msra.mxu0 %v9120_v22  ;;  %v9198_v22 = vld [vmem:[#allocation4 + $0x2e0] ss:$8 sps:$4 sm:$0xff]  }
  0xa0   :  { %5574 = vmatpush1.bf16.msra.mxu1 %v9123_v23  ;;  %5534 = vmatprep.subr.bf16.mxu0 %v9128_v24  ;;  %v9201_v23 = vld [vmem:[#allocation4 + $0x3e0] ss:$8 sps:$4 sm:$0xff]   ;;  %v9206_v24 = vld [vmem:[#allocation4 + $0x2f4] ss:$8 sps:$4 sm:$0xff]  }
  0xa1   :  { %5575 = vmatprep.subr.bf16.mxu1 %v9131_v25  ;;  %v9209_v25 = vld [vmem:[#allocation4 + $0x3f4] ss:$8 sps:$4 sm:$0xff]  }
  0xa3   :  { %5535 = vmatpush1.bf16.msra.mxu0 %v9126_v26  ;;  %v9204_v26 = vld [vmem:[#allocation4 + $0x2f0] ss:$8 sps:$4 sm:$0xff]  }
  0xa4   :  { %5576 = vmatpush1.bf16.msra.mxu1 %v9129_v27  ;;  %5536 = vmatprep.subr.bf16.mxu0 %v9134_v28  ;;  %v9207_v27 = vld [vmem:[#allocation4 + $0x3f0] ss:$8 sps:$4 sm:$0xff]   ;;  %v9213_v28 = vld [vmem:[#allocation4 + $0x404] ss:$8 sps:$4 sm:$0xff]  }
  0xa5   :  { %5577 = vmatprep.subr.bf16.mxu1 %v9137_v29  ;;  %v9216_v29 = vld [vmem:[#allocation4 + $0x504] ss:$8 sps:$4 sm:$0xff]  }
  0xa7   :  { %5537 = vmatpush1.bf16.msra.mxu0 %v9132_v30  ;;  %v407_v30 = vpack.c.bf16 %v10624_v44, %v10624_v44  ;;  %v9225_v44 = vld [vmem:[#allocation4 + $0x424] ss:$8 sps:$4 sm:$0xff]  }
  0xa8   :  { %5578 = vmatpush1.bf16.msra.mxu1 %v9135_v31  ;;  %5538 = vmatprep.subr.bf16.mxu0 %v9140_v32  ;;  %v409_v31 = vpack.c.bf16 %v10629_v50, %v10629_v50  ;;  %v9211_v32 = vld [vmem:[#allocation4 + $0x400] ss:$8 sps:$4 sm:$0xff]  }
  0xa9   :  { %5579 = vmatprep.subr.bf16.mxu1 %v9143_v33  ;;  %v9214_v33 = vld [vmem:[#allocation4 + $0x500] ss:$8 sps:$4 sm:$0xff]  }
  0xab   :  { %5539 = vmatpush1.bf16.msra.mxu0 %v9138_v34  ;;  %v9219_v34 = vld [vmem:[#allocation4 + $0x414] ss:$8 sps:$4 sm:$0xff]  }
  0xac   :  { %5580 = vmatpush1.bf16.msra.mxu1 %v9141_v35  ;;  %5540 = vmatprep.subr.bf16.mxu0 %v9146_v36  ;;  %v96_v35 = vld [vmem:[#allocation2 + $0x10] sm:$0xff]  ;;  %v9222_v36 = vld [vmem:[#allocation4 + $0x514] ss:$8 sps:$4 sm:$0xff]  }
  0xad   :  { %5581 = vmatprep.subr.bf16.mxu1 %v9149_v37  ;;  %v10638_v37 = vrot.slane %v96_v35, %v10613_v49 }
  0xaf   :  { %5541 = vmatpush1.bf16.msra.mxu0 %v9144_v38  ;;  %v156_v38 = vcombine.high %v96_v35, %v96_v35  ;;  %v9297_v35 = vld [vmem:[#allocation4 + $0x4e4] ss:$8 sps:$4 sm:$0xff]  }
  0xb0   :  { %5582 = vmatpush1.bf16.msra.mxu1 %v9147_v39  ;;  %5542 = vmatprep.subr.bf16.mxu0 %v9152_v40  ;;  %v9217_v39 = vld [vmem:[#allocation4 + $0x410] ss:$8 sps:$4 sm:$0xff]   ;;  %v171_v40 = vcombine.high %v10638_v37, %v10638_v37 }
  0xb1   :  { %5583 = vmatprep.subr.bf16.mxu1 %v9155_v41  ;;  %v10643_v41 = vrot.slane %v156_v38, %v10613_v49 }
  0xb3   :  { %5543 = vmatpush1.bf16.msra.mxu0 %v9150_v46  ;;  %v412_v46 = vpack.c.bf16 %v171_v40, %v171_v40  ;;  %v9298_v40 = vld [vmem:[#allocation4 + $0x5e0] ss:$8 sps:$4 sm:$0xff]  }
  0xb4   :  { %5584 = vmatpush1.bf16.msra.mxu1 %v9153_v47  ;;  %5544 = vmatprep.subr.bf16.mxu0 %v9158_v51  ;;  %v172_v47 = vcombine.high %v10643_v41, %v10643_v41  ;;  %v9226_v51 = vld [vmem:[#allocation4 + $0x520] ss:$8 sps:$4 sm:$0xff]  }
  0xb5   :  { %5585 = vmatprep.subr.bf16.mxu1 %v9161_v52  ;;  %v9231_v52 = vld [vmem:[#allocation4 + $0x434] ss:$8 sps:$4 sm:$0xff]  }
  0xb6   :  { %v414_v50 = vpack.c.bf16 %v172_v47, %v172_v47  ;;  %v9301_v47 = vld [vmem:[#allocation4 + $0x4f0] ss:$8 sps:$4 sm:$0xff]  }
  0xb7   :  { %5545 = vmatpush1.bf16.msra.mxu0 %v9156_v55  ;;  %v9232_v55 = vld [vmem:[#allocation4 + $0x530] ss:$8 sps:$4 sm:$0xff]  }
  0xb8   :  { %5586 = vmatpush1.bf16.msra.mxu1 %v9159_v56  ;;  %5546 = vmatprep.subr.bf16.mxu0 %v9164_v58  ;;  %v9237_v56 = vld [vmem:[#allocation4 + $0x444] ss:$8 sps:$4 sm:$0xff]   ;;  %v9235_v58 = vld [vmem:[#allocation4 + $0x440] ss:$8 sps:$4 sm:$0xff]  }
  0xb9   :  { %5587 = vmatprep.subr.bf16.mxu1 %v9167_v59  ;;  %v9238_v59 = vld [vmem:[#allocation4 + $0x540] ss:$8 sps:$4 sm:$0xff]  }
  0xbb   :  { %5547 = vmatpush1.bf16.msra.mxu0 %v9162_v60  ;;  %v9243_v60 = vld [vmem:[#allocation4 + $0x454] ss:$8 sps:$4 sm:$0xff]  }
  0xbc   :  { %5588 = vmatpush1.bf16.msra.mxu1 %v9165_v61  ;;  %5548 = vmatprep.subr.bf16.mxu0 %v9170_v63  ;;  %v9246_v61 = vld [vmem:[#allocation4 + $0x554] ss:$8 sps:$4 sm:$0xff]   ;;  %v9241_v63 = vld [vmem:[#allocation4 + $0x450] ss:$8 sps:$4 sm:$0xff]  }
  0xbd   :  { %5589 = vmatprep.subr.bf16.mxu1 %v9173_v0  ;;  %v9244_v0 = vld [vmem:[#allocation4 + $0x550] ss:$8 sps:$4 sm:$0xff]  }
  0xbf   :  { %5549 = vmatpush1.bf16.msra.mxu0 %v9168_v1  ;;  %v9249_v1 = vld [vmem:[#allocation4 + $0x464] ss:$8 sps:$4 sm:$0xff]  }
  0xc0   :  { %5590 = vmatpush1.bf16.msra.mxu1 %v9171_v2  ;;  %5550 = vmatprep.subr.bf16.mxu0 %v9176_v3  ;;  %v9252_v2 = vld [vmem:[#allocation4 + $0x564] ss:$8 sps:$4 sm:$0xff]   ;;  %v9247_v3 = vld [vmem:[#allocation4 + $0x460] ss:$8 sps:$4 sm:$0xff]  }
  0xc1   :  { %5591 = vmatprep.subr.bf16.mxu1 %v9179_v4  ;;  %v9250_v4 = vld [vmem:[#allocation4 + $0x560] ss:$8 sps:$4 sm:$0xff]  }
  0xc3   :  { %5551 = vmatpush1.bf16.msra.mxu0 %v9174_v5  ;;  %v9255_v5 = vld [vmem:[#allocation4 + $0x474] ss:$8 sps:$4 sm:$0xff]  }
  0xc4   :  { %5592 = vmatpush1.bf16.msra.mxu1 %v9177_v6  ;;  %5552 = vmatprep.subr.bf16.mxu0 %v9182_v7  ;;  %v9258_v6 = vld [vmem:[#allocation4 + $0x574] ss:$8 sps:$4 sm:$0xff]   ;;  %v9253_v7 = vld [vmem:[#allocation4 + $0x470] ss:$8 sps:$4 sm:$0xff]  }
  0xc5   :  { %5593 = vmatprep.subr.bf16.mxu1 %v9185_v8  ;;  %v9256_v8 = vld [vmem:[#allocation4 + $0x570] ss:$8 sps:$4 sm:$0xff]  }
  0xc7   :  { %5553 = vmatpush1.bf16.msra.mxu0 %v9180_v9  ;;  %v9261_v9 = vld [vmem:[#allocation4 + $0x484] ss:$8 sps:$4 sm:$0xff]  }
  0xc8   :  { %5594 = vmatpush1.bf16.msra.mxu1 %v9183_v10  ;;  %5554 = vmatprep.subr.bf16.mxu0 %v9188_v11  ;;  %v9264_v10 = vld [vmem:[#allocation4 + $0x584] ss:$8 sps:$4 sm:$0xff]   ;;  %v9259_v11 = vld [vmem:[#allocation4 + $0x480] ss:$8 sps:$4 sm:$0xff]  }
  0xc9   :  { %5595 = vmatprep.subr.bf16.mxu1 %v9191_v12  ;;  %v9262_v12 = vld [vmem:[#allocation4 + $0x580] ss:$8 sps:$4 sm:$0xff]  }
  0xcb   :  { %5555 = vmatpush1.bf16.msra.mxu0 %v9186_v13  ;;  %v9267_v13 = vld [vmem:[#allocation4 + $0x494] ss:$8 sps:$4 sm:$0xff]  }
  0xcc   :  { %5596 = vmatpush1.bf16.msra.mxu1 %v9189_v14  ;;  %5556 = vmatprep.subr.bf16.mxu0 %v9194_v15  ;;  %v9270_v14 = vld [vmem:[#allocation4 + $0x594] ss:$8 sps:$4 sm:$0xff]   ;;  %v9265_v15 = vld [vmem:[#allocation4 + $0x490] ss:$8 sps:$4 sm:$0xff]  }
  0xcd   :  { %5597 = vmatprep.subr.bf16.mxu1 %v9197_v17  ;;  %v9268_v17 = vld [vmem:[#allocation4 + $0x590] ss:$8 sps:$4 sm:$0xff]  }
  0xcf   :  { %5557 = vmatpush1.bf16.msra.mxu0 %v9192_v18  ;;  %v9273_v18 = vld [vmem:[#allocation4 + $0x4a4] ss:$8 sps:$4 sm:$0xff]  }
  0xd0   :  { %5598 = vmatpush1.bf16.msra.mxu1 %v9195_v19  ;;  %5558 = vmatprep.subr.bf16.mxu0 %v9200_v20  ;;  %v9276_v19 = vld [vmem:[#allocation4 + $0x5a4] ss:$8 sps:$4 sm:$0xff]   ;;  %v9271_v20 = vld [vmem:[#allocation4 + $0x4a0] ss:$8 sps:$4 sm:$0xff]  }
  0xd1   :  { %5599 = vmatprep.subr.bf16.mxu1 %v9203_v21  ;;  %v9274_v21 = vld [vmem:[#allocation4 + $0x5a0] ss:$8 sps:$4 sm:$0xff]  }
  0xd3   :  { %5559 = vmatpush1.bf16.msra.mxu0 %v9198_v22  ;;  %v9279_v22 = vld [vmem:[#allocation4 + $0x4b4] ss:$8 sps:$4 sm:$0xff]  }
  0xd4   :  { %5600 = vmatpush1.bf16.msra.mxu1 %v9201_v23  ;;  %5560 = vmatprep.subr.bf16.mxu0 %v9206_v24  ;;  %v9282_v23 = vld [vmem:[#allocation4 + $0x5b4] ss:$8 sps:$4 sm:$0xff]   ;;  %v9277_v24 = vld [vmem:[#allocation4 + $0x4b0] ss:$8 sps:$4 sm:$0xff]  }
  0xd5   :  { %5601 = vmatprep.subr.bf16.mxu1 %v9209_v25  ;;  %v9280_v25 = vld [vmem:[#allocation4 + $0x5b0] ss:$8 sps:$4 sm:$0xff]  }
  0xd7   :  { %5561 = vmatpush1.bf16.msra.mxu0 %v9204_v26  ;;  %v9285_v26 = vld [vmem:[#allocation4 + $0x4c4] ss:$8 sps:$4 sm:$0xff]  }
  0xd8   :  { %5602 = vmatpush1.bf16.msra.mxu1 %v9207_v27  ;;  %5612 = vmatprep.subr.bf16.mxu0 %v9213_v28  ;;  %v9288_v27 = vld [vmem:[#allocation4 + $0x5c4] ss:$8 sps:$4 sm:$0xff]   ;;  %v9283_v28 = vld [vmem:[#allocation4 + $0x4c0] ss:$8 sps:$4 sm:$0xff]  }
  0xd9   :  { %5653 = vmatprep.subr.bf16.mxu1 %v9216_v29  ;;  %v9286_v29 = vld [vmem:[#allocation4 + $0x5c0] ss:$8 sps:$4 sm:$0xff]  }
  0xda   :  { %5563 = vmatmul.mubr.bf16.vlgmr.msra.gmra.mrb[4].mxu0 %v407_v30  ;;  %v9291_v30 = vld [vmem:[#allocation4 + $0x4d4] ss:$8 sps:$4 sm:$0xff]  }
  0xdb   :  { %5604 = vmatmul.mubr.bf16.vlgmr.msra.gmra.mrb[4].mxu1 %v409_v31  ;;  %5613 = vmatpush1.bf16.msra.mxu0 %v9211_v32  ;;  %v9294_v31 = vld [vmem:[#allocation4 + $0x5d4] ss:$8 sps:$4 sm:$0xff]   ;;  %v9289_v32 = vld [vmem:[#allocation4 + $0x4d0] ss:$8 sps:$4 sm:$0xff]  }
  0xdc   :  { %5654 = vmatpush1.bf16.msra.mxu1 %v9214_v33  ;;  %5614 = vmatprep.subr.bf16.mxu0 %v9219_v34  ;;  %v9292_v33 = vld [vmem:[#allocation4 + $0x5d0] ss:$8 sps:$4 sm:$0xff]  }
  0xdd   :  { %5655 = vmatprep.subr.bf16.mxu1 %v9222_v36  ;;  %5644 = vmatprep.mubr.bf16.mxu0 %v412_v46  ;;  %v97_v34 = vld [vmem:[#allocation2 + $0x18] sm:$0xff] }
  0xde   :  { %5685 = vmatprep.mubr.bf16.mxu1 %v414_v50  ;;  %v9300_v36 = vld [vmem:[#allocation4 + $0x5e4] ss:$8 sps:$4 sm:$0xff]   ;;  %v173_v38 = vcombine.high %v97_v34, %v97_v34 }
  0xdf   :  { %5615 = vmatpush1.bf16.msra.mxu0 %v9217_v39  ;;  %v9295_v39 = vld [vmem:[#allocation4 + $0x4e0] ss:$8 sps:$4 sm:$0xff]   ;;  %v9310_v50 = vld [vmem:[#allocation4 + $0x604] ss:$8 sps:$4 sm:$0xff]  }
  0xe0   :  { %5656 = vmatpush1.bf16.msra.mxu1 %v9220_v42  ;;  %5616 = vmatprep.subr.bf16.mxu0 %v9225_v44  ;;  %v9303_v42 = vld [vmem:[#allocation4 + $0x4f4] ss:$8 sps:$4 sm:$0xff]   ;;  %v10651_v46 = vrot.slane %v173_v38, %v10613_v49 }
  0xe1   :  { %5657 = vmatprep.subr.bf16.mxu1 %v9228_v45  ;;  %v9306_v44 = vld [vmem:[#allocation4 + $0x5f4] ss:$8 sps:$4 sm:$0xff]   ;;  %v10648_v45 = vrot.slane %v97_v34, %v10613_v49  ;;  %v9368_v34 = vld [vmem:[#allocation4 + $0x6a0] ss:$8 sps:$4 sm:$0xff]  }
  0xe2   :  { %v9379_v38 = vld [vmem:[#allocation4 + $0x7b4] ss:$8 sps:$4 sm:$0xff]  }
  0xe3   :  { %5617 = vmatpush1.bf16.msra.mxu0 %v9223_v48  ;;  %v9304_v48 = vld [vmem:[#allocation4 + $0x5f0] ss:$8 sps:$4 sm:$0xff]  }
  0xe4   :  { %5658 = vmatpush1.bf16.msra.mxu1 %v9226_v51  ;;  %5618 = vmatprep.subr.bf16.mxu0 %v9231_v52  ;;  %v9313_v51 = vld [vmem:[#allocation4 + $0x704] ss:$8 sps:$4 sm:$0xff]   ;;  %v188_v52 = vcombine.high %v10648_v45, %v10648_v45 }
  0xe5   :  { %5659 = vmatprep.subr.bf16.mxu1 %v9234_v53  ;;  %v189_v53 = vcombine.high %v10651_v46, %v10651_v46 }
  0xe7   :  { %5619 = vmatpush1.bf16.msra.mxu0 %v9229_v54  ;;  %v411_v54 = vpack.c.bf16 %v10638_v37, %v10638_v37  ;;  %v9322_v37 = vld [vmem:[#allocation4 + $0x624] ss:$8 sps:$4 sm:$0xff]  }
  0xe8   :  { %5660 = vmatpush1.bf16.msra.mxu1 %v9232_v55  ;;  %5620 = vmatprep.subr.bf16.mxu0 %v9237_v56  ;;  %v413_v55 = vpack.c.bf16 %v10643_v41, %v10643_v41  ;;  %v9308_v56 = vld [vmem:[#allocation4 + $0x600] ss:$8 sps:$4 sm:$0xff]   ;;  %v9325_v41 = vld [vmem:[#allocation4 + $0x724] ss:$8 sps:$4 sm:$0xff]  }
  0xe9   :  { %5661 = vmatprep.subr.bf16.mxu1 %v9240_v57  ;;  %v9311_v57 = vld [vmem:[#allocation4 + $0x700] ss:$8 sps:$4 sm:$0xff]  }
  0xeb   :  { %5621 = vmatpush1.bf16.msra.mxu0 %v9235_v58  ;;  %v9316_v58 = vld [vmem:[#allocation4 + $0x614] ss:$8 sps:$4 sm:$0xff]  }
  0xec   :  { %5662 = vmatpush1.bf16.msra.mxu1 %v9238_v59  ;;  %5622 = vmatprep.subr.bf16.mxu0 %v9243_v60  ;;  %v9319_v59 = vld [vmem:[#allocation4 + $0x714] ss:$8 sps:$4 sm:$0xff]   ;;  %v416_v60 = vpack.c.bf16 %v188_v52, %v188_v52  ;;  %v9386_v52 = vld [vmem:[#allocation4 + $0x6d0] ss:$8 sps:$4 sm:$0xff]  }
  0xed   :  { %5663 = vmatprep.subr.bf16.mxu1 %v9246_v61  ;;  %v418_v61 = vpack.c.bf16 %v189_v53, %v189_v53  ;;  %v98_v53 = vld [vmem:[#allocation2 + $0x20] sm:$0xff] }
  0xef   :  { %5623 = vmatpush1.bf16.msra.mxu0 %v9241_v63  ;;  %v9314_v63 = vld [vmem:[#allocation4 + $0x610] ss:$8 sps:$4 sm:$0xff]  }
  0xf0   :  { %5664 = vmatpush1.bf16.msra.mxu1 %v9244_v0  ;;  %5624 = vmatprep.subr.bf16.mxu0 %v9249_v1  ;;  %v9317_v0 = vld [vmem:[#allocation4 + $0x710] ss:$8 sps:$4 sm:$0xff]   ;;  %v9320_v1 = vld [vmem:[#allocation4 + $0x620] ss:$8 sps:$4 sm:$0xff]  }
  0xf1   :  { %5665 = vmatprep.subr.bf16.mxu1 %v9252_v2  ;;  %v9323_v2 = vld [vmem:[#allocation4 + $0x720] ss:$8 sps:$4 sm:$0xff]  }
  0xf3   :  { %5625 = vmatpush1.bf16.msra.mxu0 %v9247_v3  ;;  %v9328_v3 = vld [vmem:[#allocation4 + $0x634] ss:$8 sps:$4 sm:$0xff]  }
  0xf4   :  { %5666 = vmatpush1.bf16.msra.mxu1 %v9250_v4  ;;  %5626 = vmatprep.subr.bf16.mxu0 %v9255_v5  ;;  %v9331_v4 = vld [vmem:[#allocation4 + $0x734] ss:$8 sps:$4 sm:$0xff]   ;;  %v9326_v5 = vld [vmem:[#allocation4 + $0x630] ss:$8 sps:$4 sm:$0xff]  }
  0xf5   :  { %5667 = vmatprep.subr.bf16.mxu1 %v9258_v6  ;;  %v9329_v6 = vld [vmem:[#allocation4 + $0x730] ss:$8 sps:$4 sm:$0xff]  }
  0xf7   :  { %5627 = vmatpush1.bf16.msra.mxu0 %v9253_v7  ;;  %v9334_v7 = vld [vmem:[#allocation4 + $0x644] ss:$8 sps:$4 sm:$0xff]  }
  0xf8   :  { %5668 = vmatpush1.bf16.msra.mxu1 %v9256_v8  ;;  %5628 = vmatprep.subr.bf16.mxu0 %v9261_v9  ;;  %v9337_v8 = vld [vmem:[#allocation4 + $0x744] ss:$8 sps:$4 sm:$0xff]   ;;  %v9332_v9 = vld [vmem:[#allocation4 + $0x640] ss:$8 sps:$4 sm:$0xff]  }
  0xf9   :  { %5669 = vmatprep.subr.bf16.mxu1 %v9264_v10  ;;  %v9335_v10 = vld [vmem:[#allocation4 + $0x740] ss:$8 sps:$4 sm:$0xff]  }
  0xfb   :  { %5629 = vmatpush1.bf16.msra.mxu0 %v9259_v11  ;;  %v9340_v11 = vld [vmem:[#allocation4 + $0x654] ss:$8 sps:$4 sm:$0xff]  }
  0xfc   :  { %5670 = vmatpush1.bf16.msra.mxu1 %v9262_v12  ;;  %5630 = vmatprep.subr.bf16.mxu0 %v9267_v13  ;;  %v9343_v12 = vld [vmem:[#allocation4 + $0x754] ss:$8 sps:$4 sm:$0xff]   ;;  %v9338_v13 = vld [vmem:[#allocation4 + $0x650] ss:$8 sps:$4 sm:$0xff]  }
  0xfd   :  { %5671 = vmatprep.subr.bf16.mxu1 %v9270_v14  ;;  %v9341_v14 = vld [vmem:[#allocation4 + $0x750] ss:$8 sps:$4 sm:$0xff]  }
  0xff   :  { %5631 = vmatpush1.bf16.msra.mxu0 %v9265_v15  ;;  %v9346_v15 = vld [vmem:[#allocation4 + $0x664] ss:$8 sps:$4 sm:$0xff]  }
 0x100   :  { %5672 = vmatpush1.bf16.msra.mxu1 %v9268_v17  ;;  %5632 = vmatprep.subr.bf16.mxu0 %v9273_v18  ;;  %v9349_v17 = vld [vmem:[#allocation4 + $0x764] ss:$8 sps:$4 sm:$0xff]   ;;  %v9344_v18 = vld [vmem:[#allocation4 + $0x660] ss:$8 sps:$4 sm:$0xff]  }
 0x101   :  { %5673 = vmatprep.subr.bf16.mxu1 %v9276_v19  ;;  %v9347_v19 = vld [vmem:[#allocation4 + $0x760] ss:$8 sps:$4 sm:$0xff]  }
 0x103   :  { %5633 = vmatpush1.bf16.msra.mxu0 %v9271_v20  ;;  %v9352_v20 = vld [vmem:[#allocation4 + $0x674] ss:$8 sps:$4 sm:$0xff]  }
 0x104   :  { %5674 = vmatpush1.bf16.msra.mxu1 %v9274_v21  ;;  %5634 = vmatprep.subr.bf16.mxu0 %v9279_v22  ;;  %v9355_v21 = vld [vmem:[#allocation4 + $0x774] ss:$8 sps:$4 sm:$0xff]   ;;  %v9350_v22 = vld [vmem:[#allocation4 + $0x670] ss:$8 sps:$4 sm:$0xff]  }
 0x105   :  { %5675 = vmatprep.subr.bf16.mxu1 %v9282_v23  ;;  %v9353_v23 = vld [vmem:[#allocation4 + $0x770] ss:$8 sps:$4 sm:$0xff]  }
 0x107   :  { %5635 = vmatpush1.bf16.msra.mxu0 %v9277_v24  ;;  %v9358_v24 = vld [vmem:[#allocation4 + $0x684] ss:$8 sps:$4 sm:$0xff]  }
 0x108   :  { %5676 = vmatpush1.bf16.msra.mxu1 %v9280_v25  ;;  %5636 = vmatprep.subr.bf16.mxu0 %v9285_v26  ;;  %v9361_v25 = vld [vmem:[#allocation4 + $0x784] ss:$8 sps:$4 sm:$0xff]   ;;  %v9356_v26 = vld [vmem:[#allocation4 + $0x680] ss:$8 sps:$4 sm:$0xff]  }
 0x109   :  { %5677 = vmatprep.subr.bf16.mxu1 %v9288_v27  ;;  %v9359_v27 = vld [vmem:[#allocation4 + $0x780] ss:$8 sps:$4 sm:$0xff]  }
 0x10b   :  { %5637 = vmatpush1.bf16.msra.mxu0 %v9283_v28  ;;  %v9364_v28 = vld [vmem:[#allocation4 + $0x694] ss:$8 sps:$4 sm:$0xff]  }
 0x10c   :  { %5678 = vmatpush1.bf16.msra.mxu1 %v9286_v29  ;;  %5638 = vmatprep.subr.bf16.mxu0 %v9291_v30  ;;  %v9367_v29 = vld [vmem:[#allocation4 + $0x794] ss:$8 sps:$4 sm:$0xff]   ;;  %v9362_v30 = vld [vmem:[#allocation4 + $0x690] ss:$8 sps:$4 sm:$0xff]  }
 0x10d   :  { %5679 = vmatprep.subr.bf16.mxu1 %v9294_v31  ;;  %v9365_v31 = vld [vmem:[#allocation4 + $0x790] ss:$8 sps:$4 sm:$0xff]  }
 0x10f   :  { %5639 = vmatpush1.bf16.msra.mxu0 %v9289_v32  ;;  %v9370_v32 = vld [vmem:[#allocation4 + $0x6a4] ss:$8 sps:$4 sm:$0xff]  }
 0x110   :  { %5680 = vmatpush1.bf16.msra.mxu1 %v9292_v33  ;;  %5640 = vmatprep.subr.bf16.mxu0 %v9297_v35  ;;  %v9373_v33 = vld [vmem:[#allocation4 + $0x7a4] ss:$8 sps:$4 sm:$0xff]   ;;  %v9371_v35 = vld [vmem:[#allocation4 + $0x7a0] ss:$8 sps:$4 sm:$0xff]  }
 0x111   :  { %5681 = vmatprep.subr.bf16.mxu1 %v9300_v36  ;;  %v9376_v36 = vld [vmem:[#allocation4 + $0x6b4] ss:$8 sps:$4 sm:$0xff]  }
 0x113   :  { %5641 = vmatpush1.bf16.msra.mxu0 %v9295_v39  ;;  %v9374_v39 = vld [vmem:[#allocation4 + $0x6b0] ss:$8 sps:$4 sm:$0xff]  }
 0x114   :  { %5682 = vmatpush1.bf16.msra.mxu1 %v9298_v40  ;;  %5642 = vmatprep.subr.bf16.mxu0 %v9303_v42  ;;  %v9377_v40 = vld [vmem:[#allocation4 + $0x7b0] ss:$8 sps:$4 sm:$0xff]   ;;  %v9382_v42 = vld [vmem:[#allocation4 + $0x6c4] ss:$8 sps:$4 sm:$0xff]  }
 0x115   :  { %5683 = vmatprep.subr.bf16.mxu1 %v9306_v44  ;;  %v9385_v44 = vld [vmem:[#allocation4 + $0x7c4] ss:$8 sps:$4 sm:$0xff]  }
 0x117   :  { %5643 = vmatpush1.bf16.msra.mxu0 %v9301_v47  ;;  %v9380_v47 = vld [vmem:[#allocation4 + $0x6c0] ss:$8 sps:$4 sm:$0xff]  }
 0x118   :  { %5684 = vmatpush1.bf16.msra.mxu1 %v9304_v48  ;;  %5694 = vmatprep.subr.bf16.mxu0 %v9310_v50  ;;  %v9383_v48 = vld [vmem:[#allocation4 + $0x7c0] ss:$8 sps:$4 sm:$0xff]   ;;  %v9388_v50 = vld [vmem:[#allocation4 + $0x6d4] ss:$8 sps:$4 sm:$0xff]  }
 0x119   :  { %5735 = vmatprep.subr.bf16.mxu1 %v9313_v51  ;;  %v9391_v51 = vld [vmem:[#allocation4 + $0x7d4] ss:$8 sps:$4 sm:$0xff]  }
 0x11a   :  { %5645 = vmatmul.mubr.bf16.vlgmr.msra.gmra.mrb[8].mxu0 %v411_v54  ;;  %v9389_v54 = vld [vmem:[#allocation4 + $0x7d0] ss:$8 sps:$4 sm:$0xff]  }
 0x11b   :  { %5686 = vmatmul.mubr.bf16.vlgmr.msra.gmra.mrb[8].mxu1 %v413_v55  ;;  %5695 = vmatpush1.bf16.msra.mxu0 %v9308_v56  ;;  %v9394_v55 = vld [vmem:[#allocation4 + $0x6e4] ss:$8 sps:$4 sm:$0xff]  }
 0x11c   :  { %5736 = vmatpush1.bf16.msra.mxu1 %v9311_v57  ;;  %5696 = vmatprep.subr.bf16.mxu0 %v9316_v58  ;;  %v9397_v56 = vld [vmem:[#allocation4 + $0x7e4] ss:$8 sps:$4 sm:$0xff]   ;;  %v190_v57 = vcombine.high %v98_v53, %v98_v53  ;;  %v9392_v58 = vld [vmem:[#allocation4 + $0x6e0] ss:$8 sps:$4 sm:$0xff]  }
 0x11d   :  { %5737 = vmatprep.subr.bf16.mxu1 %v9319_v59  ;;  %5726 = vmatprep.mubr.bf16.mxu0 %v416_v60  ;;  %v9395_v59 = vld [vmem:[#allocation4 + $0x7e0] ss:$8 sps:$4 sm:$0xff]   ;;  %v9400_v60 = vld [vmem:[#allocation4 + $0x6f4] ss:$8 sps:$4 sm:$0xff]  }
 0x11e   :  { %5767 = vmatprep.mubr.bf16.mxu1 %v418_v61  ;;  %v9403_v61 = vld [vmem:[#allocation4 + $0x7f4] ss:$8 sps:$4 sm:$0xff]  }
 0x11f   :  { %5697 = vmatpush1.bf16.msra.mxu0 %v9314_v63  ;;  %v10662_v63 = vrot.slane %v98_v53, %v10613_v49  ;;  %v9450_v53 = vld [vmem:[#allocation4 + $0x970] ss:$8 sps:$4 sm:$0xff]  }
 0x120   :  { %5738 = vmatpush1.bf16.msra.mxu1 %v9317_v0  ;;  %5698 = vmatprep.subr.bf16.mxu0 %v9322_v37  ;;  %v10665_v0 = vrot.slane %v190_v57, %v10613_v49  ;;  %v9398_v37 = vld [vmem:[#allocation4 + $0x6f0] ss:$8 sps:$4 sm:$0xff]   ;;  %v9456_v57 = vld [vmem:[#allocation4 + $0x980] ss:$8 sps:$4 sm:$0xff]  }
 0x121   :  { %5739 = vmatprep.subr.bf16.mxu1 %v9325_v41  ;;  %v9401_v41 = vld [vmem:[#allocation4 + $0x7f0] ss:$8 sps:$4 sm:$0xff]  }
 0x123   :  { %5699 = vmatpush1.bf16.msra.mxu0 %v9320_v1  ;;  %v9407_v1 = vld [vmem:[#allocation4 + $0x804] ss:$8 sps:$4 sm:$0xff]  }
 0x124   :  { %5740 = vmatpush1.bf16.msra.mxu1 %v9323_v2  ;;  %5700 = vmatprep.subr.bf16.mxu0 %v9328_v3  ;;  %v9410_v2 = vld [vmem:[#allocation4 + $0x904] ss:$8 sps:$4 sm:$0xff]   ;;  %v205_v3 = vcombine.high %v10662_v63, %v10662_v63 }
 0x125   :  { %5741 = vmatprep.subr.bf16.mxu1 %v9331_v4  ;;  %v206_v4 = vcombine.high %v10665_v0, %v10665_v0 }
 0x127   :  { %5701 = vmatpush1.bf16.msra.mxu0 %v9326_v5  ;;  %v415_v5 = vpack.c.bf16 %v10648_v45, %v10648_v45  ;;  %v9419_v45 = vld [vmem:[#allocation4 + $0x824] ss:$8 sps:$4 sm:$0xff]  }
 0x128   :  { %5742 = vmatpush1.bf16.msra.mxu1 %v9329_v6  ;;  %5702 = vmatprep.subr.bf16.mxu0 %v9334_v7  ;;  %v417_v6 = vpack.c.bf16 %v10651_v46, %v10651_v46  ;;  %v9405_v7 = vld [vmem:[#allocation4 + $0x800] ss:$8 sps:$4 sm:$0xff]   ;;  %v9422_v46 = vld [vmem:[#allocation4 + $0x924] ss:$8 sps:$4 sm:$0xff]  }
 0x129   :  { %5743 = vmatprep.subr.bf16.mxu1 %v9337_v8  ;;  %v9408_v8 = vld [vmem:[#allocation4 + $0x900] ss:$8 sps:$4 sm:$0xff]  }
 0x12b   :  { %5703 = vmatpush1.bf16.msra.mxu0 %v9332_v9  ;;  %v9413_v9 = vld [vmem:[#allocation4 + $0x814] ss:$8 sps:$4 sm:$0xff]  }
 0x12c   :  { %5744 = vmatpush1.bf16.msra.mxu1 %v9335_v10  ;;  %5704 = vmatprep.subr.bf16.mxu0 %v9340_v11  ;;  %v9416_v10 = vld [vmem:[#allocation4 + $0x914] ss:$8 sps:$4 sm:$0xff]   ;;  %v420_v11 = vpack.c.bf16 %v205_v3, %v205_v3 }
 0x12d   :  { %5745 = vmatprep.subr.bf16.mxu1 %v9343_v12  ;;  %v422_v12 = vpack.c.bf16 %v206_v4, %v206_v4  ;;  %v9473_v3 = vld [vmem:[#allocation4 + $0x8b4] ss:$8 sps:$4 sm:$0xff]  }
 0x12e   :  { %v9476_v4 = vld [vmem:[#allocation4 + $0x9b4] ss:$8 sps:$4 sm:$0xff]  }
 0x12f   :  { %5705 = vmatpush1.bf16.msra.mxu0 %v9338_v13  ;;  %v9411_v13 = vld [vmem:[#allocation4 + $0x810] ss:$8 sps:$4 sm:$0xff]  }
 0x130   :  { %5746 = vmatpush1.bf16.msra.mxu1 %v9341_v14  ;;  %5706 = vmatprep.subr.bf16.mxu0 %v9346_v15  ;;  %v9414_v14 = vld [vmem:[#allocation4 + $0x910] ss:$8 sps:$4 sm:$0xff]   ;;  %v9417_v15 = vld [vmem:[#allocation4 + $0x820] ss:$8 sps:$4 sm:$0xff]  }
 0x131   :  { %5747 = vmatprep.subr.bf16.mxu1 %v9349_v17  ;;  %v9420_v17 = vld [vmem:[#allocation4 + $0x920] ss:$8 sps:$4 sm:$0xff]  }
 0x133   :  { %5707 = vmatpush1.bf16.msra.mxu0 %v9344_v18  ;;  %v9425_v18 = vld [vmem:[#allocation4 + $0x834] ss:$8 sps:$4 sm:$0xff]  }
 0x134   :  { %5748 = vmatpush1.bf16.msra.mxu1 %v9347_v19  ;;  %5708 = vmatprep.subr.bf16.mxu0 %v9352_v20  ;;  %v9428_v19 = vld [vmem:[#allocation4 + $0x934] ss:$8 sps:$4 sm:$0xff]   ;;  %v9423_v20 = vld [vmem:[#allocation4 + $0x830] ss:$8 sps:$4 sm:$0xff]  }
 0x135   :  { %5749 = vmatprep.subr.bf16.mxu1 %v9355_v21  ;;  %v9426_v21 = vld [vmem:[#allocation4 + $0x930] ss:$8 sps:$4 sm:$0xff]  }
 0x137   :  { %5709 = vmatpush1.bf16.msra.mxu0 %v9350_v22  ;;  %v9431_v22 = vld [vmem:[#allocation4 + $0x844] ss:$8 sps:$4 sm:$0xff]  }
 0x138   :  { %5750 = vmatpush1.bf16.msra.mxu1 %v9353_v23  ;;  %5710 = vmatprep.subr.bf16.mxu0 %v9358_v24  ;;  %v9434_v23 = vld [vmem:[#allocation4 + $0x944] ss:$8 sps:$4 sm:$0xff]   ;;  %v9429_v24 = vld [vmem:[#allocation4 + $0x840] ss:$8 sps:$4 sm:$0xff]  }
 0x139   :  { %5751 = vmatprep.subr.bf16.mxu1 %v9361_v25  ;;  %v9432_v25 = vld [vmem:[#allocation4 + $0x940] ss:$8 sps:$4 sm:$0xff]  }
 0x13b   :  { %5711 = vmatpush1.bf16.msra.mxu0 %v9356_v26  ;;  %v9437_v26 = vld [vmem:[#allocation4 + $0x854] ss:$8 sps:$4 sm:$0xff]  }
 0x13c   :  { %5752 = vmatpush1.bf16.msra.mxu1 %v9359_v27  ;;  %5712 = vmatprep.subr.bf16.mxu0 %v9364_v28  ;;  %v9440_v27 = vld [vmem:[#allocation4 + $0x954] ss:$8 sps:$4 sm:$0xff]   ;;  %v9435_v28 = vld [vmem:[#allocation4 + $0x850] ss:$8 sps:$4 sm:$0xff]  }
 0x13d   :  { %5753 = vmatprep.subr.bf16.mxu1 %v9367_v29  ;;  %v9438_v29 = vld [vmem:[#allocation4 + $0x950] ss:$8 sps:$4 sm:$0xff]  }
 0x13f   :  { %5713 = vmatpush1.bf16.msra.mxu0 %v9362_v30  ;;  %v9443_v30 = vld [vmem:[#allocation4 + $0x864] ss:$8 sps:$4 sm:$0xff]  }
 0x140   :  { %5754 = vmatpush1.bf16.msra.mxu1 %v9365_v31  ;;  %5714 = vmatprep.subr.bf16.mxu0 %v9370_v32  ;;  %v9446_v31 = vld [vmem:[#allocation4 + $0x964] ss:$8 sps:$4 sm:$0xff]  }
 0x141   :  { %5755 = vmatprep.subr.bf16.mxu1 %v9373_v33 }
 0x143   :  { %5715 = vmatpush1.bf16.msra.mxu0 %v9368_v34  ;;  %v9441_v34 = vld [vmem:[#allocation4 + $0x860] ss:$8 sps:$4 sm:$0xff]  }
 0x144   :  { %5756 = vmatpush1.bf16.msra.mxu1 %v9371_v35  ;;  %5716 = vmatprep.subr.bf16.mxu0 %v9376_v36  ;;  %v9444_v35 = vld [vmem:[#allocation4 + $0x960] ss:$8 sps:$4 sm:$0xff]  }
 0x145   :  { %5757 = vmatprep.subr.bf16.mxu1 %v9379_v38 }
 0x147   :  { %5717 = vmatpush1.bf16.msra.mxu0 %v9374_v39 }
 0x148   :  { %5758 = vmatpush1.bf16.msra.mxu1 %v9377_v40  ;;  %5718 = vmatprep.subr.bf16.mxu0 %v9382_v42 }
 0x149   :  { %5759 = vmatprep.subr.bf16.mxu1 %v9385_v44 }
 0x14b   :  { %5719 = vmatpush1.bf16.msra.mxu0 %v9380_v47 }
 0x14c   :  { %5760 = vmatpush1.bf16.msra.mxu1 %v9383_v48  ;;  %5720 = vmatprep.subr.bf16.mxu0 %v9388_v50  ;;  %v9449_v50 = vld [vmem:[#allocation4 + $0x874] ss:$8 sps:$4 sm:$0xff]  }
 0x14d   :  { %5761 = vmatprep.subr.bf16.mxu1 %v9391_v51  ;;  %v9452_v51 = vld [vmem:[#allocation4 + $0x974] ss:$8 sps:$4 sm:$0xff]  }
 0x14f   :  { %5721 = vmatpush1.bf16.msra.mxu0 %v9386_v52  ;;  %v9447_v52 = vld [vmem:[#allocation4 + $0x870] ss:$8 sps:$4 sm:$0xff]  }
 0x150   :  { %5762 = vmatpush1.bf16.msra.mxu1 %v9389_v54  ;;  %5722 = vmatprep.subr.bf16.mxu0 %v9394_v55  ;;  %v9455_v54 = vld [vmem:[#allocation4 + $0x884] ss:$8 sps:$4 sm:$0xff]  }
 0x151   :  { %5763 = vmatprep.subr.bf16.mxu1 %v9397_v56  ;;  %v9458_v55 = vld [vmem:[#allocation4 + $0x984] ss:$8 sps:$4 sm:$0xff]   ;;  %v9453_v56 = vld [vmem:[#allocation4 + $0x880] ss:$8 sps:$4 sm:$0xff]  }
 0x153   :  { %5723 = vmatpush1.bf16.msra.mxu0 %v9392_v58  ;;  %v9461_v58 = vld [vmem:[#allocation4 + $0x894] ss:$8 sps:$4 sm:$0xff]  }
 0x154   :  { %5764 = vmatpush1.bf16.msra.mxu1 %v9395_v59  ;;  %5724 = vmatprep.subr.bf16.mxu0 %v9400_v60  ;;  %v9464_v59 = vld [vmem:[#allocation4 + $0x994] ss:$8 sps:$4 sm:$0xff]   ;;  %v9459_v60 = vld [vmem:[#allocation4 + $0x890] ss:$8 sps:$4 sm:$0xff]  }
 0x155   :  { %5765 = vmatprep.subr.bf16.mxu1 %v9403_v61  ;;  %v9462_v61 = vld [vmem:[#allocation4 + $0x990] ss:$8 sps:$4 sm:$0xff]  }
 0x157   :  { %5725 = vmatpush1.bf16.msra.mxu0 %v9398_v37  ;;  %v9467_v37 = vld [vmem:[#allocation4 + $0x8a4] ss:$8 sps:$4 sm:$0xff]  }
 0x158   :  { %5766 = vmatpush1.bf16.msra.mxu1 %v9401_v41  ;;  %5776 = vmatprep.subr.bf16.mxu0 %v9407_v1  ;;  %v9470_v41 = vld [vmem:[#allocation4 + $0x9a4] ss:$8 sps:$4 sm:$0xff]   ;;  %v9465_v1 = vld [vmem:[#allocation4 + $0x8a0] ss:$8 sps:$4 sm:$0xff]  }
 0x159   :  { %5817 = vmatprep.subr.bf16.mxu1 %v9410_v2  ;;  %v9468_v2 = vld [vmem:[#allocation4 + $0x9a0] ss:$8 sps:$4 sm:$0xff]  }
 0x15a   :  { %5727 = vmatmul.mubr.bf16.vlgmr.msra.gmra.mrb[12].mxu0 %v415_v5  ;;  %v9471_v5 = vld [vmem:[#allocation4 + $0x8b0] ss:$8 sps:$4 sm:$0xff]  }
 0x15b   :  { %5768 = vmatmul.mubr.bf16.vlgmr.msra.gmra.mrb[12].mxu1 %v417_v6  ;;  %5777 = vmatpush1.bf16.msra.mxu0 %v9405_v7  ;;  %v9474_v6 = vld [vmem:[#allocation4 + $0x9b0] ss:$8 sps:$4 sm:$0xff]   ;;  %v9479_v7 = vld [vmem:[#allocation4 + $0x8c4] ss:$8 sps:$4 sm:$0xff]  }
 0x15c   :  { %5818 = vmatpush1.bf16.msra.mxu1 %v9408_v8  ;;  %5778 = vmatprep.subr.bf16.mxu0 %v9413_v9  ;;  %v9482_v8 = vld [vmem:[#allocation4 + $0x9c4] ss:$8 sps:$4 sm:$0xff]   ;;  %v9477_v9 = vld [vmem:[#allocation4 + $0x8c0] ss:$8 sps:$4 sm:$0xff]  }
 0x15d   :  { %5819 = vmatprep.subr.bf16.mxu1 %v9416_v10  ;;  %5808 = vmatprep.mubr.bf16.mxu0 %v420_v11  ;;  %v9480_v10 = vld [vmem:[#allocation4 + $0x9c0] ss:$8 sps:$4 sm:$0xff]   ;;  %v9485_v11 = vld [vmem:[#allocation4 + $0x8d4] ss:$8 sps:$4 sm:$0xff]  }
 0x15e   :  { %5849 = vmatprep.mubr.bf16.mxu1 %v422_v12  ;;  %v9488_v12 = vld [vmem:[#allocation4 + $0x9d4] ss:$8 sps:$4 sm:$0xff]  }
 0x15f   :  { %5779 = vmatpush1.bf16.msra.mxu0 %v9411_v13  ;;  %v99_v13 = vld [vmem:[#allocation2 + $0x28] sm:$0xff] }
 0x160   :  { %5820 = vmatpush1.bf16.msra.mxu1 %v9414_v14  ;;  %5780 = vmatprep.subr.bf16.mxu0 %v9419_v45  ;;  %v9483_v14 = vld [vmem:[#allocation4 + $0x8d0] ss:$8 sps:$4 sm:$0xff]  }
 0x161   :  { %5821 = vmatprep.subr.bf16.mxu1 %v9422_v46  ;;  %v9486_v45 = vld [vmem:[#allocation4 + $0x9d0] ss:$8 sps:$4 sm:$0xff]   ;;  %v9491_v46 = vld [vmem:[#allocation4 + $0x8e4] ss:$8 sps:$4 sm:$0xff]  }
 0x163   :  { %5781 = vmatpush1.bf16.msra.mxu0 %v9417_v15  ;;  %v9494_v15 = vld [vmem:[#allocation4 + $0x9e4] ss:$8 sps:$4 sm:$0xff]  }
 0x164   :  { %5822 = vmatpush1.bf16.msra.mxu1 %v9420_v17  ;;  %5782 = vmatprep.subr.bf16.mxu0 %v9425_v18  ;;  %v207_v17 = vcombine.high %v99_v13, %v99_v13  ;;  %v9489_v18 = vld [vmem:[#allocation4 + $0x8e0] ss:$8 sps:$4 sm:$0xff]  }
 0x165   :  { %5823 = vmatprep.subr.bf16.mxu1 %v9428_v19  ;;  %v9492_v19 = vld [vmem:[#allocation4 + $0x9e0] ss:$8 sps:$4 sm:$0xff]  }
 0x167   :  { %5783 = vmatpush1.bf16.msra.mxu0 %v9423_v20  ;;  %v9497_v20 = vld [vmem:[#allocation4 + $0x8f4] ss:$8 sps:$4 sm:$0xff]  }
 0x168   :  { %5824 = vmatpush1.bf16.msra.mxu1 %v9426_v21  ;;  %5784 = vmatprep.subr.bf16.mxu0 %v9431_v22  ;;  %v9500_v21 = vld [vmem:[#allocation4 + $0x9f4] ss:$8 sps:$4 sm:$0xff]   ;;  %v10680_v22 = vrot.slane %v99_v13, %v10613_v49 }
 0x169   :  { %5825 = vmatprep.subr.bf16.mxu1 %v9434_v23  ;;  %v10683_v23 = vrot.slane %v207_v17, %v10613_v49  ;;  %v9555_v17 = vld [vmem:[#allocation4 + $0xb84] ss:$8 sps:$4 sm:$0xff]  }
 0x16b   :  { %5785 = vmatpush1.bf16.msra.mxu0 %v9429_v24  ;;  %v9495_v24 = vld [vmem:[#allocation4 + $0x8f0] ss:$8 sps:$4 sm:$0xff]  }
 0x16c   :  { %5826 = vmatpush1.bf16.msra.mxu1 %v9432_v25  ;;  %5786 = vmatprep.subr.bf16.mxu0 %v9437_v26  ;;  %v9498_v25 = vld [vmem:[#allocation4 + $0x9f0] ss:$8 sps:$4 sm:$0xff]   ;;  %v9504_v26 = vld [vmem:[#allocation4 + $0xa04] ss:$8 sps:$4 sm:$0xff]  }
 0x16d   :  { %5827 = vmatprep.subr.bf16.mxu1 %v9440_v27  ;;  %v5482_v32 = vpop.f32.mrb[0].mxu0  ;;  %v9507_v27 = vld [vmem:[#allocation4 + $0xb04] ss:$8 sps:$4 sm:$0xff]  }
 0x16e   :  { %v5523_v33 = vpop.f32.mrb[0].mxu1  ;;  %v5484_v38 = vpop.f32.mrb[1].mxu0 }
 0x16f   :  { %v10675_v36 = vadd.f32 %v5523_v33, %v5482_v32  ;;  %v5525_v39 = vpop.f32.mrb[1].mxu1  ;;  %v5486_v42 = vpop.f32.mrb[2].mxu0  ;;  %5787 = vmatpush1.bf16.msra.mxu0 %v9435_v28  ;;  %v9502_v28 = vld [vmem:[#allocation4 + $0xa00] ss:$8 sps:$4 sm:$0xff]   ;;  %v419_v32 = vpack.c.bf16 %v10662_v63, %v10662_v63  ;;  %v421_v33 = vpack.c.bf16 %v10665_v0, %v10665_v0  ;;  %v9516_v63 = vld [vmem:[#allocation4 + $0xa24] ss:$8 sps:$4 sm:$0xff]  }
 0x170   :  { %v10677_v40 = vadd.f32 %v5525_v39, %v5484_v38  ;;  %v5527_v44 = vpop.f32.mrb[2].mxu1  ;;  %5828 = vmatpush1.bf16.msra.mxu1 %v9438_v29  ;;  %v5487_v47 = vpop.f32.mrb[3].mxu0  ;;  %5788 = vmatprep.subr.bf16.mxu0 %v9443_v30  ;;  %v9505_v29 = vld [vmem:[#allocation4 + $0xb00] ss:$8 sps:$4 sm:$0xff]   ;;  %v222_v30 = vcombine.high %v10680_v22, %v10680_v22  ;;  %v9508_v42 = vld [vmem:[#allocation4 + $0xa10] ss:$8 sps:$4 sm:$0xff]  }
 0x171   :  { %v5528_v48 = vpop.f32.mrb[3].mxu1  ;;  %5829 = vmatprep.subr.bf16.mxu1 %v9446_v31  ;;  %v223_v31 = vcombine.high %v10683_v23, %v10683_v23  ;;  %v9511_v44 = vld [vmem:[#allocation4 + $0xb10] ss:$8 sps:$4 sm:$0xff]   ;;  %v9519_v47 = vld [vmem:[#allocation4 + $0xb24] ss:$8 sps:$4 sm:$0xff]  }
 0x172   :  { %v424_v38 = vpack.c.bf16 %v222_v30, %v222_v30  ;;  %v9514_v0 = vld [vmem:[#allocation4 + $0xa20] ss:$8 sps:$4 sm:$0xff]   ;;  %v9570_v30 = vld [vmem:[#allocation4 + $0xab4] ss:$8 sps:$4 sm:$0xff]  }
 0x173   :  { %5789 = vmatpush1.bf16.msra.mxu0 %v9441_v34  ;;  %v9510_v34 = vld [vmem:[#allocation4 + $0xa14] ss:$8 sps:$4 sm:$0xff]   ;;  %v426_v39 = vpack.c.bf16 %v223_v31, %v223_v31  ;;  %v9517_v48 = vld [vmem:[#allocation4 + $0xb20] ss:$8 sps:$4 sm:$0xff]  }
 0x174   :  { %5830 = vmatpush1.bf16.msra.mxu1 %v9444_v35  ;;  %5790 = vmatprep.subr.bf16.mxu0 %v9449_v50  ;;  %v9513_v35 = vld [vmem:[#allocation4 + $0xb14] ss:$8 sps:$4 sm:$0xff]  }
 0x175   :  { %5831 = vmatprep.subr.bf16.mxu1 %v9452_v51  ;;  %v9522_v50 = vld [vmem:[#allocation4 + $0xa34] ss:$8 sps:$4 sm:$0xff]  }
 0x176   :  { %v9525_v51 = vld [vmem:[#allocation4 + $0xb34] ss:$8 sps:$4 sm:$0xff]  }
 0x177   :  { %5791 = vmatpush1.bf16.msra.mxu0 %v9447_v52  ;;  %v9520_v52 = vld [vmem:[#allocation4 + $0xa30] ss:$8 sps:$4 sm:$0xff]   ;;  %v9573_v31 = vld [vmem:[#allocation4 + $0xbb4] ss:$8 sps:$4 sm:$0xff]  }
 0x178   :  { %5832 = vmatpush1.bf16.msra.mxu1 %v9450_v53  ;;  %5792 = vmatprep.subr.bf16.mxu0 %v9455_v54  ;;  %v9523_v53 = vld [vmem:[#allocation4 + $0xb30] ss:$8 sps:$4 sm:$0xff]   ;;  %v9528_v54 = vld [vmem:[#allocation4 + $0xa44] ss:$8 sps:$4 sm:$0xff]  }
 0x179   :  { %5833 = vmatprep.subr.bf16.mxu1 %v9458_v55  ;;  %v9531_v55 = vld [vmem:[#allocation4 + $0xb44] ss:$8 sps:$4 sm:$0xff]  }
 0x17b   :  { %5793 = vmatpush1.bf16.msra.mxu0 %v9453_v56  ;;  %v9526_v56 = vld [vmem:[#allocation4 + $0xa40] ss:$8 sps:$4 sm:$0xff]  }
 0x17c   :  { %5834 = vmatpush1.bf16.msra.mxu1 %v9456_v57  ;;  %5794 = vmatprep.subr.bf16.mxu0 %v9461_v58  ;;  %v9529_v57 = vld [vmem:[#allocation4 + $0xb40] ss:$8 sps:$4 sm:$0xff]   ;;  %v9534_v58 = vld [vmem:[#allocation4 + $0xa54] ss:$8 sps:$4 sm:$0xff]  }
 0x17d   :  { %5835 = vmatprep.subr.bf16.mxu1 %v9464_v59  ;;  %v9537_v59 = vld [vmem:[#allocation4 + $0xb54] ss:$8 sps:$4 sm:$0xff]  }
 0x17f   :  { %5795 = vmatpush1.bf16.msra.mxu0 %v9459_v60  ;;  %v9532_v60 = vld [vmem:[#allocation4 + $0xa50] ss:$8 sps:$4 sm:$0xff]  }
 0x180   :  { %5836 = vmatpush1.bf16.msra.mxu1 %v9462_v61  ;;  %5796 = vmatprep.subr.bf16.mxu0 %v9467_v37  ;;  %v9535_v61 = vld [vmem:[#allocation4 + $0xb50] ss:$8 sps:$4 sm:$0xff]   ;;  %v9540_v37 = vld [vmem:[#allocation4 + $0xa64] ss:$8 sps:$4 sm:$0xff]  }
 0x181   :  { %5837 = vmatprep.subr.bf16.mxu1 %v9470_v41  ;;  %v9543_v41 = vld [vmem:[#allocation4 + $0xb64] ss:$8 sps:$4 sm:$0xff]  }
 0x183   :  { %5797 = vmatpush1.bf16.msra.mxu0 %v9465_v1 }
 0x184   :  { %5838 = vmatpush1.bf16.msra.mxu1 %v9468_v2  ;;  %5798 = vmatprep.subr.bf16.mxu0 %v9473_v3  ;;  %v9538_v3 = vld [vmem:[#allocation4 + $0xa60] ss:$8 sps:$4 sm:$0xff]  }
 0x185   :  { %5839 = vmatprep.subr.bf16.mxu1 %v9476_v4  ;;  %v9541_v4 = vld [vmem:[#allocation4 + $0xb60] ss:$8 sps:$4 sm:$0xff]  }
 0x187   :  { %5799 = vmatpush1.bf16.msra.mxu0 %v9471_v5 }
 0x188   :  { %5840 = vmatpush1.bf16.msra.mxu1 %v9474_v6  ;;  %5800 = vmatprep.subr.bf16.mxu0 %v9479_v7 }
 0x189   :  { %5841 = vmatprep.subr.bf16.mxu1 %v9482_v8 }
 0x18b   :  { %5801 = vmatpush1.bf16.msra.mxu0 %v9477_v9 }
 0x18c   :  { %5842 = vmatpush1.bf16.msra.mxu1 %v9480_v10  ;;  %5802 = vmatprep.subr.bf16.mxu0 %v9485_v11 }
 0x18d   :  { %5843 = vmatprep.subr.bf16.mxu1 %v9488_v12 }
 0x18f   :  { %5803 = vmatpush1.bf16.msra.mxu0 %v9483_v14  ;;  %v9546_v14 = vld [vmem:[#allocation4 + $0xa74] ss:$8 sps:$4 sm:$0xff]  }
 0x190   :  { %5844 = vmatpush1.bf16.msra.mxu1 %v9486_v45  ;;  %5804 = vmatprep.subr.bf16.mxu0 %v9491_v46  ;;  %v9549_v45 = vld [vmem:[#allocation4 + $0xb74] ss:$8 sps:$4 sm:$0xff]  }
 0x191   :  { %5845 = vmatprep.subr.bf16.mxu1 %v9494_v15  ;;  %v9547_v15 = vld [vmem:[#allocation4 + $0xb70] ss:$8 sps:$4 sm:$0xff]  }
 0x193   :  { %5805 = vmatpush1.bf16.msra.mxu0 %v9489_v18  ;;  %v9550_v18 = vld [vmem:[#allocation4 + $0xa80] ss:$8 sps:$4 sm:$0xff]  }
 0x194   :  { %5846 = vmatpush1.bf16.msra.mxu1 %v9492_v19  ;;  %5806 = vmatprep.subr.bf16.mxu0 %v9497_v20  ;;  %v9553_v19 = vld [vmem:[#allocation4 + $0xb80] ss:$8 sps:$4 sm:$0xff]   ;;  %v9558_v20 = vld [vmem:[#allocation4 + $0xa94] ss:$8 sps:$4 sm:$0xff]  }
 0x195   :  { %5847 = vmatprep.subr.bf16.mxu1 %v9500_v21  ;;  %v9561_v21 = vld [vmem:[#allocation4 + $0xb94] ss:$8 sps:$4 sm:$0xff]  }
 0x197   :  { %5807 = vmatpush1.bf16.msra.mxu0 %v9495_v24  ;;  %v9556_v24 = vld [vmem:[#allocation4 + $0xa90] ss:$8 sps:$4 sm:$0xff]  }
 0x198   :  { %5848 = vmatpush1.bf16.msra.mxu1 %v9498_v25  ;;  %5858 = vmatprep.subr.bf16.mxu0 %v9504_v26  ;;  %v9559_v25 = vld [vmem:[#allocation4 + $0xb90] ss:$8 sps:$4 sm:$0xff]   ;;  %v9564_v26 = vld [vmem:[#allocation4 + $0xaa4] ss:$8 sps:$4 sm:$0xff]  }
 0x199   :  { %5899 = vmatprep.subr.bf16.mxu1 %v9507_v27  ;;  %v9567_v27 = vld [vmem:[#allocation4 + $0xba4] ss:$8 sps:$4 sm:$0xff]  }
 0x19a   :  { %5809 = vmatmul.mubr.bf16.vlgmr.msra.gmra.mrb[16].mxu0 %v419_v32  ;;  %v9568_v32 = vld [vmem:[#allocation4 + $0xab0] ss:$8 sps:$4 sm:$0xff]  }
 0x19b   :  { %5850 = vmatmul.mubr.bf16.vlgmr.msra.gmra.mrb[16].mxu1 %v421_v33  ;;  %5859 = vmatpush1.bf16.msra.mxu0 %v9502_v28  ;;  %v9562_v28 = vld [vmem:[#allocation4 + $0xaa0] ss:$8 sps:$4 sm:$0xff]   ;;  %v9571_v33 = vld [vmem:[#allocation4 + $0xbb0] ss:$8 sps:$4 sm:$0xff]  }
 0x19c   :  { %5900 = vmatpush1.bf16.msra.mxu1 %v9505_v29  ;;  %5860 = vmatprep.subr.bf16.mxu0 %v9510_v34  ;;  %v9565_v29 = vld [vmem:[#allocation4 + $0xba0] ss:$8 sps:$4 sm:$0xff]   ;;  %v9576_v34 = vld [vmem:[#allocation4 + $0xac4] ss:$8 sps:$4 sm:$0xff]  }
 0x19d   :  { %5901 = vmatprep.subr.bf16.mxu1 %v9513_v35  ;;  %5890 = vmatprep.mubr.bf16.mxu0 %v424_v38  ;;  %v9579_v35 = vld [vmem:[#allocation4 + $0xbc4] ss:$8 sps:$4 sm:$0xff]   ;;  %v9574_v38 = vld [vmem:[#allocation4 + $0xac0] ss:$8 sps:$4 sm:$0xff]  }
 0x19e   :  { %5931 = vmatprep.mubr.bf16.mxu1 %v426_v39  ;;  %v9577_v39 = vld [vmem:[#allocation4 + $0xbc0] ss:$8 sps:$4 sm:$0xff]  }
 0x19f   :  { %5861 = vmatpush1.bf16.msra.mxu0 %v9508_v42  ;;  %v9582_v42 = vld [vmem:[#allocation4 + $0xad4] ss:$8 sps:$4 sm:$0xff]  }
 0x1a0   :  { %5902 = vmatpush1.bf16.msra.mxu1 %v9511_v44  ;;  %5862 = vmatprep.subr.bf16.mxu0 %v9516_v63  ;;  %v9585_v44 = vld [vmem:[#allocation4 + $0xbd4] ss:$8 sps:$4 sm:$0xff]   ;;  %v100_v63 = vld [vmem:[#allocation2 + $0x30] sm:$0xff] }
 0x1a1   :  { %5903 = vmatprep.subr.bf16.mxu1 %v9519_v47  ;;  %v9580_v47 = vld [vmem:[#allocation4 + $0xad0] ss:$8 sps:$4 sm:$0xff]  }
 0x1a3   :  { %5863 = vmatpush1.bf16.msra.mxu0 %v9514_v0  ;;  %v9583_v0 = vld [vmem:[#allocation4 + $0xbd0] ss:$8 sps:$4 sm:$0xff]  }
 0x1a4   :  { %5904 = vmatpush1.bf16.msra.mxu1 %v9517_v48  ;;  %5864 = vmatprep.subr.bf16.mxu0 %v9522_v50  ;;  %v9588_v48 = vld [vmem:[#allocation4 + $0xae4] ss:$8 sps:$4 sm:$0xff]  }
 0x1a5   :  { %5905 = vmatprep.subr.bf16.mxu1 %v9525_v51  ;;  %v9591_v50 = vld [vmem:[#allocation4 + $0xbe4] ss:$8 sps:$4 sm:$0xff]   ;;  %v224_v51 = vcombine.high %v100_v63, %v100_v63 }
 0x1a7   :  { %5865 = vmatpush1.bf16.msra.mxu0 %v9520_v52  ;;  %v9586_v52 = vld [vmem:[#allocation4 + $0xae0] ss:$8 sps:$4 sm:$0xff]  }
 0x1a8   :  { %5906 = vmatpush1.bf16.msra.mxu1 %v9523_v53  ;;  %5866 = vmatprep.subr.bf16.mxu0 %v9528_v54  ;;  %v9589_v53 = vld [vmem:[#allocation4 + $0xbe0] ss:$8 sps:$4 sm:$0xff]   ;;  %v9594_v54 = vld [vmem:[#allocation4 + $0xaf4] ss:$8 sps:$4 sm:$0xff]  }
 0x1a9   :  { %5907 = vmatprep.subr.bf16.mxu1 %v9531_v55  ;;  %v9597_v55 = vld [vmem:[#allocation4 + $0xbf4] ss:$8 sps:$4 sm:$0xff]  }
 0x1ab   :  { %5867 = vmatpush1.bf16.msra.mxu0 %v9526_v56  ;;  %v10700_v56 = vrot.slane %v100_v63, %v10613_v49 }
 0x1ac   :  { %5908 = vmatpush1.bf16.msra.mxu1 %v9529_v57  ;;  %5868 = vmatprep.subr.bf16.mxu0 %v9534_v58  ;;  %v10703_v57 = vrot.slane %v224_v51, %v10613_v49  ;;  %v9592_v58 = vld [vmem:[#allocation4 + $0xaf0] ss:$8 sps:$4 sm:$0xff]   ;;  %v9652_v51 = vld [vmem:[#allocation4 + $0xd84] ss:$8 sps:$4 sm:$0xff]  }
 0x1ad   :  { %5909 = vmatprep.subr.bf16.mxu1 %v9537_v59  ;;  %v5564_v1 = vpop.f32.mrb[4].mxu0  ;;  %v9595_v59 = vld [vmem:[#allocation4 + $0xbf0] ss:$8 sps:$4 sm:$0xff]  }
 0x1ae   :  { %v5605_v2 = vpop.f32.mrb[4].mxu1  ;;  %v5565_v5 = vadd.f32 %v5564_v1, %v10675_v36  ;;  %v5566_v6 = vpop.f32.mrb[5].mxu0  ;;  %v9544_v36 = vld [vmem:[#allocation4 + $0xa70] ss:$8 sps:$4 sm:$0xff]   ;;  %v239_v1 = vcombine.high %v10700_v56, %v10700_v56 }
 0x1af   :  { %v5607_v7 = vpop.f32.mrb[5].mxu1  ;;  %v5567_v8 = vadd.f32 %v5566_v6, %v10677_v40  ;;  %v5568_v9 = vpop.f32.mrb[6].mxu0  ;;  %5869 = vmatpush1.bf16.msra.mxu0 %v9532_v60  ;;  %v9552_v40 = vld [vmem:[#allocation4 + $0xa84] ss:$8 sps:$4 sm:$0xff]   ;;  %v9610_v6 = vld [vmem:[#allocation4 + $0xd14] ss:$8 sps:$4 sm:$0xff]  }
 0x1b0   :  { %v5609_v10 = vpop.f32.mrb[6].mxu1  ;;  %5910 = vmatpush1.bf16.msra.mxu1 %v9535_v61  ;;  %v10695_v11 = vadd.f32 %v5605_v2, %v5565_v5  ;;  %v5569_v12 = vpop.f32.mrb[7].mxu0  ;;  %5870 = vmatprep.subr.bf16.mxu0 %v9540_v37  ;;  %v9601_v60 = vld [vmem:[#allocation4 + $0xc04] ss:$8 sps:$4 sm:$0xff]   ;;  %v9599_v37 = vld [vmem:[#allocation4 + $0xc00] ss:$8 sps:$4 sm:$0xff]   ;;  %v240_v2 = vcombine.high %v10703_v57, %v10703_v57 }
 0x1b1   :  { %v5610_v13 = vpop.f32.mrb[7].mxu1  ;;  %5911 = vmatprep.subr.bf16.mxu1 %v9543_v41  ;;  %v10697_v46 = vadd.f32 %v5607_v7, %v5567_v8  ;;  %v9604_v61 = vld [vmem:[#allocation4 + $0xd04] ss:$8 sps:$4 sm:$0xff]   ;;  %v9602_v41 = vld [vmem:[#allocation4 + $0xd00] ss:$8 sps:$4 sm:$0xff]   ;;  %v428_v7 = vpack.c.bf16 %v239_v1, %v239_v1 }
 0x1b2   :  { %v9607_v5 = vld [vmem:[#allocation4 + $0xc14] ss:$8 sps:$4 sm:$0xff]   ;;  %v430_v8 = vpack.c.bf16 %v240_v2, %v240_v2  ;;  %v9605_v9 = vld [vmem:[#allocation4 + $0xc10] ss:$8 sps:$4 sm:$0xff]   ;;  %v9616_v12 = vld [vmem:[#allocation4 + $0xd24] ss:$8 sps:$4 sm:$0xff]  }
 0x1b3   :  { %5871 = vmatpush1.bf16.msra.mxu0 %v9538_v3  ;;  %v423_v3 = vpack.c.bf16 %v10680_v22, %v10680_v22  ;;  %v9608_v10 = vld [vmem:[#allocation4 + $0xd10] ss:$8 sps:$4 sm:$0xff]   ;;  %v9613_v22 = vld [vmem:[#allocation4 + $0xc24] ss:$8 sps:$4 sm:$0xff]   ;;  %v9614_v13 = vld [vmem:[#allocation4 + $0xd20] ss:$8 sps:$4 sm:$0xff]  }
 0x1b4   :  { %5912 = vmatpush1.bf16.msra.mxu1 %v9541_v4  ;;  %5872 = vmatprep.subr.bf16.mxu0 %v9546_v14  ;;  %v425_v4 = vpack.c.bf16 %v10683_v23, %v10683_v23  ;;  %v9611_v23 = vld [vmem:[#allocation4 + $0xc20] ss:$8 sps:$4 sm:$0xff]   ;;  %v9619_v14 = vld [vmem:[#allocation4 + $0xc34] ss:$8 sps:$4 sm:$0xff]  }
 0x1b5   :  { %5913 = vmatprep.subr.bf16.mxu1 %v9549_v45  ;;  %v9622_v45 = vld [vmem:[#allocation4 + $0xd34] ss:$8 sps:$4 sm:$0xff]  }
 0x1b6   :  { %v9667_v1 = vld [vmem:[#allocation4 + $0xcb4] ss:$8 sps:$4 sm:$0xff]  }
 0x1b7   :  { %5873 = vmatpush1.bf16.msra.mxu0 %v9544_v36  ;;  %v9617_v36 = vld [vmem:[#allocation4 + $0xc30] ss:$8 sps:$4 sm:$0xff]   ;;  %v9670_v2 = vld [vmem:[#allocation4 + $0xdb4] ss:$8 sps:$4 sm:$0xff]  }
 0x1b8   :  { %5914 = vmatpush1.bf16.msra.mxu1 %v9547_v15  ;;  %5874 = vmatprep.subr.bf16.mxu0 %v9552_v40  ;;  %v9620_v15 = vld [vmem:[#allocation4 + $0xd30] ss:$8 sps:$4 sm:$0xff]   ;;  %v9625_v40 = vld [vmem:[#allocation4 + $0xc44] ss:$8 sps:$4 sm:$0xff]  }
 0x1b9   :  { %5915 = vmatprep.subr.bf16.mxu1 %v9555_v17  ;;  %v9628_v17 = vld [vmem:[#allocation4 + $0xd44] ss:$8 sps:$4 sm:$0xff]  }
 0x1bb   :  { %5875 = vmatpush1.bf16.msra.mxu0 %v9550_v18  ;;  %v9623_v18 = vld [vmem:[#allocation4 + $0xc40] ss:$8 sps:$4 sm:$0xff]  }
 0x1bc   :  { %5916 = vmatpush1.bf16.msra.mxu1 %v9553_v19  ;;  %5876 = vmatprep.subr.bf16.mxu0 %v9558_v20  ;;  %v9626_v19 = vld [vmem:[#allocation4 + $0xd40] ss:$8 sps:$4 sm:$0xff]   ;;  %v9631_v20 = vld [vmem:[#allocation4 + $0xc54] ss:$8 sps:$4 sm:$0xff]  }
 0x1bd   :  { %5917 = vmatprep.subr.bf16.mxu1 %v9561_v21  ;;  %v9634_v21 = vld [vmem:[#allocation4 + $0xd54] ss:$8 sps:$4 sm:$0xff]  }
 0x1bf   :  { %5877 = vmatpush1.bf16.msra.mxu0 %v9556_v24  ;;  %v9629_v24 = vld [vmem:[#allocation4 + $0xc50] ss:$8 sps:$4 sm:$0xff]  }
 0x1c0   :  { %5918 = vmatpush1.bf16.msra.mxu1 %v9559_v25  ;;  %5878 = vmatprep.subr.bf16.mxu0 %v9564_v26  ;;  %v9632_v25 = vld [vmem:[#allocation4 + $0xd50] ss:$8 sps:$4 sm:$0xff]   ;;  %v9637_v26 = vld [vmem:[#allocation4 + $0xc64] ss:$8 sps:$4 sm:$0xff]  }
 0x1c1   :  { %5919 = vmatprep.subr.bf16.mxu1 %v9567_v27  ;;  %v9640_v27 = vld [vmem:[#allocation4 + $0xd64] ss:$8 sps:$4 sm:$0xff]  }
 0x1c3   :  { %5879 = vmatpush1.bf16.msra.mxu0 %v9562_v28 }
 0x1c4   :  { %5920 = vmatpush1.bf16.msra.mxu1 %v9565_v29  ;;  %5880 = vmatprep.subr.bf16.mxu0 %v9570_v30  ;;  %v9635_v30 = vld [vmem:[#allocation4 + $0xc60] ss:$8 sps:$4 sm:$0xff]  }
 0x1c5   :  { %5921 = vmatprep.subr.bf16.mxu1 %v9573_v31  ;;  %v9638_v31 = vld [vmem:[#allocation4 + $0xd60] ss:$8 sps:$4 sm:$0xff]  }
 0x1c7   :  { %5881 = vmatpush1.bf16.msra.mxu0 %v9568_v32 }
 0x1c8   :  { %5922 = vmatpush1.bf16.msra.mxu1 %v9571_v33  ;;  %5882 = vmatprep.subr.bf16.mxu0 %v9576_v34 }
 0x1c9   :  { %5923 = vmatprep.subr.bf16.mxu1 %v9579_v35 }
 0x1cb   :  { %5883 = vmatpush1.bf16.msra.mxu0 %v9574_v38 }
 0x1cc   :  { %5924 = vmatpush1.bf16.msra.mxu1 %v9577_v39  ;;  %5884 = vmatprep.subr.bf16.mxu0 %v9582_v42 }
 0x1cd   :  { %5925 = vmatprep.subr.bf16.mxu1 %v9585_v44 }
 0x1cf   :  { %5885 = vmatpush1.bf16.msra.mxu0 %v9580_v47  ;;  %v9643_v47 = vld [vmem:[#allocation4 + $0xc74] ss:$8 sps:$4 sm:$0xff]  }
 0x1d0   :  { %5926 = vmatpush1.bf16.msra.mxu1 %v9583_v0  ;;  %5886 = vmatprep.subr.bf16.mxu0 %v9588_v48  ;;  %v9646_v0 = vld [vmem:[#allocation4 + $0xd74] ss:$8 sps:$4 sm:$0xff]  }
 0x1d1   :  { %5927 = vmatprep.subr.bf16.mxu1 %v9591_v50  ;;  %v9644_v50 = vld [vmem:[#allocation4 + $0xd70] ss:$8 sps:$4 sm:$0xff]  }
 0x1d3   :  { %5887 = vmatpush1.bf16.msra.mxu0 %v9586_v52  ;;  %v9647_v52 = vld [vmem:[#allocation4 + $0xc80] ss:$8 sps:$4 sm:$0xff]  }
 0x1d4   :  { %5928 = vmatpush1.bf16.msra.mxu1 %v9589_v53  ;;  %5888 = vmatprep.subr.bf16.mxu0 %v9594_v54  ;;  %v9650_v53 = vld [vmem:[#allocation4 + $0xd80] ss:$8 sps:$4 sm:$0xff]   ;;  %v9655_v54 = vld [vmem:[#allocation4 + $0xc94] ss:$8 sps:$4 sm:$0xff]  }
 0x1d5   :  { %5929 = vmatprep.subr.bf16.mxu1 %v9597_v55  ;;  %v9658_v55 = vld [vmem:[#allocation4 + $0xd94] ss:$8 sps:$4 sm:$0xff]  }
 0x1d7   :  { %5889 = vmatpush1.bf16.msra.mxu0 %v9592_v58  ;;  %v9653_v58 = vld [vmem:[#allocation4 + $0xc90] ss:$8 sps:$4 sm:$0xff]  }
 0x1d8   :  { %5930 = vmatpush1.bf16.msra.mxu1 %v9595_v59  ;;  %5940 = vmatprep.subr.bf16.mxu0 %v9601_v60  ;;  %v9656_v59 = vld [vmem:[#allocation4 + $0xd90] ss:$8 sps:$4 sm:$0xff]   ;;  %v9661_v60 = vld [vmem:[#allocation4 + $0xca4] ss:$8 sps:$4 sm:$0xff]  }
 0x1d9   :  { %5981 = vmatprep.subr.bf16.mxu1 %v9604_v61  ;;  %v9664_v61 = vld [vmem:[#allocation4 + $0xda4] ss:$8 sps:$4 sm:$0xff]  }
 0x1da   :  { %5891 = vmatmul.mubr.bf16.vlgmr.msra.gmra.mrb[20].mxu0 %v423_v3  ;;  %v9665_v3 = vld [vmem:[#allocation4 + $0xcb0] ss:$8 sps:$4 sm:$0xff]  }
 0x1db   :  { %5932 = vmatmul.mubr.bf16.vlgmr.msra.gmra.mrb[20].mxu1 %v425_v4  ;;  %5941 = vmatpush1.bf16.msra.mxu0 %v9599_v37  ;;  %v9659_v37 = vld [vmem:[#allocation4 + $0xca0] ss:$8 sps:$4 sm:$0xff]   ;;  %v9668_v4 = vld [vmem:[#allocation4 + $0xdb0] ss:$8 sps:$4 sm:$0xff]  }
 0x1dc   :  { %5982 = vmatpush1.bf16.msra.mxu1 %v9602_v41  ;;  %5942 = vmatprep.subr.bf16.mxu0 %v9607_v5  ;;  %v9662_v41 = vld [vmem:[#allocation4 + $0xda0] ss:$8 sps:$4 sm:$0xff]   ;;  %v9673_v5 = vld [vmem:[#allocation4 + $0xcc4] ss:$8 sps:$4 sm:$0xff]  }
 0x1dd   :  { %5983 = vmatprep.subr.bf16.mxu1 %v9610_v6  ;;  %5972 = vmatprep.mubr.bf16.mxu0 %v428_v7  ;;  %v9676_v6 = vld [vmem:[#allocation4 + $0xdc4] ss:$8 sps:$4 sm:$0xff]   ;;  %v9671_v7 = vld [vmem:[#allocation4 + $0xcc0] ss:$8 sps:$4 sm:$0xff]  }
 0x1de   :  { %6013 = vmatprep.mubr.bf16.mxu1 %v430_v8  ;;  %v9674_v8 = vld [vmem:[#allocation4 + $0xdc0] ss:$8 sps:$4 sm:$0xff]  }
 0x1df   :  { %5943 = vmatpush1.bf16.msra.mxu0 %v9605_v9  ;;  %v9679_v9 = vld [vmem:[#allocation4 + $0xcd4] ss:$8 sps:$4 sm:$0xff]  }
 0x1e0   :  { %5984 = vmatpush1.bf16.msra.mxu1 %v9608_v10  ;;  %5944 = vmatprep.subr.bf16.mxu0 %v9613_v22  ;;  %v9682_v10 = vld [vmem:[#allocation4 + $0xdd4] ss:$8 sps:$4 sm:$0xff]  }
 0x1e1   :  { %5985 = vmatprep.subr.bf16.mxu1 %v9616_v12  ;;  %v101_v22 = vld [vmem:[#allocation2 + $0x38] sm:$0xff] }
 0x1e2   :  { %v9677_v12 = vld [vmem:[#allocation4 + $0xcd0] ss:$8 sps:$4 sm:$0xff]  }
 0x1e3   :  { %5945 = vmatpush1.bf16.msra.mxu0 %v9611_v23  ;;  %v9680_v23 = vld [vmem:[#allocation4 + $0xdd0] ss:$8 sps:$4 sm:$0xff]  }
 0x1e4   :  { %5986 = vmatpush1.bf16.msra.mxu1 %v9614_v13  ;;  %5946 = vmatprep.subr.bf16.mxu0 %v9619_v14  ;;  %v9685_v13 = vld [vmem:[#allocation4 + $0xce4] ss:$8 sps:$4 sm:$0xff]  }
 0x1e5   :  { %5987 = vmatprep.subr.bf16.mxu1 %v9622_v45  ;;  %v9688_v14 = vld [vmem:[#allocation4 + $0xde4] ss:$8 sps:$4 sm:$0xff]   ;;  %v241_v45 = vcombine.high %v101_v22, %v101_v22 }
 0x1e7   :  { %5947 = vmatpush1.bf16.msra.mxu0 %v9617_v36  ;;  %v9683_v36 = vld [vmem:[#allocation4 + $0xce0] ss:$8 sps:$4 sm:$0xff]  }
 0x1e8   :  { %5988 = vmatpush1.bf16.msra.mxu1 %v9620_v15  ;;  %5948 = vmatprep.subr.bf16.mxu0 %v9625_v40  ;;  %v9686_v15 = vld [vmem:[#allocation4 + $0xde0] ss:$8 sps:$4 sm:$0xff]   ;;  %v9691_v40 = vld [vmem:[#allocation4 + $0xcf4] ss:$8 sps:$4 sm:$0xff]  }
 0x1e9   :  { %5989 = vmatprep.subr.bf16.mxu1 %v9628_v17  ;;  %v9694_v17 = vld [vmem:[#allocation4 + $0xdf4] ss:$8 sps:$4 sm:$0xff]  }
 0x1eb   :  { %5949 = vmatpush1.bf16.msra.mxu0 %v9623_v18  ;;  %v10720_v18 = vrot.slane %v101_v22, %v10613_v49 }
 0x1ec   :  { %5990 = vmatpush1.bf16.msra.mxu1 %v9626_v19  ;;  %5950 = vmatprep.subr.bf16.mxu0 %v9631_v20  ;;  %v10723_v19 = vrot.slane %v241_v45, %v10613_v49  ;;  %v9689_v20 = vld [vmem:[#allocation4 + $0xcf0] ss:$8 sps:$4 sm:$0xff]   ;;  %v9749_v45 = vld [vmem:[#allocation4 + $0xf84] ss:$8 sps:$4 sm:$0xff]  }
 0x1ed   :  { %5991 = vmatprep.subr.bf16.mxu1 %v9634_v21  ;;  %v5646_v28 = vpop.f32.mrb[8].mxu0  ;;  %v9692_v21 = vld [vmem:[#allocation4 + $0xdf0] ss:$8 sps:$4 sm:$0xff]  }
 0x1ee   :  { %v5687_v29 = vpop.f32.mrb[8].mxu1  ;;  %v5647_v32 = vadd.f32 %v5646_v28, %v10695_v11  ;;  %v5648_v33 = vpop.f32.mrb[9].mxu0  ;;  %v9641_v11 = vld [vmem:[#allocation4 + $0xc70] ss:$8 sps:$4 sm:$0xff]   ;;  %v256_v28 = vcombine.high %v10720_v18, %v10720_v18 }
 0x1ef   :  { %v5689_v34 = vpop.f32.mrb[9].mxu1  ;;  %v5649_v35 = vadd.f32 %v5648_v33, %v10697_v46  ;;  %v5650_v38 = vpop.f32.mrb[10].mxu0  ;;  %5951 = vmatpush1.bf16.msra.mxu0 %v9629_v24  ;;  %v9649_v46 = vld [vmem:[#allocation4 + $0xc84] ss:$8 sps:$4 sm:$0xff]   ;;  %v9707_v33 = vld [vmem:[#allocation4 + $0xf14] ss:$8 sps:$4 sm:$0xff]  }
 0x1f0   :  { %v5691_v39 = vpop.f32.mrb[10].mxu1  ;;  %5992 = vmatpush1.bf16.msra.mxu1 %v9632_v25  ;;  %v10715_v42 = vadd.f32 %v5687_v29, %v5647_v32  ;;  %v5651_v44 = vpop.f32.mrb[11].mxu0  ;;  %5952 = vmatprep.subr.bf16.mxu0 %v9637_v26  ;;  %v9698_v24 = vld [vmem:[#allocation4 + $0xe04] ss:$8 sps:$4 sm:$0xff]   ;;  %v9696_v26 = vld [vmem:[#allocation4 + $0xe00] ss:$8 sps:$4 sm:$0xff]   ;;  %v257_v29 = vcombine.high %v10723_v19, %v10723_v19 }
 0x1f1   :  { %v5692_v63 = vpop.f32.mrb[11].mxu1  ;;  %5993 = vmatprep.subr.bf16.mxu1 %v9640_v27  ;;  %v10717_v48 = vadd.f32 %v5689_v34, %v5649_v35  ;;  %v9701_v25 = vld [vmem:[#allocation4 + $0xf04] ss:$8 sps:$4 sm:$0xff]   ;;  %v9699_v27 = vld [vmem:[#allocation4 + $0xf00] ss:$8 sps:$4 sm:$0xff]   ;;  %v432_v34 = vpack.c.bf16 %v256_v28, %v256_v28 }
 0x1f2   :  { %v9704_v32 = vld [vmem:[#allocation4 + $0xe14] ss:$8 sps:$4 sm:$0xff]   ;;  %v434_v35 = vpack.c.bf16 %v257_v29, %v257_v29  ;;  %v9702_v38 = vld [vmem:[#allocation4 + $0xe10] ss:$8 sps:$4 sm:$0xff]   ;;  %v9713_v44 = vld [vmem:[#allocation4 + $0xf24] ss:$8 sps:$4 sm:$0xff]  }
 0x1f3   :  { %5953 = vmatpush1.bf16.msra.mxu0 %v9635_v30  ;;  %v427_v30 = vpack.c.bf16 %v10700_v56, %v10700_v56  ;;  %v9705_v39 = vld [vmem:[#allocation4 + $0xf10] ss:$8 sps:$4 sm:$0xff]   ;;  %v9710_v56 = vld [vmem:[#allocation4 + $0xe24] ss:$8 sps:$4 sm:$0xff]   ;;  %v9711_v63 = vld [vmem:[#allocation4 + $0xf20] ss:$8 sps:$4 sm:$0xff]  }
 0x1f4   :  { %5994 = vmatpush1.bf16.msra.mxu1 %v9638_v31  ;;  %5954 = vmatprep.subr.bf16.mxu0 %v9643_v47  ;;  %v429_v31 = vpack.c.bf16 %v10703_v57, %v10703_v57  ;;  %v9708_v57 = vld [vmem:[#allocation4 + $0xe20] ss:$8 sps:$4 sm:$0xff]   ;;  %v9716_v47 = vld [vmem:[#allocation4 + $0xe34] ss:$8 sps:$4 sm:$0xff]  }
 0x1f5   :  { %5995 = vmatprep.subr.bf16.mxu1 %v9646_v0  ;;  %v9719_v0 = vld [vmem:[#allocation4 + $0xf34] ss:$8 sps:$4 sm:$0xff]  }
 0x1f6   :  { %v9764_v28 = vld [vmem:[#allocation4 + $0xeb4] ss:$8 sps:$4 sm:$0xff]  }
 0x1f7   :  { %5955 = vmatpush1.bf16.msra.mxu0 %v9641_v11  ;;  %v9714_v11 = vld [vmem:[#allocation4 + $0xe30] ss:$8 sps:$4 sm:$0xff]   ;;  %v9767_v29 = vld [vmem:[#allocation4 + $0xfb4] ss:$8 sps:$4 sm:$0xff]  }
 0x1f8   :  { %5996 = vmatpush1.bf16.msra.mxu1 %v9644_v50  ;;  %5956 = vmatprep.subr.bf16.mxu0 %v9649_v46  ;;  %v9717_v50 = vld [vmem:[#allocation4 + $0xf30] ss:$8 sps:$4 sm:$0xff]   ;;  %v9722_v46 = vld [vmem:[#allocation4 + $0xe44] ss:$8 sps:$4 sm:$0xff]  }
 0x1f9   :  { %5997 = vmatprep.subr.bf16.mxu1 %v9652_v51  ;;  %v9725_v51 = vld [vmem:[#allocation4 + $0xf44] ss:$8 sps:$4 sm:$0xff]  }
 0x1fb   :  { %5957 = vmatpush1.bf16.msra.mxu0 %v9647_v52  ;;  %v9720_v52 = vld [vmem:[#allocation4 + $0xe40] ss:$8 sps:$4 sm:$0xff]  }
 0x1fc   :  { %5998 = vmatpush1.bf16.msra.mxu1 %v9650_v53  ;;  %5958 = vmatprep.subr.bf16.mxu0 %v9655_v54  ;;  %v9723_v53 = vld [vmem:[#allocation4 + $0xf40] ss:$8 sps:$4 sm:$0xff]   ;;  %v9728_v54 = vld [vmem:[#allocation4 + $0xe54] ss:$8 sps:$4 sm:$0xff]  }
 0x1fd   :  { %5999 = vmatprep.subr.bf16.mxu1 %v9658_v55  ;;  %v9731_v55 = vld [vmem:[#allocation4 + $0xf54] ss:$8 sps:$4 sm:$0xff]  }
 0x1ff   :  { %5959 = vmatpush1.bf16.msra.mxu0 %v9653_v58  ;;  %v9726_v58 = vld [vmem:[#allocation4 + $0xe50] ss:$8 sps:$4 sm:$0xff]  }
 0x200   :  { %6000 = vmatpush1.bf16.msra.mxu1 %v9656_v59  ;;  %5960 = vmatprep.subr.bf16.mxu0 %v9661_v60  ;;  %v9729_v59 = vld [vmem:[#allocation4 + $0xf50] ss:$8 sps:$4 sm:$0xff]   ;;  %v9734_v60 = vld [vmem:[#allocation4 + $0xe64] ss:$8 sps:$4 sm:$0xff]  }
 0x201   :  { %6001 = vmatprep.subr.bf16.mxu1 %v9664_v61  ;;  %v9737_v61 = vld [vmem:[#allocation4 + $0xf64] ss:$8 sps:$4 sm:$0xff]  }
 0x203   :  { %5961 = vmatpush1.bf16.msra.mxu0 %v9659_v37 }
 0x204   :  { %6002 = vmatpush1.bf16.msra.mxu1 %v9662_v41  ;;  %5962 = vmatprep.subr.bf16.mxu0 %v9667_v1  ;;  %v9732_v1 = vld [vmem:[#allocation4 + $0xe60] ss:$8 sps:$4 sm:$0xff]  }
 0x205   :  { %6003 = vmatprep.subr.bf16.mxu1 %v9670_v2  ;;  %v9735_v2 = vld [vmem:[#allocation4 + $0xf60] ss:$8 sps:$4 sm:$0xff]  }
 0x207   :  { %5963 = vmatpush1.bf16.msra.mxu0 %v9665_v3 }
 0x208   :  { %6004 = vmatpush1.bf16.msra.mxu1 %v9668_v4  ;;  %5964 = vmatprep.subr.bf16.mxu0 %v9673_v5 }
 0x209   :  { %6005 = vmatprep.subr.bf16.mxu1 %v9676_v6 }
 0x20b   :  { %5965 = vmatpush1.bf16.msra.mxu0 %v9671_v7 }
 0x20c   :  { %6006 = vmatpush1.bf16.msra.mxu1 %v9674_v8  ;;  %5966 = vmatprep.subr.bf16.mxu0 %v9679_v9 }
 0x20d   :  { %6007 = vmatprep.subr.bf16.mxu1 %v9682_v10 }
 0x20f   :  { %5967 = vmatpush1.bf16.msra.mxu0 %v9677_v12  ;;  %v9740_v12 = vld [vmem:[#allocation4 + $0xe74] ss:$8 sps:$4 sm:$0xff]  }
 0x210   :  { %6008 = vmatpush1.bf16.msra.mxu1 %v9680_v23  ;;  %5968 = vmatprep.subr.bf16.mxu0 %v9685_v13  ;;  %v9743_v23 = vld [vmem:[#allocation4 + $0xf74] ss:$8 sps:$4 sm:$0xff]  }
 0x211   :  { %6009 = vmatprep.subr.bf16.mxu1 %v9688_v14  ;;  %v9741_v14 = vld [vmem:[#allocation4 + $0xf70] ss:$8 sps:$4 sm:$0xff]  }
 0x213   :  { %5969 = vmatpush1.bf16.msra.mxu0 %v9683_v36  ;;  %v9744_v36 = vld [vmem:[#allocation4 + $0xe80] ss:$8 sps:$4 sm:$0xff]  }
 0x214   :  { %6010 = vmatpush1.bf16.msra.mxu1 %v9686_v15  ;;  %5970 = vmatprep.subr.bf16.mxu0 %v9691_v40  ;;  %v9747_v15 = vld [vmem:[#allocation4 + $0xf80] ss:$8 sps:$4 sm:$0xff]   ;;  %v9752_v40 = vld [vmem:[#allocation4 + $0xe94] ss:$8 sps:$4 sm:$0xff]  }
 0x215   :  { %6011 = vmatprep.subr.bf16.mxu1 %v9694_v17  ;;  %v9755_v17 = vld [vmem:[#allocation4 + $0xf94] ss:$8 sps:$4 sm:$0xff]  }
 0x217   :  { %5971 = vmatpush1.bf16.msra.mxu0 %v9689_v20  ;;  %v9750_v20 = vld [vmem:[#allocation4 + $0xe90] ss:$8 sps:$4 sm:$0xff]  }
 0x218   :  { %6012 = vmatpush1.bf16.msra.mxu1 %v9692_v21  ;;  %6022 = vmatprep.subr.bf16.mxu0 %v9698_v24  ;;  %v9753_v21 = vld [vmem:[#allocation4 + $0xf90] ss:$8 sps:$4 sm:$0xff]   ;;  %v9758_v24 = vld [vmem:[#allocation4 + $0xea4] ss:$8 sps:$4 sm:$0xff]  }
 0x219   :  { %6063 = vmatprep.subr.bf16.mxu1 %v9701_v25  ;;  %v9761_v25 = vld [vmem:[#allocation4 + $0xfa4] ss:$8 sps:$4 sm:$0xff]  }
 0x21a   :  { %5973 = vmatmul.mubr.bf16.vlgmr.msra.gmra.mrb[24].mxu0 %v427_v30  ;;  %v9762_v30 = vld [vmem:[#allocation4 + $0xeb0] ss:$8 sps:$4 sm:$0xff]  }
 0x21b   :  { %6014 = vmatmul.mubr.bf16.vlgmr.msra.gmra.mrb[24].mxu1 %v429_v31  ;;  %6023 = vmatpush1.bf16.msra.mxu0 %v9696_v26  ;;  %v9756_v26 = vld [vmem:[#allocation4 + $0xea0] ss:$8 sps:$4 sm:$0xff]   ;;  %v9765_v31 = vld [vmem:[#allocation4 + $0xfb0] ss:$8 sps:$4 sm:$0xff]  }
 0x21c   :  { %6064 = vmatpush1.bf16.msra.mxu1 %v9699_v27  ;;  %6024 = vmatprep.subr.bf16.mxu0 %v9704_v32  ;;  %v9759_v27 = vld [vmem:[#allocation4 + $0xfa0] ss:$8 sps:$4 sm:$0xff]   ;;  %v9770_v32 = vld [vmem:[#allocation4 + $0xec4] ss:$8 sps:$4 sm:$0xff]  }
 0x21d   :  { %6065 = vmatprep.subr.bf16.mxu1 %v9707_v33  ;;  %6054 = vmatprep.mubr.bf16.mxu0 %v432_v34  ;;  %v9773_v33 = vld [vmem:[#allocation4 + $0xfc4] ss:$8 sps:$4 sm:$0xff]   ;;  %v9768_v34 = vld [vmem:[#allocation4 + $0xec0] ss:$8 sps:$4 sm:$0xff]  }
 0x21e   :  { %6095 = vmatprep.mubr.bf16.mxu1 %v434_v35  ;;  %v9771_v35 = vld [vmem:[#allocation4 + $0xfc0] ss:$8 sps:$4 sm:$0xff]  }
 0x21f   :  { %6025 = vmatpush1.bf16.msra.mxu0 %v9702_v38  ;;  %v9776_v38 = vld [vmem:[#allocation4 + $0xed4] ss:$8 sps:$4 sm:$0xff]  }
 0x220   :  { %6066 = vmatpush1.bf16.msra.mxu1 %v9705_v39  ;;  %6026 = vmatprep.subr.bf16.mxu0 %v9710_v56  ;;  %v9779_v39 = vld [vmem:[#allocation4 + $0xfd4] ss:$8 sps:$4 sm:$0xff]  }
 0x221   :  { %6067 = vmatprep.subr.bf16.mxu1 %v9713_v44  ;;  %v102_v56 = vld [vmem:[#allocation2 + $0x40] sm:$0xff] }
 0x222   :  { %v9774_v44 = vld [vmem:[#allocation4 + $0xed0] ss:$8 sps:$4 sm:$0xff]  }
 0x223   :  { %6027 = vmatpush1.bf16.msra.mxu0 %v9708_v57  ;;  %v9777_v57 = vld [vmem:[#allocation4 + $0xfd0] ss:$8 sps:$4 sm:$0xff]  }
 0x224   :  { %6068 = vmatpush1.bf16.msra.mxu1 %v9711_v63  ;;  %6028 = vmatprep.subr.bf16.mxu0 %v9716_v47  ;;  %v9782_v63 = vld [vmem:[#allocation4 + $0xee4] ss:$8 sps:$4 sm:$0xff]  }
 0x225   :  { %6069 = vmatprep.subr.bf16.mxu1 %v9719_v0  ;;  %v9785_v47 = vld [vmem:[#allocation4 + $0xfe4] ss:$8 sps:$4 sm:$0xff]   ;;  %v258_v0 = vcombine.high %v102_v56, %v102_v56 }
 0x227   :  { %6029 = vmatpush1.bf16.msra.mxu0 %v9714_v11  ;;  %v9780_v11 = vld [vmem:[#allocation4 + $0xee0] ss:$8 sps:$4 sm:$0xff]  }
 0x228   :  { %6070 = vmatpush1.bf16.msra.mxu1 %v9717_v50  ;;  %6030 = vmatprep.subr.bf16.mxu0 %v9722_v46  ;;  %v9783_v50 = vld [vmem:[#allocation4 + $0xfe0] ss:$8 sps:$4 sm:$0xff]   ;;  %v9788_v46 = vld [vmem:[#allocation4 + $0xef4] ss:$8 sps:$4 sm:$0xff]  }
 0x229   :  { %6071 = vmatprep.subr.bf16.mxu1 %v9725_v51  ;;  %v9791_v51 = vld [vmem:[#allocation4 + $0xff4] ss:$8 sps:$4 sm:$0xff]  }
 0x22b   :  { %6031 = vmatpush1.bf16.msra.mxu0 %v9720_v52  ;;  %v10740_v52 = vrot.slane %v102_v56, %v10613_v49 }
 0x22c   :  { %6072 = vmatpush1.bf16.msra.mxu1 %v9723_v53  ;;  %6032 = vmatprep.subr.bf16.mxu0 %v9728_v54  ;;  %v10743_v53 = vrot.slane %v258_v0, %v10613_v49  ;;  %v9786_v54 = vld [vmem:[#allocation4 + $0xef0] ss:$8 sps:$4 sm:$0xff]   ;;  %v9846_v0 = vld [vmem:[#allocation4 + $0x1184] ss:$8 sps:$4 sm:$0xff]  }
 0x22d   :  { %6073 = vmatprep.subr.bf16.mxu1 %v9731_v55  ;;  %v5728_v37 = vpop.f32.mrb[12].mxu0  ;;  %v9789_v55 = vld [vmem:[#allocation4 + $0xff0] ss:$8 sps:$4 sm:$0xff]  }
 0x22e   :  { %v5769_v41 = vpop.f32.mrb[12].mxu1  ;;  %v5729_v3 = vadd.f32 %v5728_v37, %v10715_v42  ;;  %v5730_v4 = vpop.f32.mrb[13].mxu0  ;;  %v9738_v42 = vld [vmem:[#allocation4 + $0xe70] ss:$8 sps:$4 sm:$0xff]   ;;  %v273_v37 = vcombine.high %v10740_v52, %v10740_v52 }
 0x22f   :  { %v5771_v5 = vpop.f32.mrb[13].mxu1  ;;  %v5731_v6 = vadd.f32 %v5730_v4, %v10717_v48  ;;  %v5732_v7 = vpop.f32.mrb[14].mxu0  ;;  %6033 = vmatpush1.bf16.msra.mxu0 %v9726_v58  ;;  %v9746_v48 = vld [vmem:[#allocation4 + $0xe84] ss:$8 sps:$4 sm:$0xff]   ;;  %v9804_v4 = vld [vmem:[#allocation4 + $0x1114] ss:$8 sps:$4 sm:$0xff]  }
 0x230   :  { %v5773_v8 = vpop.f32.mrb[14].mxu1  ;;  %6074 = vmatpush1.bf16.msra.mxu1 %v9729_v59  ;;  %v10735_v9 = vadd.f32 %v5769_v41, %v5729_v3  ;;  %v5733_v10 = vpop.f32.mrb[15].mxu0  ;;  %6034 = vmatprep.subr.bf16.mxu0 %v9734_v60  ;;  %v9795_v58 = vld [vmem:[#allocation4 + $0x1004] ss:$8 sps:$4 sm:$0xff]   ;;  %v9793_v60 = vld [vmem:[#allocation4 + $0x1000] ss:$8 sps:$4 sm:$0xff]   ;;  %v274_v41 = vcombine.high %v10743_v53, %v10743_v53 }
 0x231   :  { %v5774_v22 = vpop.f32.mrb[15].mxu1  ;;  %6075 = vmatprep.subr.bf16.mxu1 %v9737_v61  ;;  %v10737_v13 = vadd.f32 %v5771_v5, %v5731_v6  ;;  %v9798_v59 = vld [vmem:[#allocation4 + $0x1104] ss:$8 sps:$4 sm:$0xff]   ;;  %v9796_v61 = vld [vmem:[#allocation4 + $0x1100] ss:$8 sps:$4 sm:$0xff]   ;;  %v436_v5 = vpack.c.bf16 %v273_v37, %v273_v37 }
 0x232   :  { %v9801_v3 = vld [vmem:[#allocation4 + $0x1014] ss:$8 sps:$4 sm:$0xff]   ;;  %v438_v6 = vpack.c.bf16 %v274_v41, %v274_v41  ;;  %v9799_v7 = vld [vmem:[#allocation4 + $0x1010] ss:$8 sps:$4 sm:$0xff]   ;;  %v9810_v10 = vld [vmem:[#allocation4 + $0x1124] ss:$8 sps:$4 sm:$0xff]  }
 0x233   :  { %6035 = vmatpush1.bf16.msra.mxu0 %v9732_v1  ;;  %v431_v1 = vpack.c.bf16 %v10720_v18, %v10720_v18  ;;  %v9802_v8 = vld [vmem:[#allocation4 + $0x1110] ss:$8 sps:$4 sm:$0xff]   ;;  %v9807_v18 = vld [vmem:[#allocation4 + $0x1024] ss:$8 sps:$4 sm:$0xff]   ;;  %v9808_v22 = vld [vmem:[#allocation4 + $0x1120] ss:$8 sps:$4 sm:$0xff]  }
 0x234   :  { %6076 = vmatpush1.bf16.msra.mxu1 %v9735_v2  ;;  %6036 = vmatprep.subr.bf16.mxu0 %v9740_v12  ;;  %v433_v2 = vpack.c.bf16 %v10723_v19, %v10723_v19  ;;  %v9805_v19 = vld [vmem:[#allocation4 + $0x1020] ss:$8 sps:$4 sm:$0xff]   ;;  %v9813_v12 = vld [vmem:[#allocation4 + $0x1034] ss:$8 sps:$4 sm:$0xff]  }
 0x235   :  { %6077 = vmatprep.subr.bf16.mxu1 %v9743_v23  ;;  %v9816_v23 = vld [vmem:[#allocation4 + $0x1134] ss:$8 sps:$4 sm:$0xff]  }
 0x236   :  { %v9861_v37 = vld [vmem:[#allocation4 + $0x10b4] ss:$8 sps:$4 sm:$0xff]  }
 0x237   :  { %6037 = vmatpush1.bf16.msra.mxu0 %v9738_v42  ;;  %v9811_v42 = vld [vmem:[#allocation4 + $0x1030] ss:$8 sps:$4 sm:$0xff]   ;;  %v9864_v41 = vld [vmem:[#allocation4 + $0x11b4] ss:$8 sps:$4 sm:$0xff]  }
 0x238   :  { %6078 = vmatpush1.bf16.msra.mxu1 %v9741_v14  ;;  %6038 = vmatprep.subr.bf16.mxu0 %v9746_v48  ;;  %v9814_v14 = vld [vmem:[#allocation4 + $0x1130] ss:$8 sps:$4 sm:$0xff]   ;;  %v9819_v48 = vld [vmem:[#allocation4 + $0x1044] ss:$8 sps:$4 sm:$0xff]  }
 0x239   :  { %6079 = vmatprep.subr.bf16.mxu1 %v9749_v45  ;;  %v9822_v45 = vld [vmem:[#allocation4 + $0x1144] ss:$8 sps:$4 sm:$0xff]  }
 0x23b   :  { %6039 = vmatpush1.bf16.msra.mxu0 %v9744_v36  ;;  %v9817_v36 = vld [vmem:[#allocation4 + $0x1040] ss:$8 sps:$4 sm:$0xff]  }
 0x23c   :  { %6080 = vmatpush1.bf16.msra.mxu1 %v9747_v15  ;;  %6040 = vmatprep.subr.bf16.mxu0 %v9752_v40  ;;  %v9820_v15 = vld [vmem:[#allocation4 + $0x1140] ss:$8 sps:$4 sm:$0xff]   ;;  %v9825_v40 = vld [vmem:[#allocation4 + $0x1054] ss:$8 sps:$4 sm:$0xff]  }
 0x23d   :  { %6081 = vmatprep.subr.bf16.mxu1 %v9755_v17  ;;  %v9828_v17 = vld [vmem:[#allocation4 + $0x1154] ss:$8 sps:$4 sm:$0xff]  }
 0x23f   :  { %6041 = vmatpush1.bf16.msra.mxu0 %v9750_v20  ;;  %v9823_v20 = vld [vmem:[#allocation4 + $0x1050] ss:$8 sps:$4 sm:$0xff]  }
 0x240   :  { %6082 = vmatpush1.bf16.msra.mxu1 %v9753_v21  ;;  %6042 = vmatprep.subr.bf16.mxu0 %v9758_v24  ;;  %v9826_v21 = vld [vmem:[#allocation4 + $0x1150] ss:$8 sps:$4 sm:$0xff]   ;;  %v9831_v24 = vld [vmem:[#allocation4 + $0x1064] ss:$8 sps:$4 sm:$0xff]  }
 0x241   :  { %6083 = vmatprep.subr.bf16.mxu1 %v9761_v25  ;;  %v9834_v25 = vld [vmem:[#allocation4 + $0x1164] ss:$8 sps:$4 sm:$0xff]  }
 0x243   :  { %6043 = vmatpush1.bf16.msra.mxu0 %v9756_v26 }
 0x244   :  { %6084 = vmatpush1.bf16.msra.mxu1 %v9759_v27  ;;  %6044 = vmatprep.subr.bf16.mxu0 %v9764_v28  ;;  %v9829_v28 = vld [vmem:[#allocation4 + $0x1060] ss:$8 sps:$4 sm:$0xff]  }
 0x245   :  { %6085 = vmatprep.subr.bf16.mxu1 %v9767_v29  ;;  %v9832_v29 = vld [vmem:[#allocation4 + $0x1160] ss:$8 sps:$4 sm:$0xff]  }
 0x247   :  { %6045 = vmatpush1.bf16.msra.mxu0 %v9762_v30 }
 0x248   :  { %6086 = vmatpush1.bf16.msra.mxu1 %v9765_v31  ;;  %6046 = vmatprep.subr.bf16.mxu0 %v9770_v32 }
 0x249   :  { %6087 = vmatprep.subr.bf16.mxu1 %v9773_v33 }
 0x24b   :  { %6047 = vmatpush1.bf16.msra.mxu0 %v9768_v34 }
 0x24c   :  { %6088 = vmatpush1.bf16.msra.mxu1 %v9771_v35  ;;  %6048 = vmatprep.subr.bf16.mxu0 %v9776_v38 }
 0x24d   :  { %6089 = vmatprep.subr.bf16.mxu1 %v9779_v39 }
 0x24f   :  { %6049 = vmatpush1.bf16.msra.mxu0 %v9774_v44  ;;  %v9837_v44 = vld [vmem:[#allocation4 + $0x1074] ss:$8 sps:$4 sm:$0xff]  }
 0x250   :  { %6090 = vmatpush1.bf16.msra.mxu1 %v9777_v57  ;;  %6050 = vmatprep.subr.bf16.mxu0 %v9782_v63  ;;  %v9840_v57 = vld [vmem:[#allocation4 + $0x1174] ss:$8 sps:$4 sm:$0xff]  }
 0x251   :  { %6091 = vmatprep.subr.bf16.mxu1 %v9785_v47  ;;  %v9838_v47 = vld [vmem:[#allocation4 + $0x1170] ss:$8 sps:$4 sm:$0xff]  }
 0x253   :  { %6051 = vmatpush1.bf16.msra.mxu0 %v9780_v11  ;;  %v9841_v11 = vld [vmem:[#allocation4 + $0x1080] ss:$8 sps:$4 sm:$0xff]  }
 0x254   :  { %6092 = vmatpush1.bf16.msra.mxu1 %v9783_v50  ;;  %6052 = vmatprep.subr.bf16.mxu0 %v9788_v46  ;;  %v9844_v50 = vld [vmem:[#allocation4 + $0x1180] ss:$8 sps:$4 sm:$0xff]   ;;  %v9849_v46 = vld [vmem:[#allocation4 + $0x1094] ss:$8 sps:$4 sm:$0xff]  }
 0x255   :  { %6093 = vmatprep.subr.bf16.mxu1 %v9791_v51  ;;  %v9852_v51 = vld [vmem:[#allocation4 + $0x1194] ss:$8 sps:$4 sm:$0xff]  }
 0x257   :  { %6053 = vmatpush1.bf16.msra.mxu0 %v9786_v54  ;;  %v9847_v54 = vld [vmem:[#allocation4 + $0x1090] ss:$8 sps:$4 sm:$0xff]  }
 0x258   :  { %6094 = vmatpush1.bf16.msra.mxu1 %v9789_v55  ;;  %6104 = vmatprep.subr.bf16.mxu0 %v9795_v58  ;;  %v9850_v55 = vld [vmem:[#allocation4 + $0x1190] ss:$8 sps:$4 sm:$0xff]   ;;  %v9855_v58 = vld [vmem:[#allocation4 + $0x10a4] ss:$8 sps:$4 sm:$0xff]  }
 0x259   :  { %6145 = vmatprep.subr.bf16.mxu1 %v9798_v59  ;;  %v9858_v59 = vld [vmem:[#allocation4 + $0x11a4] ss:$8 sps:$4 sm:$0xff]  }
 0x25a   :  { %6055 = vmatmul.mubr.bf16.vlgmr.msra.gmra.mrb[28].mxu0 %v431_v1  ;;  %v9859_v1 = vld [vmem:[#allocation4 + $0x10b0] ss:$8 sps:$4 sm:$0xff]  }
 0x25b   :  { %6096 = vmatmul.mubr.bf16.vlgmr.msra.gmra.mrb[28].mxu1 %v433_v2  ;;  %6105 = vmatpush1.bf16.msra.mxu0 %v9793_v60  ;;  %v9853_v60 = vld [vmem:[#allocation4 + $0x10a0] ss:$8 sps:$4 sm:$0xff]   ;;  %v9862_v2 = vld [vmem:[#allocation4 + $0x11b0] ss:$8 sps:$4 sm:$0xff]  }
 0x25c   :  { %6146 = vmatpush1.bf16.msra.mxu1 %v9796_v61  ;;  %6106 = vmatprep.subr.bf16.mxu0 %v9801_v3  ;;  %v9856_v61 = vld [vmem:[#allocation4 + $0x11a0] ss:$8 sps:$4 sm:$0xff]   ;;  %v9867_v3 = vld [vmem:[#allocation4 + $0x10c4] ss:$8 sps:$4 sm:$0xff]  }
 0x25d   :  { %6147 = vmatprep.subr.bf16.mxu1 %v9804_v4  ;;  %6136 = vmatprep.mubr.bf16.mxu0 %v436_v5  ;;  %v9870_v4 = vld [vmem:[#allocation4 + $0x11c4] ss:$8 sps:$4 sm:$0xff]   ;;  %v9865_v5 = vld [vmem:[#allocation4 + $0x10c0] ss:$8 sps:$4 sm:$0xff]  }
 0x25e   :  { %6177 = vmatprep.mubr.bf16.mxu1 %v438_v6  ;;  %v9868_v6 = vld [vmem:[#allocation4 + $0x11c0] ss:$8 sps:$4 sm:$0xff]  }
 0x25f   :  { %6107 = vmatpush1.bf16.msra.mxu0 %v9799_v7  ;;  %v9873_v7 = vld [vmem:[#allocation4 + $0x10d4] ss:$8 sps:$4 sm:$0xff]  }
 0x260   :  { %6148 = vmatpush1.bf16.msra.mxu1 %v9802_v8  ;;  %6108 = vmatprep.subr.bf16.mxu0 %v9807_v18  ;;  %v9876_v8 = vld [vmem:[#allocation4 + $0x11d4] ss:$8 sps:$4 sm:$0xff]  }
 0x261   :  { %6149 = vmatprep.subr.bf16.mxu1 %v9810_v10  ;;  %v103_v18 = vld [vmem:[#allocation2 + $0x48] sm:$0xff]  ;;  %v9871_v10 = vld [vmem:[#allocation4 + $0x10d0] ss:$8 sps:$4 sm:$0xff]  }
 0x263   :  { %6109 = vmatpush1.bf16.msra.mxu0 %v9805_v19  ;;  %v9874_v19 = vld [vmem:[#allocation4 + $0x11d0] ss:$8 sps:$4 sm:$0xff]  }
 0x264   :  { %6150 = vmatpush1.bf16.msra.mxu1 %v9808_v22  ;;  %6110 = vmatprep.subr.bf16.mxu0 %v9813_v12  ;;  %v9879_v22 = vld [vmem:[#allocation4 + $0x10e4] ss:$8 sps:$4 sm:$0xff]  }
 0x265   :  { %6151 = vmatprep.subr.bf16.mxu1 %v9816_v23  ;;  %v9882_v12 = vld [vmem:[#allocation4 + $0x11e4] ss:$8 sps:$4 sm:$0xff]   ;;  %v275_v23 = vcombine.high %v103_v18, %v103_v18 }
 0x267   :  { %6111 = vmatpush1.bf16.msra.mxu0 %v9811_v42  ;;  %v9877_v42 = vld [vmem:[#allocation4 + $0x10e0] ss:$8 sps:$4 sm:$0xff]  }
 0x268   :  { %6152 = vmatpush1.bf16.msra.mxu1 %v9814_v14  ;;  %6112 = vmatprep.subr.bf16.mxu0 %v9819_v48  ;;  %v9880_v14 = vld [vmem:[#allocation4 + $0x11e0] ss:$8 sps:$4 sm:$0xff]   ;;  %v9885_v48 = vld [vmem:[#allocation4 + $0x10f4] ss:$8 sps:$4 sm:$0xff]  }
 0x269   :  { %6153 = vmatprep.subr.bf16.mxu1 %v9822_v45  ;;  %v9888_v45 = vld [vmem:[#allocation4 + $0x11f4] ss:$8 sps:$4 sm:$0xff]  }
 0x26b   :  { %6113 = vmatpush1.bf16.msra.mxu0 %v9817_v36  ;;  %v10760_v36 = vrot.slane %v103_v18, %v10613_v49 }
 0x26c   :  { %6154 = vmatpush1.bf16.msra.mxu1 %v9820_v15  ;;  %6114 = vmatprep.subr.bf16.mxu0 %v9825_v40  ;;  %v10763_v15 = vrot.slane %v275_v23, %v10613_v49  ;;  %v9883_v40 = vld [vmem:[#allocation4 + $0x10f0] ss:$8 sps:$4 sm:$0xff]   ;;  %v9943_v23 = vld [vmem:[#allocation4 + $0x1384] ss:$8 sps:$4 sm:$0xff]  }
 0x26d   :  { %6155 = vmatprep.subr.bf16.mxu1 %v9828_v17  ;;  %v5810_v26 = vpop.f32.mrb[16].mxu0  ;;  %v9886_v17 = vld [vmem:[#allocation4 + $0x11f0] ss:$8 sps:$4 sm:$0xff]  }
 0x26e   :  { %v5851_v27 = vpop.f32.mrb[16].mxu1  ;;  %v5811_v30 = vadd.f32 %v5810_v26, %v10735_v9  ;;  %v5812_v31 = vpop.f32.mrb[17].mxu0  ;;  %v9835_v9 = vld [vmem:[#allocation4 + $0x1070] ss:$8 sps:$4 sm:$0xff]   ;;  %v435_v26 = vpack.c.bf16 %v10740_v52, %v10740_v52  ;;  %v9904_v52 = vld [vmem:[#allocation4 + $0x1224] ss:$8 sps:$4 sm:$0xff]  }
 0x26f   :  { %v5853_v32 = vpop.f32.mrb[17].mxu1  ;;  %v5813_v33 = vadd.f32 %v5812_v31, %v10737_v13  ;;  %v5814_v34 = vpop.f32.mrb[18].mxu0  ;;  %6115 = vmatpush1.bf16.msra.mxu0 %v9823_v20  ;;  %v9843_v13 = vld [vmem:[#allocation4 + $0x1084] ss:$8 sps:$4 sm:$0xff]   ;;  %v9901_v31 = vld [vmem:[#allocation4 + $0x1314] ss:$8 sps:$4 sm:$0xff]  }
 0x270   :  { %v5855_v35 = vpop.f32.mrb[18].mxu1  ;;  %6156 = vmatpush1.bf16.msra.mxu1 %v9826_v21  ;;  %v10755_v38 = vadd.f32 %v5851_v27, %v5811_v30  ;;  %v5815_v39 = vpop.f32.mrb[19].mxu0  ;;  %6116 = vmatprep.subr.bf16.mxu0 %v9831_v24  ;;  %v9892_v20 = vld [vmem:[#allocation4 + $0x1204] ss:$8 sps:$4 sm:$0xff]   ;;  %v290_v24 = vcombine.high %v10760_v36, %v10760_v36  ;;  %v437_v27 = vpack.c.bf16 %v10743_v53, %v10743_v53  ;;  %v9898_v30 = vld [vmem:[#allocation4 + $0x1214] ss:$8 sps:$4 sm:$0xff]  }
 0x271   :  { %v5856_v56 = vpop.f32.mrb[19].mxu1  ;;  %6157 = vmatprep.subr.bf16.mxu1 %v9834_v25  ;;  %v10757_v63 = vadd.f32 %v5853_v32, %v5813_v33  ;;  %v9895_v21 = vld [vmem:[#allocation4 + $0x1304] ss:$8 sps:$4 sm:$0xff]   ;;  %v291_v25 = vcombine.high %v10763_v15, %v10763_v15  ;;  %v9896_v34 = vld [vmem:[#allocation4 + $0x1210] ss:$8 sps:$4 sm:$0xff]  }
 0x272   :  { %v440_v32 = vpack.c.bf16 %v290_v24, %v290_v24  ;;  %v9899_v35 = vld [vmem:[#allocation4 + $0x1310] ss:$8 sps:$4 sm:$0xff]   ;;  %v9907_v53 = vld [vmem:[#allocation4 + $0x1324] ss:$8 sps:$4 sm:$0xff]   ;;  %v9902_v39 = vld [vmem:[#allocation4 + $0x1220] ss:$8 sps:$4 sm:$0xff]  }
 0x273   :  { %6117 = vmatpush1.bf16.msra.mxu0 %v9829_v28  ;;  %v9890_v28 = vld [vmem:[#allocation4 + $0x1200] ss:$8 sps:$4 sm:$0xff]   ;;  %v442_v33 = vpack.c.bf16 %v291_v25, %v291_v25 }
 0x274   :  { %6158 = vmatpush1.bf16.msra.mxu1 %v9832_v29  ;;  %6118 = vmatprep.subr.bf16.mxu0 %v9837_v44  ;;  %v9893_v29 = vld [vmem:[#allocation4 + $0x1300] ss:$8 sps:$4 sm:$0xff]   ;;  %v9910_v44 = vld [vmem:[#allocation4 + $0x1234] ss:$8 sps:$4 sm:$0xff]  }
 0x275   :  { %6159 = vmatprep.subr.bf16.mxu1 %v9840_v57  ;;  %v9905_v56 = vld [vmem:[#allocation4 + $0x1320] ss:$8 sps:$4 sm:$0xff]   ;;  %v9913_v57 = vld [vmem:[#allocation4 + $0x1334] ss:$8 sps:$4 sm:$0xff]  }
 0x276   :  { %v9950_v24 = vld [vmem:[#allocation4 + $0x12a0] ss:$8 sps:$4 sm:$0xff]  }
 0x277   :  { %6119 = vmatpush1.bf16.msra.mxu0 %v9835_v9  ;;  %v9908_v9 = vld [vmem:[#allocation4 + $0x1230] ss:$8 sps:$4 sm:$0xff]   ;;  %v9953_v25 = vld [vmem:[#allocation4 + $0x13a0] ss:$8 sps:$4 sm:$0xff]  }
 0x278   :  { %6160 = vmatpush1.bf16.msra.mxu1 %v9838_v47  ;;  %6120 = vmatprep.subr.bf16.mxu0 %v9843_v13  ;;  %v9911_v47 = vld [vmem:[#allocation4 + $0x1330] ss:$8 sps:$4 sm:$0xff]   ;;  %v9916_v13 = vld [vmem:[#allocation4 + $0x1244] ss:$8 sps:$4 sm:$0xff]  }
 0x279   :  { %6161 = vmatprep.subr.bf16.mxu1 %v9846_v0  ;;  %v9919_v0 = vld [vmem:[#allocation4 + $0x1344] ss:$8 sps:$4 sm:$0xff]  }
 0x27b   :  { %6121 = vmatpush1.bf16.msra.mxu0 %v9841_v11  ;;  %v9914_v11 = vld [vmem:[#allocation4 + $0x1240] ss:$8 sps:$4 sm:$0xff]  }
 0x27c   :  { %6162 = vmatpush1.bf16.msra.mxu1 %v9844_v50  ;;  %6122 = vmatprep.subr.bf16.mxu0 %v9849_v46  ;;  %v9917_v50 = vld [vmem:[#allocation4 + $0x1340] ss:$8 sps:$4 sm:$0xff]   ;;  %v9922_v46 = vld [vmem:[#allocation4 + $0x1254] ss:$8 sps:$4 sm:$0xff]  }
 0x27d   :  { %6163 = vmatprep.subr.bf16.mxu1 %v9852_v51  ;;  %v9925_v51 = vld [vmem:[#allocation4 + $0x1354] ss:$8 sps:$4 sm:$0xff]  }
 0x27f   :  { %6123 = vmatpush1.bf16.msra.mxu0 %v9847_v54  ;;  %v9920_v54 = vld [vmem:[#allocation4 + $0x1250] ss:$8 sps:$4 sm:$0xff]  }
 0x280   :  { %6164 = vmatpush1.bf16.msra.mxu1 %v9850_v55  ;;  %6124 = vmatprep.subr.bf16.mxu0 %v9855_v58  ;;  %v9923_v55 = vld [vmem:[#allocation4 + $0x1350] ss:$8 sps:$4 sm:$0xff]   ;;  %v9928_v58 = vld [vmem:[#allocation4 + $0x1264] ss:$8 sps:$4 sm:$0xff]  }
 0x281   :  { %6165 = vmatprep.subr.bf16.mxu1 %v9858_v59  ;;  %v9931_v59 = vld [vmem:[#allocation4 + $0x1364] ss:$8 sps:$4 sm:$0xff]  }
 0x283   :  { %6125 = vmatpush1.bf16.msra.mxu0 %v9853_v60 }
 0x284   :  { %6166 = vmatpush1.bf16.msra.mxu1 %v9856_v61  ;;  %6126 = vmatprep.subr.bf16.mxu0 %v9861_v37 }
 0x285   :  { %6167 = vmatprep.subr.bf16.mxu1 %v9864_v41 }
 0x287   :  { %6127 = vmatpush1.bf16.msra.mxu0 %v9859_v1 }
 0x288   :  { %6168 = vmatpush1.bf16.msra.mxu1 %v9862_v2  ;;  %6128 = vmatprep.subr.bf16.mxu0 %v9867_v3 }
 0x289   :  { %6169 = vmatprep.subr.bf16.mxu1 %v9870_v4 }
 0x28b   :  { %6129 = vmatpush1.bf16.msra.mxu0 %v9865_v5  ;;  %v9926_v5 = vld [vmem:[#allocation4 + $0x1260] ss:$8 sps:$4 sm:$0xff]  }
 0x28c   :  { %6170 = vmatpush1.bf16.msra.mxu1 %v9868_v6  ;;  %6130 = vmatprep.subr.bf16.mxu0 %v9873_v7  ;;  %v9929_v6 = vld [vmem:[#allocation4 + $0x1360] ss:$8 sps:$4 sm:$0xff]  }
 0x28d   :  { %6171 = vmatprep.subr.bf16.mxu1 %v9876_v8 }
 0x28f   :  { %6131 = vmatpush1.bf16.msra.mxu0 %v9871_v10  ;;  %v9934_v10 = vld [vmem:[#allocation4 + $0x1274] ss:$8 sps:$4 sm:$0xff]  }
 0x290   :  { %6172 = vmatpush1.bf16.msra.mxu1 %v9874_v19  ;;  %6132 = vmatprep.subr.bf16.mxu0 %v9879_v22  ;;  %v9937_v19 = vld [vmem:[#allocation4 + $0x1374] ss:$8 sps:$4 sm:$0xff]  }
 0x291   :  { %6173 = vmatprep.subr.bf16.mxu1 %v9882_v12  ;;  %v9940_v12 = vld [vmem:[#allocation4 + $0x1284] ss:$8 sps:$4 sm:$0xff]  }
 0x293   :  { %6133 = vmatpush1.bf16.msra.mxu0 %v9877_v42  ;;  %v9938_v42 = vld [vmem:[#allocation4 + $0x1280] ss:$8 sps:$4 sm:$0xff]  }
 0x294   :  { %6174 = vmatpush1.bf16.msra.mxu1 %v9880_v14  ;;  %6134 = vmatprep.subr.bf16.mxu0 %v9885_v48  ;;  %v9941_v14 = vld [vmem:[#allocation4 + $0x1380] ss:$8 sps:$4 sm:$0xff]   ;;  %v9946_v48 = vld [vmem:[#allocation4 + $0x1294] ss:$8 sps:$4 sm:$0xff]  }
 0x295   :  { %6175 = vmatprep.subr.bf16.mxu1 %v9888_v45  ;;  %v9949_v45 = vld [vmem:[#allocation4 + $0x1394] ss:$8 sps:$4 sm:$0xff]  }
 0x297   :  { %6135 = vmatpush1.bf16.msra.mxu0 %v9883_v40  ;;  %v9944_v40 = vld [vmem:[#allocation4 + $0x1290] ss:$8 sps:$4 sm:$0xff]  }
 0x298   :  { %6176 = vmatpush1.bf16.msra.mxu1 %v9886_v17  ;;  %6186 = vmatprep.subr.bf16.mxu0 %v9892_v20  ;;  %v9947_v17 = vld [vmem:[#allocation4 + $0x1390] ss:$8 sps:$4 sm:$0xff]   ;;  %v9952_v20 = vld [vmem:[#allocation4 + $0x12a4] ss:$8 sps:$4 sm:$0xff]  }
 0x299   :  { %6227 = vmatprep.subr.bf16.mxu1 %v9895_v21  ;;  %v9955_v21 = vld [vmem:[#allocation4 + $0x13a4] ss:$8 sps:$4 sm:$0xff]  }
 0x29a   :  { %6137 = vmatmul.mubr.bf16.vlgmr.msra.gmra.mrb[32].mxu0 %v435_v26  ;;  %v9958_v26 = vld [vmem:[#allocation4 + $0x12b4] ss:$8 sps:$4 sm:$0xff]  }
 0x29b   :  { %6178 = vmatmul.mubr.bf16.vlgmr.msra.gmra.mrb[32].mxu1 %v437_v27  ;;  %6187 = vmatpush1.bf16.msra.mxu0 %v9890_v28  ;;  %v9961_v27 = vld [vmem:[#allocation4 + $0x13b4] ss:$8 sps:$4 sm:$0xff]   ;;  %v9956_v28 = vld [vmem:[#allocation4 + $0x12b0] ss:$8 sps:$4 sm:$0xff]  }
 0x29c   :  { %6228 = vmatpush1.bf16.msra.mxu1 %v9893_v29  ;;  %6188 = vmatprep.subr.bf16.mxu0 %v9898_v30  ;;  %v9959_v29 = vld [vmem:[#allocation4 + $0x13b0] ss:$8 sps:$4 sm:$0xff]   ;;  %v9964_v30 = vld [vmem:[#allocation4 + $0x12c4] ss:$8 sps:$4 sm:$0xff]  }
 0x29d   :  { %6229 = vmatprep.subr.bf16.mxu1 %v9901_v31  ;;  %6218 = vmatprep.mubr.bf16.mxu0 %v440_v32  ;;  %v9967_v31 = vld [vmem:[#allocation4 + $0x13c4] ss:$8 sps:$4 sm:$0xff]   ;;  %v9962_v32 = vld [vmem:[#allocation4 + $0x12c0] ss:$8 sps:$4 sm:$0xff]  }
 0x29e   :  { %6259 = vmatprep.mubr.bf16.mxu1 %v442_v33  ;;  %v9965_v33 = vld [vmem:[#allocation4 + $0x13c0] ss:$8 sps:$4 sm:$0xff]  }
 0x29f   :  { %6189 = vmatpush1.bf16.msra.mxu0 %v9896_v34  ;;  %v9970_v34 = vld [vmem:[#allocation4 + $0x12d4] ss:$8 sps:$4 sm:$0xff]  }
 0x2a0   :  { %6230 = vmatpush1.bf16.msra.mxu1 %v9899_v35  ;;  %6190 = vmatprep.subr.bf16.mxu0 %v9904_v52  ;;  %v9973_v35 = vld [vmem:[#allocation4 + $0x13d4] ss:$8 sps:$4 sm:$0xff]   ;;  %v104_v52 = vld [vmem:[#allocation2 + $0x50] sm:$0xff] }
 0x2a1   :  { %6231 = vmatprep.subr.bf16.mxu1 %v9907_v53  ;;  %v9968_v53 = vld [vmem:[#allocation4 + $0x12d0] ss:$8 sps:$4 sm:$0xff]  }
 0x2a3   :  { %6191 = vmatpush1.bf16.msra.mxu0 %v9902_v39  ;;  %v9971_v39 = vld [vmem:[#allocation4 + $0x13d0] ss:$8 sps:$4 sm:$0xff]  }
 0x2a4   :  { %6232 = vmatpush1.bf16.msra.mxu1 %v9905_v56  ;;  %6192 = vmatprep.subr.bf16.mxu0 %v9910_v44  ;;  %v9976_v56 = vld [vmem:[#allocation4 + $0x12e4] ss:$8 sps:$4 sm:$0xff]  }
 0x2a5   :  { %6233 = vmatprep.subr.bf16.mxu1 %v9913_v57  ;;  %v9979_v44 = vld [vmem:[#allocation4 + $0x13e4] ss:$8 sps:$4 sm:$0xff]   ;;  %v292_v57 = vcombine.high %v104_v52, %v104_v52 }
 0x2a7   :  { %6193 = vmatpush1.bf16.msra.mxu0 %v9908_v9  ;;  %v9974_v9 = vld [vmem:[#allocation4 + $0x12e0] ss:$8 sps:$4 sm:$0xff]  }
 0x2a8   :  { %6234 = vmatpush1.bf16.msra.mxu1 %v9911_v47  ;;  %6194 = vmatprep.subr.bf16.mxu0 %v9916_v13  ;;  %v9977_v47 = vld [vmem:[#allocation4 + $0x13e0] ss:$8 sps:$4 sm:$0xff]   ;;  %v9982_v13 = vld [vmem:[#allocation4 + $0x12f4] ss:$8 sps:$4 sm:$0xff]  }
 0x2a9   :  { %6235 = vmatprep.subr.bf16.mxu1 %v9919_v0  ;;  %v9985_v0 = vld [vmem:[#allocation4 + $0x13f4] ss:$8 sps:$4 sm:$0xff]  }
 0x2ab   :  { %6195 = vmatpush1.bf16.msra.mxu0 %v9914_v11  ;;  %v10780_v11 = vrot.slane %v104_v52, %v10613_v49 }
 0x2ac   :  { %6236 = vmatpush1.bf16.msra.mxu1 %v9917_v50  ;;  %6196 = vmatprep.subr.bf16.mxu0 %v9922_v46  ;;  %v10783_v50 = vrot.slane %v292_v57, %v10613_v49  ;;  %v9980_v46 = vld [vmem:[#allocation4 + $0x12f0] ss:$8 sps:$4 sm:$0xff]   ;;  %v10040_v57 = vld [vmem:[#allocation4 + $0x1584] ss:$8 sps:$4 sm:$0xff]  }
 0x2ad   :  { %6237 = vmatprep.subr.bf16.mxu1 %v9925_v51  ;;  %v5892_v60 = vpop.f32.mrb[20].mxu0  ;;  %v9983_v51 = vld [vmem:[#allocation4 + $0x13f0] ss:$8 sps:$4 sm:$0xff]  }
 0x2ae   :  { %v5933_v61 = vpop.f32.mrb[20].mxu1  ;;  %v5893_v37 = vadd.f32 %v5892_v60, %v10755_v38  ;;  %v5894_v41 = vpop.f32.mrb[21].mxu0  ;;  %v9932_v38 = vld [vmem:[#allocation4 + $0x1270] ss:$8 sps:$4 sm:$0xff]   ;;  %v439_v60 = vpack.c.bf16 %v10760_v36, %v10760_v36  ;;  %v10001_v36 = vld [vmem:[#allocation4 + $0x1424] ss:$8 sps:$4 sm:$0xff]  }
 0x2af   :  { %v5935_v1 = vpop.f32.mrb[21].mxu1  ;;  %v5895_v2 = vadd.f32 %v5894_v41, %v10757_v63  ;;  %v5896_v3 = vpop.f32.mrb[22].mxu0  ;;  %6197 = vmatpush1.bf16.msra.mxu0 %v9920_v54  ;;  %v9935_v63 = vld [vmem:[#allocation4 + $0x1370] ss:$8 sps:$4 sm:$0xff]   ;;  %v9989_v54 = vld [vmem:[#allocation4 + $0x1404] ss:$8 sps:$4 sm:$0xff]  }
 0x2b0   :  { %v5937_v4 = vpop.f32.mrb[22].mxu1  ;;  %6238 = vmatpush1.bf16.msra.mxu1 %v9923_v55  ;;  %v10775_v7 = vadd.f32 %v5933_v61, %v5893_v37  ;;  %v5897_v8 = vpop.f32.mrb[23].mxu0  ;;  %6198 = vmatprep.subr.bf16.mxu0 %v9928_v58  ;;  %v9992_v55 = vld [vmem:[#allocation4 + $0x1504] ss:$8 sps:$4 sm:$0xff]   ;;  %v307_v58 = vcombine.high %v10780_v11, %v10780_v11  ;;  %v441_v61 = vpack.c.bf16 %v10763_v15, %v10763_v15  ;;  %v9987_v37 = vld [vmem:[#allocation4 + $0x1400] ss:$8 sps:$4 sm:$0xff]  }
 0x2b1   :  { %v5938_v18 = vpop.f32.mrb[23].mxu1  ;;  %6239 = vmatprep.subr.bf16.mxu1 %v9931_v59  ;;  %v10777_v22 = vadd.f32 %v5935_v1, %v5895_v2  ;;  %v308_v59 = vcombine.high %v10783_v50, %v10783_v50  ;;  %v9990_v41 = vld [vmem:[#allocation4 + $0x1500] ss:$8 sps:$4 sm:$0xff]   ;;  %v9995_v1 = vld [vmem:[#allocation4 + $0x1414] ss:$8 sps:$4 sm:$0xff]  }
 0x2b2   :  { %v9998_v2 = vld [vmem:[#allocation4 + $0x1514] ss:$8 sps:$4 sm:$0xff]   ;;  %v444_v3 = vpack.c.bf16 %v307_v58, %v307_v58  ;;  %v10004_v15 = vld [vmem:[#allocation4 + $0x1524] ss:$8 sps:$4 sm:$0xff]   ;;  %v9999_v8 = vld [vmem:[#allocation4 + $0x1420] ss:$8 sps:$4 sm:$0xff]  }
 0x2b3   :  { %6199 = vmatpush1.bf16.msra.mxu0 %v9926_v5  ;;  %v446_v4 = vpack.c.bf16 %v308_v59, %v308_v59  ;;  %v9993_v5 = vld [vmem:[#allocation4 + $0x1410] ss:$8 sps:$4 sm:$0xff]   ;;  %v10002_v18 = vld [vmem:[#allocation4 + $0x1520] ss:$8 sps:$4 sm:$0xff]  }
 0x2b4   :  { %6240 = vmatpush1.bf16.msra.mxu1 %v9929_v6  ;;  %6200 = vmatprep.subr.bf16.mxu0 %v9934_v10  ;;  %v9996_v6 = vld [vmem:[#allocation4 + $0x1510] ss:$8 sps:$4 sm:$0xff]   ;;  %v10007_v10 = vld [vmem:[#allocation4 + $0x1434] ss:$8 sps:$4 sm:$0xff]   ;;  %v10047_v58 = vld [vmem:[#allocation4 + $0x14a0] ss:$8 sps:$4 sm:$0xff]  }
 0x2b5   :  { %6241 = vmatprep.subr.bf16.mxu1 %v9937_v19  ;;  %v10010_v19 = vld [vmem:[#allocation4 + $0x1534] ss:$8 sps:$4 sm:$0xff]   ;;  %v10050_v59 = vld [vmem:[#allocation4 + $0x15a0] ss:$8 sps:$4 sm:$0xff]  }
 0x2b7   :  { %6201 = vmatpush1.bf16.msra.mxu0 %v9932_v38  ;;  %v10005_v38 = vld [vmem:[#allocation4 + $0x1430] ss:$8 sps:$4 sm:$0xff]  }
 0x2b8   :  { %6242 = vmatpush1.bf16.msra.mxu1 %v9935_v63  ;;  %6202 = vmatprep.subr.bf16.mxu0 %v9940_v12  ;;  %v10008_v63 = vld [vmem:[#allocation4 + $0x1530] ss:$8 sps:$4 sm:$0xff]   ;;  %v10013_v12 = vld [vmem:[#allocation4 + $0x1444] ss:$8 sps:$4 sm:$0xff]  }
 0x2b9   :  { %6243 = vmatprep.subr.bf16.mxu1 %v9943_v23  ;;  %v10016_v23 = vld [vmem:[#allocation4 + $0x1544] ss:$8 sps:$4 sm:$0xff]  }
 0x2bb   :  { %6203 = vmatpush1.bf16.msra.mxu0 %v9938_v42  ;;  %v10011_v42 = vld [vmem:[#allocation4 + $0x1440] ss:$8 sps:$4 sm:$0xff]  }
 0x2bc   :  { %6244 = vmatpush1.bf16.msra.mxu1 %v9941_v14  ;;  %6204 = vmatprep.subr.bf16.mxu0 %v9946_v48  ;;  %v10014_v14 = vld [vmem:[#allocation4 + $0x1540] ss:$8 sps:$4 sm:$0xff]   ;;  %v10019_v48 = vld [vmem:[#allocation4 + $0x1454] ss:$8 sps:$4 sm:$0xff]  }
 0x2bd   :  { %6245 = vmatprep.subr.bf16.mxu1 %v9949_v45  ;;  %v10022_v45 = vld [vmem:[#allocation4 + $0x1554] ss:$8 sps:$4 sm:$0xff]  }
 0x2bf   :  { %6205 = vmatpush1.bf16.msra.mxu0 %v9944_v40  ;;  %v10017_v40 = vld [vmem:[#allocation4 + $0x1450] ss:$8 sps:$4 sm:$0xff]  }
 0x2c0   :  { %6246 = vmatpush1.bf16.msra.mxu1 %v9947_v17  ;;  %6206 = vmatprep.subr.bf16.mxu0 %v9952_v20  ;;  %v10020_v17 = vld [vmem:[#allocation4 + $0x1550] ss:$8 sps:$4 sm:$0xff]   ;;  %v10025_v20 = vld [vmem:[#allocation4 + $0x1464] ss:$8 sps:$4 sm:$0xff]  }
 0x2c1   :  { %6247 = vmatprep.subr.bf16.mxu1 %v9955_v21  ;;  %v10028_v21 = vld [vmem:[#allocation4 + $0x1564] ss:$8 sps:$4 sm:$0xff]  }
 0x2c3   :  { %6207 = vmatpush1.bf16.msra.mxu0 %v9950_v24 }
 0x2c4   :  { %6248 = vmatpush1.bf16.msra.mxu1 %v9953_v25  ;;  %6208 = vmatprep.subr.bf16.mxu0 %v9958_v26 }
 0x2c5   :  { %6249 = vmatprep.subr.bf16.mxu1 %v9961_v27 }
 0x2c7   :  { %6209 = vmatpush1.bf16.msra.mxu0 %v9956_v28 }
 0x2c8   :  { %6250 = vmatpush1.bf16.msra.mxu1 %v9959_v29  ;;  %6210 = vmatprep.subr.bf16.mxu0 %v9964_v30 }
 0x2c9   :  { %6251 = vmatprep.subr.bf16.mxu1 %v9967_v31 }
 0x2cb   :  { %6211 = vmatpush1.bf16.msra.mxu0 %v9962_v32  ;;  %v10023_v32 = vld [vmem:[#allocation4 + $0x1460] ss:$8 sps:$4 sm:$0xff]  }
 0x2cc   :  { %6252 = vmatpush1.bf16.msra.mxu1 %v9965_v33  ;;  %6212 = vmatprep.subr.bf16.mxu0 %v9970_v34  ;;  %v10026_v33 = vld [vmem:[#allocation4 + $0x1560] ss:$8 sps:$4 sm:$0xff]  }
 0x2cd   :  { %6253 = vmatprep.subr.bf16.mxu1 %v9973_v35 }
 0x2cf   :  { %6213 = vmatpush1.bf16.msra.mxu0 %v9968_v53  ;;  %v10031_v53 = vld [vmem:[#allocation4 + $0x1474] ss:$8 sps:$4 sm:$0xff]  }
 0x2d0   :  { %6254 = vmatpush1.bf16.msra.mxu1 %v9971_v39  ;;  %6214 = vmatprep.subr.bf16.mxu0 %v9976_v56  ;;  %v10034_v39 = vld [vmem:[#allocation4 + $0x1574] ss:$8 sps:$4 sm:$0xff]  }
 0x2d1   :  { %6255 = vmatprep.subr.bf16.mxu1 %v9979_v44  ;;  %v10037_v44 = vld [vmem:[#allocation4 + $0x1484] ss:$8 sps:$4 sm:$0xff]  }
 0x2d3   :  { %6215 = vmatpush1.bf16.msra.mxu0 %v9974_v9  ;;  %v10035_v9 = vld [vmem:[#allocation4 + $0x1480] ss:$8 sps:$4 sm:$0xff]  }
 0x2d4   :  { %6256 = vmatpush1.bf16.msra.mxu1 %v9977_v47  ;;  %6216 = vmatprep.subr.bf16.mxu0 %v9982_v13  ;;  %v10038_v47 = vld [vmem:[#allocation4 + $0x1580] ss:$8 sps:$4 sm:$0xff]   ;;  %v10043_v13 = vld [vmem:[#allocation4 + $0x1494] ss:$8 sps:$4 sm:$0xff]  }
 0x2d5   :  { %6257 = vmatprep.subr.bf16.mxu1 %v9985_v0  ;;  %v10046_v0 = vld [vmem:[#allocation4 + $0x1594] ss:$8 sps:$4 sm:$0xff]  }
 0x2d7   :  { %6217 = vmatpush1.bf16.msra.mxu0 %v9980_v46  ;;  %v10041_v46 = vld [vmem:[#allocation4 + $0x1490] ss:$8 sps:$4 sm:$0xff]  }
 0x2d8   :  { %6258 = vmatpush1.bf16.msra.mxu1 %v9983_v51  ;;  %6268 = vmatprep.subr.bf16.mxu0 %v9989_v54  ;;  %v10044_v51 = vld [vmem:[#allocation4 + $0x1590] ss:$8 sps:$4 sm:$0xff]   ;;  %v10049_v54 = vld [vmem:[#allocation4 + $0x14a4] ss:$8 sps:$4 sm:$0xff]  }
 0x2d9   :  { %6309 = vmatprep.subr.bf16.mxu1 %v9992_v55  ;;  %v10052_v55 = vld [vmem:[#allocation4 + $0x15a4] ss:$8 sps:$4 sm:$0xff]  }
 0x2da   :  { %6219 = vmatmul.mubr.bf16.vlgmr.msra.gmra.mrb[36].mxu0 %v439_v60  ;;  %v10055_v60 = vld [vmem:[#allocation4 + $0x14b4] ss:$8 sps:$4 sm:$0xff]  }
 0x2db   :  { %6260 = vmatmul.mubr.bf16.vlgmr.msra.gmra.mrb[36].mxu1 %v441_v61  ;;  %6269 = vmatpush1.bf16.msra.mxu0 %v9987_v37  ;;  %v10058_v61 = vld [vmem:[#allocation4 + $0x15b4] ss:$8 sps:$4 sm:$0xff]   ;;  %v10053_v37 = vld [vmem:[#allocation4 + $0x14b0] ss:$8 sps:$4 sm:$0xff]  }
 0x2dc   :  { %6310 = vmatpush1.bf16.msra.mxu1 %v9990_v41  ;;  %6270 = vmatprep.subr.bf16.mxu0 %v9995_v1  ;;  %v10056_v41 = vld [vmem:[#allocation4 + $0x15b0] ss:$8 sps:$4 sm:$0xff]   ;;  %v10061_v1 = vld [vmem:[#allocation4 + $0x14c4] ss:$8 sps:$4 sm:$0xff]  }
 0x2dd   :  { %6311 = vmatprep.subr.bf16.mxu1 %v9998_v2  ;;  %6300 = vmatprep.mubr.bf16.mxu0 %v444_v3  ;;  %v10064_v2 = vld [vmem:[#allocation4 + $0x15c4] ss:$8 sps:$4 sm:$0xff]   ;;  %v10059_v3 = vld [vmem:[#allocation4 + $0x14c0] ss:$8 sps:$4 sm:$0xff]  }
 0x2de   :  { %6341 = vmatprep.mubr.bf16.mxu1 %v446_v4  ;;  %v10062_v4 = vld [vmem:[#allocation4 + $0x15c0] ss:$8 sps:$4 sm:$0xff]  }
 0x2df   :  { %6271 = vmatpush1.bf16.msra.mxu0 %v9993_v5  ;;  %v10067_v5 = vld [vmem:[#allocation4 + $0x14d4] ss:$8 sps:$4 sm:$0xff]  }
 0x2e0   :  { %6312 = vmatpush1.bf16.msra.mxu1 %v9996_v6  ;;  %6272 = vmatprep.subr.bf16.mxu0 %v10001_v36  ;;  %v10070_v6 = vld [vmem:[#allocation4 + $0x15d4] ss:$8 sps:$4 sm:$0xff]  }
 0x2e1   :  { %6313 = vmatprep.subr.bf16.mxu1 %v10004_v15  ;;  %v105_v36 = vld [vmem:[#allocation2 + $0x58] sm:$0xff] }
 0x2e2   :  { %v10065_v15 = vld [vmem:[#allocation4 + $0x14d0] ss:$8 sps:$4 sm:$0xff]  }
 0x2e3   :  { %6273 = vmatpush1.bf16.msra.mxu0 %v9999_v8  ;;  %v10068_v8 = vld [vmem:[#allocation4 + $0x15d0] ss:$8 sps:$4 sm:$0xff]  }
 0x2e4   :  { %6314 = vmatpush1.bf16.msra.mxu1 %v10002_v18  ;;  %6274 = vmatprep.subr.bf16.mxu0 %v10007_v10  ;;  %v10073_v18 = vld [vmem:[#allocation4 + $0x14e4] ss:$8 sps:$4 sm:$0xff]  }
 0x2e5   :  { %6315 = vmatprep.subr.bf16.mxu1 %v10010_v19  ;;  %v10076_v10 = vld [vmem:[#allocation4 + $0x15e4] ss:$8 sps:$4 sm:$0xff]   ;;  %v309_v19 = vcombine.high %v105_v36, %v105_v36 }
 0x2e7   :  { %6275 = vmatpush1.bf16.msra.mxu0 %v10005_v38  ;;  %v10071_v38 = vld [vmem:[#allocation4 + $0x14e0] ss:$8 sps:$4 sm:$0xff]  }
 0x2e8   :  { %6316 = vmatpush1.bf16.msra.mxu1 %v10008_v63  ;;  %6276 = vmatprep.subr.bf16.mxu0 %v10013_v12  ;;  %v10074_v63 = vld [vmem:[#allocation4 + $0x15e0] ss:$8 sps:$4 sm:$0xff]   ;;  %v10079_v12 = vld [vmem:[#allocation4 + $0x14f4] ss:$8 sps:$4 sm:$0xff]  }
 0x2e9   :  { %6317 = vmatprep.subr.bf16.mxu1 %v10016_v23  ;;  %v10082_v23 = vld [vmem:[#allocation4 + $0x15f4] ss:$8 sps:$4 sm:$0xff]  }
 0x2eb   :  { %6277 = vmatpush1.bf16.msra.mxu0 %v10011_v42  ;;  %v10800_v42 = vrot.slane %v105_v36, %v10613_v49 }
 0x2ec   :  { %6318 = vmatpush1.bf16.msra.mxu1 %v10014_v14  ;;  %6278 = vmatprep.subr.bf16.mxu0 %v10019_v48  ;;  %v10803_v14 = vrot.slane %v309_v19, %v10613_v49  ;;  %v10077_v48 = vld [vmem:[#allocation4 + $0x14f0] ss:$8 sps:$4 sm:$0xff]   ;;  %v10137_v19 = vld [vmem:[#allocation4 + $0x1784] ss:$8 sps:$4 sm:$0xff]  }
 0x2ed   :  { %6319 = vmatprep.subr.bf16.mxu1 %v10022_v45  ;;  %v5974_v24 = vpop.f32.mrb[24].mxu0  ;;  %v10080_v45 = vld [vmem:[#allocation4 + $0x15f0] ss:$8 sps:$4 sm:$0xff]  }
 0x2ee   :  { %v6015_v25 = vpop.f32.mrb[24].mxu1  ;;  %v5975_v26 = vadd.f32 %v5974_v24, %v10775_v7  ;;  %v5976_v27 = vpop.f32.mrb[25].mxu0  ;;  %v10029_v7 = vld [vmem:[#allocation4 + $0x1470] ss:$8 sps:$4 sm:$0xff]   ;;  %v443_v24 = vpack.c.bf16 %v10780_v11, %v10780_v11  ;;  %v10098_v11 = vld [vmem:[#allocation4 + $0x1624] ss:$8 sps:$4 sm:$0xff]  }
 0x2ef   :  { %v6017_v28 = vpop.f32.mrb[25].mxu1  ;;  %v5977_v29 = vadd.f32 %v5976_v27, %v10777_v22  ;;  %v5978_v30 = vpop.f32.mrb[26].mxu0  ;;  %6279 = vmatpush1.bf16.msra.mxu0 %v10017_v40  ;;  %v10032_v22 = vld [vmem:[#allocation4 + $0x1570] ss:$8 sps:$4 sm:$0xff]   ;;  %v10086_v40 = vld [vmem:[#allocation4 + $0x1604] ss:$8 sps:$4 sm:$0xff]  }
 0x2f0   :  { %v6019_v31 = vpop.f32.mrb[26].mxu1  ;;  %6320 = vmatpush1.bf16.msra.mxu1 %v10020_v17  ;;  %v10795_v34 = vadd.f32 %v6015_v25, %v5975_v26  ;;  %v5979_v35 = vpop.f32.mrb[27].mxu0  ;;  %6280 = vmatprep.subr.bf16.mxu0 %v10025_v20  ;;  %v10089_v17 = vld [vmem:[#allocation4 + $0x1704] ss:$8 sps:$4 sm:$0xff]   ;;  %v324_v20 = vcombine.high %v10800_v42, %v10800_v42  ;;  %v445_v25 = vpack.c.bf16 %v10783_v50, %v10783_v50  ;;  %v10084_v26 = vld [vmem:[#allocation4 + $0x1600] ss:$8 sps:$4 sm:$0xff]  }
 0x2f1   :  { %v6020_v52 = vpop.f32.mrb[27].mxu1  ;;  %6321 = vmatprep.subr.bf16.mxu1 %v10028_v21  ;;  %v10797_v56 = vadd.f32 %v6017_v28, %v5977_v29  ;;  %v325_v21 = vcombine.high %v10803_v14, %v10803_v14  ;;  %v10087_v27 = vld [vmem:[#allocation4 + $0x1700] ss:$8 sps:$4 sm:$0xff]   ;;  %v10092_v28 = vld [vmem:[#allocation4 + $0x1614] ss:$8 sps:$4 sm:$0xff]  }
 0x2f2   :  { %v10095_v29 = vld [vmem:[#allocation4 + $0x1714] ss:$8 sps:$4 sm:$0xff]   ;;  %v448_v30 = vpack.c.bf16 %v324_v20, %v324_v20  ;;  %v10101_v50 = vld [vmem:[#allocation4 + $0x1724] ss:$8 sps:$4 sm:$0xff]   ;;  %v10096_v35 = vld [vmem:[#allocation4 + $0x1620] ss:$8 sps:$4 sm:$0xff]  }
 0x2f3   :  { %6281 = vmatpush1.bf16.msra.mxu0 %v10023_v32  ;;  %v450_v31 = vpack.c.bf16 %v325_v21, %v325_v21  ;;  %v10090_v32 = vld [vmem:[#allocation4 + $0x1610] ss:$8 sps:$4 sm:$0xff]   ;;  %v10099_v52 = vld [vmem:[#allocation4 + $0x1720] ss:$8 sps:$4 sm:$0xff]  }
 0x2f4   :  { %6322 = vmatpush1.bf16.msra.mxu1 %v10026_v33  ;;  %6282 = vmatprep.subr.bf16.mxu0 %v10031_v53  ;;  %v10093_v33 = vld [vmem:[#allocation4 + $0x1710] ss:$8 sps:$4 sm:$0xff]   ;;  %v10104_v53 = vld [vmem:[#allocation4 + $0x1634] ss:$8 sps:$4 sm:$0xff]   ;;  %v10144_v20 = vld [vmem:[#allocation4 + $0x16a0] ss:$8 sps:$4 sm:$0xff]  }
 0x2f5   :  { %6323 = vmatprep.subr.bf16.mxu1 %v10034_v39  ;;  %v10107_v39 = vld [vmem:[#allocation4 + $0x1734] ss:$8 sps:$4 sm:$0xff]   ;;  %v10147_v21 = vld [vmem:[#allocation4 + $0x17a0] ss:$8 sps:$4 sm:$0xff]  }
 0x2f7   :  { %6283 = vmatpush1.bf16.msra.mxu0 %v10029_v7  ;;  %v10102_v7 = vld [vmem:[#allocation4 + $0x1630] ss:$8 sps:$4 sm:$0xff]  }
 0x2f8   :  { %6324 = vmatpush1.bf16.msra.mxu1 %v10032_v22  ;;  %6284 = vmatprep.subr.bf16.mxu0 %v10037_v44  ;;  %v10105_v22 = vld [vmem:[#allocation4 + $0x1730] ss:$8 sps:$4 sm:$0xff]   ;;  %v10110_v44 = vld [vmem:[#allocation4 + $0x1644] ss:$8 sps:$4 sm:$0xff]  }
 0x2f9   :  { %6325 = vmatprep.subr.bf16.mxu1 %v10040_v57  ;;  %v10113_v57 = vld [vmem:[#allocation4 + $0x1744] ss:$8 sps:$4 sm:$0xff]  }
 0x2fb   :  { %6285 = vmatpush1.bf16.msra.mxu0 %v10035_v9  ;;  %v10108_v9 = vld [vmem:[#allocation4 + $0x1640] ss:$8 sps:$4 sm:$0xff]  }
 0x2fc   :  { %6326 = vmatpush1.bf16.msra.mxu1 %v10038_v47  ;;  %6286 = vmatprep.subr.bf16.mxu0 %v10043_v13  ;;  %v10111_v47 = vld [vmem:[#allocation4 + $0x1740] ss:$8 sps:$4 sm:$0xff]   ;;  %v10116_v13 = vld [vmem:[#allocation4 + $0x1654] ss:$8 sps:$4 sm:$0xff]  }
 0x2fd   :  { %6327 = vmatprep.subr.bf16.mxu1 %v10046_v0  ;;  %v10119_v0 = vld [vmem:[#allocation4 + $0x1754] ss:$8 sps:$4 sm:$0xff]  }
 0x2ff   :  { %6287 = vmatpush1.bf16.msra.mxu0 %v10041_v46  ;;  %v10114_v46 = vld [vmem:[#allocation4 + $0x1650] ss:$8 sps:$4 sm:$0xff]  }
 0x300   :  { %6328 = vmatpush1.bf16.msra.mxu1 %v10044_v51  ;;  %6288 = vmatprep.subr.bf16.mxu0 %v10049_v54  ;;  %v10117_v51 = vld [vmem:[#allocation4 + $0x1750] ss:$8 sps:$4 sm:$0xff]   ;;  %v10122_v54 = vld [vmem:[#allocation4 + $0x1664] ss:$8 sps:$4 sm:$0xff]  }
 0x301   :  { %6329 = vmatprep.subr.bf16.mxu1 %v10052_v55  ;;  %v10125_v55 = vld [vmem:[#allocation4 + $0x1764] ss:$8 sps:$4 sm:$0xff]  }
 0x303   :  { %6289 = vmatpush1.bf16.msra.mxu0 %v10047_v58 }
 0x304   :  { %6330 = vmatpush1.bf16.msra.mxu1 %v10050_v59  ;;  %6290 = vmatprep.subr.bf16.mxu0 %v10055_v60 }
 0x305   :  { %6331 = vmatprep.subr.bf16.mxu1 %v10058_v61 }
 0x307   :  { %6291 = vmatpush1.bf16.msra.mxu0 %v10053_v37 }
 0x308   :  { %6332 = vmatpush1.bf16.msra.mxu1 %v10056_v41  ;;  %6292 = vmatprep.subr.bf16.mxu0 %v10061_v1 }
 0x309   :  { %6333 = vmatprep.subr.bf16.mxu1 %v10064_v2 }
 0x30b   :  { %6293 = vmatpush1.bf16.msra.mxu0 %v10059_v3  ;;  %v10120_v3 = vld [vmem:[#allocation4 + $0x1660] ss:$8 sps:$4 sm:$0xff]  }
 0x30c   :  { %6334 = vmatpush1.bf16.msra.mxu1 %v10062_v4  ;;  %6294 = vmatprep.subr.bf16.mxu0 %v10067_v5  ;;  %v10123_v4 = vld [vmem:[#allocation4 + $0x1760] ss:$8 sps:$4 sm:$0xff]  }
 0x30d   :  { %6335 = vmatprep.subr.bf16.mxu1 %v10070_v6 }
 0x30f   :  { %6295 = vmatpush1.bf16.msra.mxu0 %v10065_v15  ;;  %v10128_v15 = vld [vmem:[#allocation4 + $0x1674] ss:$8 sps:$4 sm:$0xff]  }
 0x310   :  { %6336 = vmatpush1.bf16.msra.mxu1 %v10068_v8  ;;  %6296 = vmatprep.subr.bf16.mxu0 %v10073_v18  ;;  %v10131_v8 = vld [vmem:[#allocation4 + $0x1774] ss:$8 sps:$4 sm:$0xff]  }
 0x311   :  { %6337 = vmatprep.subr.bf16.mxu1 %v10076_v10  ;;  %v10134_v10 = vld [vmem:[#allocation4 + $0x1684] ss:$8 sps:$4 sm:$0xff]  }
 0x313   :  { %6297 = vmatpush1.bf16.msra.mxu0 %v10071_v38  ;;  %v10132_v38 = vld [vmem:[#allocation4 + $0x1680] ss:$8 sps:$4 sm:$0xff]  }
 0x314   :  { %6338 = vmatpush1.bf16.msra.mxu1 %v10074_v63  ;;  %6298 = vmatprep.subr.bf16.mxu0 %v10079_v12  ;;  %v10135_v63 = vld [vmem:[#allocation4 + $0x1780] ss:$8 sps:$4 sm:$0xff]   ;;  %v10140_v12 = vld [vmem:[#allocation4 + $0x1694] ss:$8 sps:$4 sm:$0xff]  }
 0x315   :  { %6339 = vmatprep.subr.bf16.mxu1 %v10082_v23  ;;  %v10143_v23 = vld [vmem:[#allocation4 + $0x1794] ss:$8 sps:$4 sm:$0xff]  }
 0x317   :  { %6299 = vmatpush1.bf16.msra.mxu0 %v10077_v48  ;;  %v10138_v48 = vld [vmem:[#allocation4 + $0x1690] ss:$8 sps:$4 sm:$0xff]  }
 0x318   :  { %6340 = vmatpush1.bf16.msra.mxu1 %v10080_v45  ;;  %6350 = vmatprep.subr.bf16.mxu0 %v10086_v40  ;;  %v10141_v45 = vld [vmem:[#allocation4 + $0x1790] ss:$8 sps:$4 sm:$0xff]   ;;  %v10146_v40 = vld [vmem:[#allocation4 + $0x16a4] ss:$8 sps:$4 sm:$0xff]  }
 0x319   :  { %6391 = vmatprep.subr.bf16.mxu1 %v10089_v17  ;;  %v10149_v17 = vld [vmem:[#allocation4 + $0x17a4] ss:$8 sps:$4 sm:$0xff]  }
 0x31a   :  { %6301 = vmatmul.mubr.bf16.vlgmr.msra.gmra.mrb[40].mxu0 %v443_v24  ;;  %v10152_v24 = vld [vmem:[#allocation4 + $0x16b4] ss:$8 sps:$4 sm:$0xff]  }
 0x31b   :  { %6342 = vmatmul.mubr.bf16.vlgmr.msra.gmra.mrb[40].mxu1 %v445_v25  ;;  %6351 = vmatpush1.bf16.msra.mxu0 %v10084_v26  ;;  %v10155_v25 = vld [vmem:[#allocation4 + $0x17b4] ss:$8 sps:$4 sm:$0xff]   ;;  %v10150_v26 = vld [vmem:[#allocation4 + $0x16b0] ss:$8 sps:$4 sm:$0xff]  }
 0x31c   :  { %6392 = vmatpush1.bf16.msra.mxu1 %v10087_v27  ;;  %6352 = vmatprep.subr.bf16.mxu0 %v10092_v28  ;;  %v10153_v27 = vld [vmem:[#allocation4 + $0x17b0] ss:$8 sps:$4 sm:$0xff]   ;;  %v10158_v28 = vld [vmem:[#allocation4 + $0x16c4] ss:$8 sps:$4 sm:$0xff]  }
 0x31d   :  { %6393 = vmatprep.subr.bf16.mxu1 %v10095_v29  ;;  %6382 = vmatprep.mubr.bf16.mxu0 %v448_v30  ;;  %v10161_v29 = vld [vmem:[#allocation4 + $0x17c4] ss:$8 sps:$4 sm:$0xff]   ;;  %v10156_v30 = vld [vmem:[#allocation4 + $0x16c0] ss:$8 sps:$4 sm:$0xff]  }
 0x31e   :  { %6423 = vmatprep.mubr.bf16.mxu1 %v450_v31  ;;  %v10159_v31 = vld [vmem:[#allocation4 + $0x17c0] ss:$8 sps:$4 sm:$0xff]  }
 0x31f   :  { %6353 = vmatpush1.bf16.msra.mxu0 %v10090_v32  ;;  %v10164_v32 = vld [vmem:[#allocation4 + $0x16d4] ss:$8 sps:$4 sm:$0xff]  }
 0x320   :  { %6394 = vmatpush1.bf16.msra.mxu1 %v10093_v33  ;;  %6354 = vmatprep.subr.bf16.mxu0 %v10098_v11  ;;  %v10167_v33 = vld [vmem:[#allocation4 + $0x17d4] ss:$8 sps:$4 sm:$0xff]  }
 0x321   :  { %6395 = vmatprep.subr.bf16.mxu1 %v10101_v50  ;;  %v106_v11 = vld [vmem:[#allocation2 + $0x60] sm:$0xff] }
 0x322   :  { %v10162_v50 = vld [vmem:[#allocation4 + $0x16d0] ss:$8 sps:$4 sm:$0xff]  }
 0x323   :  { %6355 = vmatpush1.bf16.msra.mxu0 %v10096_v35  ;;  %v10165_v35 = vld [vmem:[#allocation4 + $0x17d0] ss:$8 sps:$4 sm:$0xff]  }
 0x324   :  { %6396 = vmatpush1.bf16.msra.mxu1 %v10099_v52  ;;  %6356 = vmatprep.subr.bf16.mxu0 %v10104_v53  ;;  %v10170_v52 = vld [vmem:[#allocation4 + $0x16e4] ss:$8 sps:$4 sm:$0xff]  }
 0x325   :  { %6397 = vmatprep.subr.bf16.mxu1 %v10107_v39  ;;  %v10173_v53 = vld [vmem:[#allocation4 + $0x17e4] ss:$8 sps:$4 sm:$0xff]   ;;  %v326_v39 = vcombine.high %v106_v11, %v106_v11 }
 0x327   :  { %6357 = vmatpush1.bf16.msra.mxu0 %v10102_v7  ;;  %v10168_v7 = vld [vmem:[#allocation4 + $0x16e0] ss:$8 sps:$4 sm:$0xff]  }
 0x328   :  { %6398 = vmatpush1.bf16.msra.mxu1 %v10105_v22  ;;  %6358 = vmatprep.subr.bf16.mxu0 %v10110_v44  ;;  %v10171_v22 = vld [vmem:[#allocation4 + $0x17e0] ss:$8 sps:$4 sm:$0xff]   ;;  %v10176_v44 = vld [vmem:[#allocation4 + $0x16f4] ss:$8 sps:$4 sm:$0xff]  }
 0x329   :  { %6399 = vmatprep.subr.bf16.mxu1 %v10113_v57  ;;  %v10179_v57 = vld [vmem:[#allocation4 + $0x17f4] ss:$8 sps:$4 sm:$0xff]  }
 0x32b   :  { %6359 = vmatpush1.bf16.msra.mxu0 %v10108_v9  ;;  %v10820_v9 = vrot.slane %v106_v11, %v10613_v49 }
 0x32c   :  { %6400 = vmatpush1.bf16.msra.mxu1 %v10111_v47  ;;  %6360 = vmatprep.subr.bf16.mxu0 %v10116_v13  ;;  %v10823_v47 = vrot.slane %v326_v39, %v10613_v49  ;;  %v10174_v13 = vld [vmem:[#allocation4 + $0x16f0] ss:$8 sps:$4 sm:$0xff]   ;;  %v449_v49 = vpack.c.bf16 %v10803_v14, %v10803_v14  ;;  %v10195_v14 = vld [vmem:[#allocation4 + $0x1824] ss:$8 sps:$4 sm:$0xff]  }
 0x32d   :  { %6401 = vmatprep.subr.bf16.mxu1 %v10119_v0  ;;  %v6056_v58 = vpop.f32.mrb[28].mxu0  ;;  %v10177_v0 = vld [vmem:[#allocation4 + $0x17f0] ss:$8 sps:$4 sm:$0xff]  }
 0x32e   :  { %v6097_v59 = vpop.f32.mrb[28].mxu1  ;;  %v6057_v60 = vadd.f32 %v6056_v58, %v10795_v34  ;;  %v6058_v61 = vpop.f32.mrb[29].mxu0  ;;  %v10126_v34 = vld [vmem:[#allocation4 + $0x1670] ss:$8 sps:$4 sm:$0xff]   ;;  %v447_v58 = vpack.c.bf16 %v10800_v42, %v10800_v42 }
 0x32f   :  { %v6099_v37 = vpop.f32.mrb[29].mxu1  ;;  %v6059_v41 = vadd.f32 %v6058_v61, %v10797_v56  ;;  %v6060_v1 = vpop.f32.mrb[30].mxu0  ;;  %6361 = vmatpush1.bf16.msra.mxu0 %v10114_v46  ;;  %v10129_v56 = vld [vmem:[#allocation4 + $0x1770] ss:$8 sps:$4 sm:$0xff]   ;;  %v10183_v46 = vld [vmem:[#allocation4 + $0x1804] ss:$8 sps:$4 sm:$0xff]  }
 0x330   :  { %v6101_v2 = vpop.f32.mrb[30].mxu1  ;;  %6402 = vmatpush1.bf16.msra.mxu1 %v10117_v51  ;;  %v10815_v5 = vadd.f32 %v6097_v59, %v6057_v60  ;;  %v6061_v6 = vpop.f32.mrb[31].mxu0  ;;  %6362 = vmatprep.subr.bf16.mxu0 %v10122_v54  ;;  %v10186_v51 = vld [vmem:[#allocation4 + $0x1904] ss:$8 sps:$4 sm:$0xff]   ;;  %v341_v54 = vcombine.high %v10820_v9, %v10820_v9  ;;  %v10181_v59 = vld [vmem:[#allocation4 + $0x1800] ss:$8 sps:$4 sm:$0xff]  }
 0x331   :  { %v6102_v36 = vpop.f32.mrb[31].mxu1  ;;  %6403 = vmatprep.subr.bf16.mxu1 %v10125_v55  ;;  %v10817_v18 = vadd.f32 %v6099_v37, %v6059_v41  ;;  %v342_v55 = vcombine.high %v10823_v47, %v10823_v47  ;;  %v10184_v60 = vld [vmem:[#allocation4 + $0x1900] ss:$8 sps:$4 sm:$0xff]   ;;  %v10189_v61 = vld [vmem:[#allocation4 + $0x1814] ss:$8 sps:$4 sm:$0xff]  }
 0x332   :  { %v10192_v37 = vld [vmem:[#allocation4 + $0x1914] ss:$8 sps:$4 sm:$0xff]   ;;  %v452_v41 = vpack.c.bf16 %v341_v54, %v341_v54  ;;  %v10187_v2 = vld [vmem:[#allocation4 + $0x1810] ss:$8 sps:$4 sm:$0xff]   ;;  %v10196_v6 = vld [vmem:[#allocation4 + $0x1920] ss:$8 sps:$4 sm:$0xff]  }
 0x333   :  { %6363 = vmatpush1.bf16.msra.mxu0 %v10120_v3  ;;  %v10833_v1 = vpack.c.bf16 %v342_v55, %v342_v55  ;;  %v10190_v42 = vld [vmem:[#allocation4 + $0x1910] ss:$8 sps:$4 sm:$0xff]   ;;  %v10198_v3 = vld [vmem:[#allocation4 + $0x1924] ss:$8 sps:$4 sm:$0xff]   ;;  %v10201_v36 = vld [vmem:[#allocation4 + $0x1834] ss:$8 sps:$4 sm:$0xff]  }
 0x334   :  { %6404 = vmatpush1.bf16.msra.mxu1 %v10123_v4  ;;  %6364 = vmatprep.subr.bf16.mxu0 %v10128_v15  ;;  %v10193_v4 = vld [vmem:[#allocation4 + $0x1820] ss:$8 sps:$4 sm:$0xff]   ;;  %v10204_v15 = vld [vmem:[#allocation4 + $0x1934] ss:$8 sps:$4 sm:$0xff]  }
 0x335   :  { %6405 = vmatprep.subr.bf16.mxu1 %v10131_v8  ;;  %v10199_v8 = vld [vmem:[#allocation4 + $0x1830] ss:$8 sps:$4 sm:$0xff]  }
 0x337   :  { %6365 = vmatpush1.bf16.msra.mxu0 %v10126_v34  ;;  %v10202_v34 = vld [vmem:[#allocation4 + $0x1930] ss:$8 sps:$4 sm:$0xff]  }
 0x338   :  { %6406 = vmatpush1.bf16.msra.mxu1 %v10129_v56  ;;  %6366 = vmatprep.subr.bf16.mxu0 %v10134_v10  ;;  %v10207_v56 = vld [vmem:[#allocation4 + $0x1844] ss:$8 sps:$4 sm:$0xff]  }
 0x339   :  { %6407 = vmatprep.subr.bf16.mxu1 %v10137_v19  ;;  %v10210_v10 = vld [vmem:[#allocation4 + $0x1944] ss:$8 sps:$4 sm:$0xff]   ;;  %v10205_v19 = vld [vmem:[#allocation4 + $0x1840] ss:$8 sps:$4 sm:$0xff]  }
 0x33b   :  { %6367 = vmatpush1.bf16.msra.mxu0 %v10132_v38  ;;  %v10208_v38 = vld [vmem:[#allocation4 + $0x1940] ss:$8 sps:$4 sm:$0xff]  }
 0x33c   :  { %6408 = vmatpush1.bf16.msra.mxu1 %v10135_v63  ;;  %6368 = vmatprep.subr.bf16.mxu0 %v10140_v12  ;;  %v10213_v63 = vld [vmem:[#allocation4 + $0x1854] ss:$8 sps:$4 sm:$0xff]  }
 0x33d   :  { %6409 = vmatprep.subr.bf16.mxu1 %v10143_v23  ;;  %v10216_v12 = vld [vmem:[#allocation4 + $0x1954] ss:$8 sps:$4 sm:$0xff]   ;;  %v10211_v23 = vld [vmem:[#allocation4 + $0x1850] ss:$8 sps:$4 sm:$0xff]  }
 0x33f   :  { %6369 = vmatpush1.bf16.msra.mxu0 %v10138_v48  ;;  %v10214_v48 = vld [vmem:[#allocation4 + $0x1950] ss:$8 sps:$4 sm:$0xff]  }
 0x340   :  { %6410 = vmatpush1.bf16.msra.mxu1 %v10141_v45  ;;  %6370 = vmatprep.subr.bf16.mxu0 %v10146_v40  ;;  %v10219_v45 = vld [vmem:[#allocation4 + $0x1864] ss:$8 sps:$4 sm:$0xff]  }
 0x341   :  { %6411 = vmatprep.subr.bf16.mxu1 %v10149_v17  ;;  %v10222_v40 = vld [vmem:[#allocation4 + $0x1964] ss:$8 sps:$4 sm:$0xff]  }
 0x343   :  { %6371 = vmatpush1.bf16.msra.mxu0 %v10144_v20 }
 0x344   :  { %6412 = vmatpush1.bf16.msra.mxu1 %v10147_v21  ;;  %6372 = vmatprep.subr.bf16.mxu0 %v10152_v24  ;;  %v10837_v21 = vsub.s32 0, %v10610_v43 }
 0x345   :  { %6413 = vmatprep.subr.bf16.mxu1 %v10155_v25 }
 0x347   :  { %6373 = vmatpush1.bf16.msra.mxu0 %v10150_v26 }
 0x348   :  { %6414 = vmatpush1.bf16.msra.mxu1 %v10153_v27  ;;  %6374 = vmatprep.subr.bf16.mxu0 %v10158_v28 }
 0x349   :  { %6415 = vmatprep.subr.bf16.mxu1 %v10161_v29 }
 0x34b   :  { %6375 = vmatpush1.bf16.msra.mxu0 %v10156_v30  ;;  %v10217_v30 = vld [vmem:[#allocation4 + $0x1860] ss:$8 sps:$4 sm:$0xff]  }
 0x34c   :  { %6416 = vmatpush1.bf16.msra.mxu1 %v10159_v31  ;;  %6376 = vmatprep.subr.bf16.mxu0 %v10164_v32  ;;  %v10220_v31 = vld [vmem:[#allocation4 + $0x1960] ss:$8 sps:$4 sm:$0xff]  }
 0x34d   :  { %6417 = vmatprep.subr.bf16.mxu1 %v10167_v33 }
 0x34f   :  { %6377 = vmatpush1.bf16.msra.mxu0 %v10162_v50  ;;  %v10225_v50 = vld [vmem:[#allocation4 + $0x1874] ss:$8 sps:$4 sm:$0xff]  }
 0x350   :  { %6418 = vmatpush1.bf16.msra.mxu1 %v10165_v35  ;;  %6378 = vmatprep.subr.bf16.mxu0 %v10170_v52  ;;  %v10228_v35 = vld [vmem:[#allocation4 + $0x1974] ss:$8 sps:$4 sm:$0xff]  }
 0x351   :  { %6419 = vmatprep.subr.bf16.mxu1 %v10173_v53  ;;  %v7239_v53 = vld [vmem:[#allocation9 + $0x8] sm:$0x11] }
 0x353   :  { %6379 = vmatpush1.bf16.msra.mxu0 %v10168_v7  ;;  %v7244_v7 = vrot.slane %v7239_v53, %v10837_v21 }
 0x354   :  { %6420 = vmatpush1.bf16.msra.mxu1 %v10171_v22  ;;  %6380 = vmatprep.subr.bf16.mxu0 %v10176_v44  ;;  %v10223_v22 = vld [vmem:[#allocation4 + $0x1870] ss:$8 sps:$4 sm:$0xff]  }
 0x355   :  { %6421 = vmatprep.subr.bf16.mxu1 %v10179_v57  ;;  %v10226_v44 = vld [vmem:[#allocation4 + $0x1970] ss:$8 sps:$4 sm:$0xff]  }
 0x357   :  { %6381 = vmatpush1.bf16.msra.mxu0 %v10174_v13 }
 0x358   :  { %6422 = vmatpush1.bf16.msra.mxu1 %v10177_v0  ;;  %6432 = vmatprep.subr.bf16.mxu0 %v10183_v46  ;;  %v10231_v0 = vld [vmem:[#allocation4 + $0x1884] ss:$8 sps:$4 sm:$0xff]  }
 0x359   :  { %6473 = vmatprep.subr.bf16.mxu1 %v10186_v51  ;;  %v10234_v46 = vld [vmem:[#allocation4 + $0x1984] ss:$8 sps:$4 sm:$0xff]   ;;  %v7254_v51 = vrot.slane %v7244_v7, %v10837_v21 }
 0x35a   :  { %6383 = vmatmul.mubr.bf16.vlgmr.msra.gmra.mrb[44].mxu0 %v447_v58  ;;  %v10229_v58 = vld [vmem:[#allocation4 + $0x1880] ss:$8 sps:$4 sm:$0xff]  }
 0x35b   :  { %6424 = vmatmul.mubr.bf16.vlgmr.msra.gmra.mrb[44].mxu1 %v449_v49  ;;  %6433 = vmatpush1.bf16.msra.mxu0 %v10181_v59  ;;  %v10232_v49 = vld [vmem:[#allocation4 + $0x1980] ss:$8 sps:$4 sm:$0xff]   ;;  %v10237_v59 = vld [vmem:[#allocation4 + $0x1894] ss:$8 sps:$4 sm:$0xff]  }
 0x35c   :  { %6474 = vmatpush1.bf16.msra.mxu1 %v10184_v60  ;;  %6434 = vmatprep.subr.bf16.mxu0 %v10189_v61  ;;  %v10240_v60 = vld [vmem:[#allocation4 + $0x1994] ss:$8 sps:$4 sm:$0xff]   ;;  %v10235_v61 = vld [vmem:[#allocation4 + $0x1890] ss:$8 sps:$4 sm:$0xff]  }
 0x35d   :  { %6475 = vmatprep.subr.bf16.mxu1 %v10192_v37  ;;  %6464 = vmatprep.mubr.bf16.mxu0 %v452_v41  ;;  %v10238_v37 = vld [vmem:[#allocation4 + $0x1990] ss:$8 sps:$4 sm:$0xff]   ;;  %v10243_v41 = vld [vmem:[#allocation4 + $0x18a4] ss:$8 sps:$4 sm:$0xff]  }
 0x35e   :  { %6505 = vmatprep.mubr.bf16.mxu1 %v10833_v1  ;;  %7261 = vrot.lane.b32.xlu0 %v7254_v51, %s10493_s7 }
 0x35f   :  { %6435 = vmatpush1.bf16.msra.mxu0 %v10187_v2  ;;  %v10246_v2 = vld [vmem:[#allocation4 + $0x19a4] ss:$8 sps:$4 sm:$0xff]  }
 0x360   :  { %6476 = vmatpush1.bf16.msra.mxu1 %v10190_v42  ;;  %6436 = vmatprep.subr.bf16.mxu0 %v10195_v14  ;;  %v10241_v42 = vld [vmem:[#allocation4 + $0x18a0] ss:$8 sps:$4 sm:$0xff]  }
 0x361   :  { %6477 = vmatprep.subr.bf16.mxu1 %v10198_v3  ;;  %v10244_v14 = vld [vmem:[#allocation4 + $0x19a0] ss:$8 sps:$4 sm:$0xff]   ;;  %v10249_v3 = vld [vmem:[#allocation4 + $0x18b4] ss:$8 sps:$4 sm:$0xff]  }
 0x363   :  { %6437 = vmatpush1.bf16.msra.mxu0 %v10193_v4  ;;  %v10252_v4 = vld [vmem:[#allocation4 + $0x19b4] ss:$8 sps:$4 sm:$0xff]  }
 0x364   :  { %6478 = vmatpush1.bf16.msra.mxu1 %v10196_v6  ;;  %6438 = vmatprep.subr.bf16.mxu0 %v10201_v36  ;;  %v10247_v6 = vld [vmem:[#allocation4 + $0x18b0] ss:$8 sps:$4 sm:$0xff]  }
 0x365   :  { %6479 = vmatprep.subr.bf16.mxu1 %v10204_v15  ;;  %v10250_v36 = vld [vmem:[#allocation4 + $0x19b0] ss:$8 sps:$4 sm:$0xff]   ;;  %v10255_v15 = vld [vmem:[#allocation4 + $0x18c4] ss:$8 sps:$4 sm:$0xff]  }
 0x367   :  { %6439 = vmatpush1.bf16.msra.mxu0 %v10199_v8  ;;  %v10258_v8 = vld [vmem:[#allocation4 + $0x19c4] ss:$8 sps:$4 sm:$0xff]  }
 0x368   :  { %6480 = vmatpush1.bf16.msra.mxu1 %v10202_v34  ;;  %6440 = vmatprep.subr.bf16.mxu0 %v10207_v56  ;;  %v10253_v34 = vld [vmem:[#allocation4 + $0x18c0] ss:$8 sps:$4 sm:$0xff]  }
 0x369   :  { %6481 = vmatprep.subr.bf16.mxu1 %v10210_v10  ;;  %v10256_v56 = vld [vmem:[#allocation4 + $0x19c0] ss:$8 sps:$4 sm:$0xff]   ;;  %v10261_v10 = vld [vmem:[#allocation4 + $0x18d4] ss:$8 sps:$4 sm:$0xff]  }
 0x36b   :  { %6441 = vmatpush1.bf16.msra.mxu0 %v10205_v19  ;;  %v10264_v19 = vld [vmem:[#allocation4 + $0x19d4] ss:$8 sps:$4 sm:$0xff]  }
 0x36c   :  { %6482 = vmatpush1.bf16.msra.mxu1 %v10208_v38  ;;  %6442 = vmatprep.subr.bf16.mxu0 %v10213_v63  ;;  %v10259_v38 = vld [vmem:[#allocation4 + $0x18d0] ss:$8 sps:$4 sm:$0xff]  }
 0x36d   :  { %6483 = vmatprep.subr.bf16.mxu1 %v10216_v12  ;;  %v6138_v17 = vpop.f32.mrb[32].mxu0  ;;  %v10262_v63 = vld [vmem:[#allocation4 + $0x19d0] ss:$8 sps:$4 sm:$0xff]   ;;  %v10267_v12 = vld [vmem:[#allocation4 + $0x18e4] ss:$8 sps:$4 sm:$0xff]  }
 0x36e   :  { %v6179_v20 = vpop.f32.mrb[32].mxu1  ;;  %v6139_v24 = vadd.f32 %v6138_v17, %v10815_v5  ;;  %v6140_v25 = vpop.f32.mrb[33].mxu0  ;;  %v10846_v5 = vsub.s32 4, %v10610_v43  ;;  %v10276_v17 = vld [vmem:[#allocation4 + $0x19f4] ss:$8 sps:$4 sm:$0xff]  }
 0x36f   :  { %v6181_v26 = vpop.f32.mrb[33].mxu1  ;;  %v6141_v27 = vadd.f32 %v6140_v25, %v10817_v18  ;;  %v6142_v28 = vpop.f32.mrb[34].mxu0  ;;  %6443 = vmatpush1.bf16.msra.mxu0 %v10211_v23  ;;  %v7136_v18 = vld [vmem:[#allocation9 + $0x4] sm:$0x11]  ;;  %v451_v25 = vpack.c.bf16 %v10820_v9, %v10820_v9 }
 0x370   :  { %v6183_v29 = vpop.f32.mrb[34].mxu1  ;;  %6484 = vmatpush1.bf16.msra.mxu1 %v10214_v48  ;;  %v10841_v32 = vadd.f32 %v6179_v20, %v6139_v24  ;;  %v6143_v33 = vpop.f32.mrb[35].mxu0  ;;  %6444 = vmatprep.subr.bf16.mxu0 %v10219_v45  ;;  %v7141_v39 = vrot.slane %v7136_v18, %v10837_v21  ;;  %v7145_v57 = vrot.slane %v7136_v18, %v10846_v5  ;;  %v10270_v23 = vld [vmem:[#allocation4 + $0x19e4] ss:$8 sps:$4 sm:$0xff]   ;;  %v10265_v48 = vld [vmem:[#allocation4 + $0x18e0] ss:$8 sps:$4 sm:$0xff]  }
 0x371   :  { %v6184_v11 = vpop.f32.mrb[35].mxu1  ;;  %6485 = vmatprep.subr.bf16.mxu1 %v10222_v40  ;;  %v10843_v52 = vadd.f32 %v6181_v26, %v6141_v27  ;;  %v7248_v13 = vrot.slane %v7239_v53, %v10846_v5  ;;  %v10268_v45 = vld [vmem:[#allocation4 + $0x19e0] ss:$8 sps:$4 sm:$0xff]   ;;  %v10273_v40 = vld [vmem:[#allocation4 + $0x18f4] ss:$8 sps:$4 sm:$0xff]   ;;  %v453_v26 = vpack.c.bf16 %v10823_v47, %v10823_v47  ;;  %v10494_v28 = vmov 0.0  }
 0x372   :  { %v7151_v43 = vrot.slane %v7141_v39, %v10837_v21  ;;  %v7155_v54 = vrot.slane %v7145_v57, %v10837_v21  ;;  %v10271_v20 = vld [vmem:[#allocation4 + $0x18f0] ss:$8 sps:$4 sm:$0xff]   ;;  %v10279_v29 = vld [vmem:[%s11260_s2 + $0x8] sm:$0xff]   ;;  %v10280_v9 = vld [vmem:[%s11260_s2 + $0x10] sm:$0xff]  }
 0x373   :  { %6445 = vmatpush1.bf16.msra.mxu0 %v10217_v30  ;;  %v7258_v55 = vrot.slane %v7248_v13, %v10837_v21  ;;  %v10274_v24 = vld [vmem:[#allocation4 + $0x19f0] ss:$8 sps:$4 sm:$0xff]  }
 0x374   :  { %6486 = vmatpush1.bf16.msra.mxu1 %v10220_v31  ;;  %6446 = vmatprep.subr.bf16.mxu0 %v10225_v50  ;;  %v10278_v27 = vld [vmem:[%s11260_s2] sm:$0xff]   ;;  %v10281_v47 = vld [vmem:[%s11260_s2 + $0x18] sm:$0xff]   ;;  %v10283_v31 = vld [vmem:[%s11260_s2 + $0x28] sm:$0xff]  }
 0x375   :  { %6487 = vmatprep.subr.bf16.mxu1 %v10228_v35  ;;  %7158 = vrot.lane.b32.xlu1 %v7151_v43, %s10493_s7  ;;  %v10282_v30 = vld [vmem:[%s11260_s2 + $0x20] sm:$0xff]  }
 0x376   :  { %7263 = vrot.lane.b32.xlu0 %v7258_v55, %s10493_s7 }
 0x377   :  { %6447 = vmatpush1.bf16.msra.mxu0 %v10223_v22  ;;  %v10284_v22 = vld [vmem:[%s11260_s2 + $0x30] sm:$0xff]  }
 0x378   :  { %6488 = vmatpush1.bf16.msra.mxu1 %v10226_v44  ;;  %6448 = vmatprep.subr.bf16.mxu0 %v10231_v0 }
 0x379   :  { %6489 = vmatprep.subr.bf16.mxu1 %v10234_v46  ;;  %7160 = vrot.lane.b32.xlu1 %v7155_v54, %s10493_s7 }
 0x37b   :  { %6449 = vmatpush1.bf16.msra.mxu0 %v10229_v58 }
 0x37c   :  { %6490 = vmatpush1.bf16.msra.mxu1 %v10232_v49  ;;  %6450 = vmatprep.subr.bf16.mxu0 %v10237_v59 }
 0x37d   :  { %6491 = vmatprep.subr.bf16.mxu1 %v10240_v60 }
 0x37f   :  { %6451 = vmatpush1.bf16.msra.mxu0 %v10235_v61 }
 0x380   :  { %6492 = vmatpush1.bf16.msra.mxu1 %v10238_v37  ;;  %6452 = vmatprep.subr.bf16.mxu0 %v10243_v41  ;;  %v10496_v41 = vmov 0  }
 0x381   :  { %6493 = vmatprep.subr.bf16.mxu1 %v10246_v2  ;;  %v10286_v2 = vld [vmem:[#allocation7] sm:$0xff]  }
 0x383   :  { %6453 = vmatpush1.bf16.msra.mxu0 %v10241_v42  ;;  %v10288_v42 = vld [vmem:[#allocation7 + $0x10] sm:$0xff]  }
 0x384   :  { %6494 = vmatpush1.bf16.msra.mxu1 %v10244_v14  ;;  %6454 = vmatprep.subr.bf16.mxu0 %v10249_v3  ;;  %v10289_v14 = vld [vmem:[#allocation7 + $0x18] sm:$0xff]   ;;  %v10290_v3 = vld [vmem:[#allocation7 + $0x20] sm:$0xff]  }
 0x385   :  { %6495 = vmatprep.subr.bf16.mxu1 %v10252_v4  ;;  %v10291_v4 = vld [vmem:[#allocation6 + $0x40] sm:$0xff]  }
 0x387   :  { %6455 = vmatpush1.bf16.msra.mxu0 %v10247_v6  ;;  %v10292_v6 = vld [vmem:[#allocation6] sm:$0xff]  }
 0x388   :  { %6496 = vmatpush1.bf16.msra.mxu1 %v10250_v36  ;;  %6456 = vmatprep.subr.bf16.mxu0 %v10255_v15  ;;  %v10294_v36 = vld [vmem:[#allocation6 + $0x48] sm:$0xff]  }
 0x389   :  { %6497 = vmatprep.subr.bf16.mxu1 %v10258_v8  ;;  %v10293_v15 = vld [vmem:[#allocation7 + $0x28] sm:$0xff]  }
 0x38a   :  { %v10295_v8 = vld [vmem:[#allocation6 + $0x8] sm:$0xff]  }
 0x38b   :  { %6457 = vmatpush1.bf16.msra.mxu0 %v10253_v34  ;;  %v10297_v34 = vld [vmem:[#allocation6 + $0x50] sm:$0xff]  }
 0x38c   :  { %6498 = vmatpush1.bf16.msra.mxu1 %v10256_v56  ;;  %6458 = vmatprep.subr.bf16.mxu0 %v10261_v10  ;;  %v10296_v56 = vld [vmem:[#allocation7 + $0x30] sm:$0xff]  }
 0x38d   :  { %6499 = vmatprep.subr.bf16.mxu1 %v10264_v19  ;;  %v10298_v10 = vld [vmem:[#allocation6 + $0x10] sm:$0xff]   ;;  %v10300_v19 = vld [vmem:[#allocation6 + $0x58] sm:$0xff]  }
 0x38f   :  { %6459 = vmatpush1.bf16.msra.mxu0 %v10259_v38  ;;  %v7935_v38 = vld.sshfl [vmem:[#allocation2 + $0x68] sm:$0x3 pattern:$0x76325410] }
 0x390   :  { %6500 = vmatpush1.bf16.msra.mxu1 %v10262_v63  ;;  %6460 = vmatprep.subr.bf16.mxu0 %v10267_v12  ;;  %v455_v63 = vpack.c.bf16 %v7935_v38, %v7935_v38  ;;  %v10299_v12 = vld [vmem:[#allocation7 + $0x38] sm:$0xff]  }
 0x391   :  { %6501 = vmatprep.subr.bf16.mxu1 %v10270_v23  ;;  %v10301_v23 = vld [vmem:[#allocation6 + $0x18] sm:$0xff]  }
 0x393   :  { %6461 = vmatpush1.bf16.msra.mxu0 %v10265_v48  ;;  %v10303_v48 = vld [vmem:[#allocation6 + $0x60] sm:$0xff]  }
 0x394   :  { %6502 = vmatpush1.bf16.msra.mxu1 %v10268_v45  ;;  %6462 = vmatprep.subr.bf16.mxu0 %v10273_v40  ;;  %v10302_v45 = vld [vmem:[#allocation7 + $0x40] sm:$0xff]  }
 0x395   :  { %6503 = vmatprep.subr.bf16.mxu1 %v10276_v17 }
 0x397   :  { %6463 = vmatpush1.bf16.msra.mxu0 %v10271_v20  ;;  %v10304_v20 = vld [vmem:[#allocation6 + $0x20] sm:$0xff]  }
 0x398   :  { %6504 = vmatpush1.bf16.msra.mxu1 %v10274_v24  ;;  %8911 = vmatprep.subr.bf16.mxu0 %v10494_v28 }
 0x399   :  { %6761 = vmatprep.subr.bf16.mxu1 %v10496_v41 }
 0x39a   :  { %6465 = vmatmul.mubr.bf16.vlgmr.msra.gmra.mrb[48].mxu0 %v451_v25 }
 0x39b   :  { %6506 = vmatmul.mubr.bf16.vlgmr.msra.gmra.mrb[48].mxu1 %v453_v26  ;;  %8912 = vmatpush3.bf16.msra.mxu0 %v10278_v27  ;;  %v10306_v27 = vld [vmem:[#allocation6 + $0x68] sm:$0xff]  }
 0x39c   :  { %8927 = vmatprep.mubr.msk.bf16.mxu0 %vm10495_vm0, %v10494_v28  ;;  %8913 = vmatprep.subr.bf16.mxu0 %v10494_v28 }
 0x39d   :  { %6762 = vmatpush1.bf16.msra.mxu1 %v10286_v2  ;;  %8789 = vmatprep.mubr.msk.bf16.mxu1 %vm6753_vm1, %v455_v63 }
 0x39e   :  { %6763 = vmatprep.subr.bf16.mxu1 %v10496_v41 }
 0x39f   :  { %8914 = vmatpush3.bf16.msra.mxu0 %v10279_v29 }
 0x3a0   :  { %8915 = vmatprep.subr.bf16.mxu0 %v10494_v28 }
 0x3a3   :  { %8916 = vmatpush3.bf16.msra.mxu0 %v10280_v9 }
 0x3a4   :  { %8917 = vmatprep.subr.bf16.mxu0 %v10494_v28 }
 0x3a7   :  { %8918 = vmatpush3.bf16.msra.mxu0 %v10281_v47 }
 0x3a8   :  { %8919 = vmatprep.subr.bf16.mxu0 %v10494_v28 }
 0x3ab   :  { %8920 = vmatpush3.bf16.msra.mxu0 %v10282_v30 }
 0x3ac   :  { %8921 = vmatprep.subr.bf16.mxu0 %v10494_v28 }
 0x3ad   :  { %v6220_v33 = vpop.f32.mrb[36].mxu0 }
 0x3ae   :  { %v6261_v11 = vpop.f32.mrb[36].mxu1  ;;  %v6221_v50 = vadd.f32 %v6220_v33, %v10841_v32  ;;  %v6222_v35 = vpop.f32.mrb[37].mxu0  ;;  %v10285_v32 = vld [vmem:[%s11260_s2 + $0x38] sm:$0xff]   ;;  %s10497_s2 = smov 120  }
 0x3af   :  { %v6263_v18 = vpop.f32.mrb[37].mxu1  ;;  %v6223_v53 = vadd.f32 %v6222_v35, %v10843_v52  ;;  %v6224_v39 = vpop.f32.mrb[38].mxu0  ;;  %8922 = vmatpush3.bf16.msra.mxu0 %v10283_v31  ;;  %v10307_v35 = vld [vmem:[#allocation6 + $0x28] sm:$0xff]  }
 0x3b0   :  { %v6265_v7 = vpop.f32.mrb[38].mxu1  ;;  %v6262_v44 = vadd.f32 %v6261_v11, %v6221_v50  ;;  %v6225_v57 = vpop.f32.mrb[39].mxu0  ;;  %8923 = vmatprep.subr.bf16.mxu0 %v10494_v28  ;;  %v10305_v11 = vld [vmem:[#allocation7 + $0x48] sm:$0xff]   ;;  %v10310_v39 = vld [vmem:[#allocation6 + $0x30] sm:$0xff]  }
 0x3b1   :  { %v6266_v13 = vpop.f32.mrb[39].mxu1  ;;  %v6264_v0 = vadd.f32 %v6263_v18, %v6223_v53  ;;  %v10309_v18 = vld [vmem:[#allocation6 + $0x70] sm:$0xff]   ;;  %v10312_v7 = vld [vmem:[#allocation6 + $0x78] sm:$0xff]   ;;  %v10314_v57 = vld [vmem:[#allocation7 + $0x60] sm:$0x1f]  }
 0x3b2   :  { %v10308_v53 = vld [vmem:[#allocation7 + $0x50] sm:$0xff]   ;;  %v6759_v13 = vsel %vm6757_vm2, %v10314_v57, 0 }
 0x3b3   :  { %8924 = vmatpush3.bf16.msra.mxu0 %v10284_v22  ;;  %v10311_v22 = vld [vmem:[#allocation7 + $0x58] sm:$0xff]  }
 0x3b4   :  { %8925 = vmatprep.subr.bf16.mxu0 %v10494_v28 }
 0x3b7   :  { %8926 = vmatpush3.bf16.msra.mxu0 %v10285_v32 }
 0x3b8   :  { %8859 = vmatprep.subr.bf16.mxu0 %v10291_v4  ;;  %v7281_v4 = vld [vmem:[#allocation9 + $0x9] sm:$0x11] }
 0x3ba   :  { %8928 = vmatmul.mubr.bf16.vlgmr.msra.gmra.mrb[52].mxu0 %v10620_v16 }
 0x3bb   :  { %6929 = vmatprep.mubr.bf16.mxu0 %v10617_v62  ;;  %v10287_v62 = vld [vmem:[#allocation7 + $0x8] sm:$0xff]   ;;  %8860 = vmatpush3.bf16.msra.mxu0 %v10292_v6  ;;  %v7286_v6 = vrot.slane %v7281_v4, %v10837_v21 }
 0x3bc   :  { %6764 = vmatpush1.bf16.msra.mxu1 %v10287_v62  ;;  %8861 = vmatprep.subr.bf16.mxu0 %v10294_v36  ;;  %v7180_v36 = vld [vmem:[#allocation9 + $0x5] sm:$0x11] }
 0x3bd   :  { %6765 = vmatprep.subr.bf16.mxu1 %v10496_v41 }
 0x3bf   :  { %8862 = vmatpush3.bf16.msra.mxu0 %v10295_v8  ;;  %v7185_v8 = vrot.slane %v7180_v36, %v10837_v21 }
 0x3c0   :  { %6766 = vmatpush1.bf16.msra.mxu1 %v10288_v42  ;;  %8863 = vmatprep.subr.bf16.mxu0 %v10297_v34  ;;  %v7290_v34 = vrot.slane %v7281_v4, %v10846_v5 }
 0x3c1   :  { %6767 = vmatprep.subr.bf16.mxu1 %v10496_v41 }
 0x3c2   :  { %v7300_v38 = vrot.slane %v7290_v34, %v10837_v21  ;;  %v11019_v34 = vld [vmem:[#allocation9 + $0xc] sm:$0x11] }
 0x3c3   :  { %8864 = vmatpush3.bf16.msra.mxu0 %v10298_v10  ;;  %v7189_v10 = vrot.slane %v7180_v36, %v10846_v5  ;;  %v10321_v36 = vld [vmem:[%s11263_s5 + $0x50] sm:$0xff]  }
 0x3c4   :  { %6768 = vmatpush1.bf16.msra.mxu1 %v10289_v14  ;;  %8865 = vmatprep.subr.bf16.mxu0 %v10300_v19  ;;  %v7310_v19 = vld [vmem:[#allocation9 + $0xa] sm:$0x11] }
 0x3c5   :  { %6769 = vmatprep.subr.bf16.mxu1 %v10496_v41  ;;  %v7199_v63 = vrot.slane %v7189_v10, %v10837_v21  ;;  %v10322_v10 = vld [vmem:[%s11263_s5 + $0x20] sm:$0xff]  }
 0x3c7   :  { %8866 = vmatpush3.bf16.msra.mxu0 %v10301_v23  ;;  %v10938_v23 = vld [vmem:[#allocation9 + $0x6] sm:$0x11] }
 0x3c8   :  { %6770 = vmatpush1.bf16.msra.mxu1 %v10290_v3  ;;  %8867 = vmatprep.subr.bf16.mxu0 %v10303_v48 }
 0x3c9   :  { %6771 = vmatprep.subr.bf16.mxu1 %v10496_v41 }
 0x3cb   :  { %8868 = vmatpush3.bf16.msra.mxu0 %v10304_v20  ;;  %v10945_v20 = vld [vmem:[#allocation9] sm:$0x11] }
 0x3cc   :  { %6772 = vmatpush1.bf16.msra.mxu1 %v10293_v15  ;;  %8869 = vmatprep.subr.bf16.mxu0 %v10306_v27  ;;  %v7296_v15 = vrot.slane %v7286_v6, %v10837_v21  ;;  %v7035_v27 = vrot.slane %v10945_v20, %v10846_v5  ;;  %v10320_v6 = vld [vmem:[%s11263_s5 + $0x18] sm:$0xff]  }
 0x3cd   :  { %6773 = vmatprep.subr.bf16.mxu1 %v10496_v41 }
 0x3cf   :  { %8870 = vmatpush3.bf16.msra.mxu0 %v10307_v35 }
 0x3d0   :  { %6774 = vmatpush1.bf16.msra.mxu1 %v10296_v56  ;;  %8871 = vmatprep.subr.bf16.mxu0 %v10309_v18  ;;  %v7262_v32 = vpop.permute.xlu0 %7261  ;;  %v7195_v56 = vrot.slane %v7185_v8, %v10837_v21 }
 0x3d1   :  { %6775 = vmatprep.subr.bf16.mxu1 %v10496_v41 }
 0x3d3   :  { %8872 = vmatpush3.bf16.msra.mxu0 %v10310_v39 }
 0x3d4   :  { %6776 = vmatpush1.bf16.msra.mxu1 %v10299_v12  ;;  %8873 = vmatprep.subr.bf16.mxu0 %v10312_v7  ;;  %v7319_v12 = vrot.slane %v7310_v19, %v10846_v5 }
 0x3d5   :  { %6777 = vmatprep.subr.bf16.mxu1 %v10496_v41 }
 0x3d8   :  { %6778 = vmatpush1.bf16.msra.mxu1 %v10302_v45  ;;  %v7329_v45 = vrot.slane %v7319_v12, %v10837_v21  ;;  %v10324_v12 = vld [vmem:[%s11263_s5 + $0x28] sm:$0xff]  }
 0x3d9   :  { %6779 = vmatprep.subr.bf16.mxu1 %v10496_v41 }
 0x3dc   :  { %6780 = vmatpush1.bf16.msra.mxu1 %v10305_v11 }
 0x3dd   :  { %6781 = vmatprep.subr.bf16.mxu1 %v10496_v41 }
 0x3e0   :  { %6782 = vmatpush1.bf16.msra.mxu1 %v10308_v53 }
 0x3e1   :  { %6783 = vmatprep.subr.bf16.mxu1 %v10496_v41 }
 0x3e4   :  { %6784 = vmatpush1.bf16.msra.mxu1 %v10311_v22 }
 0x3e5   :  { %6785 = vmatprep.subr.bf16.mxu1 %v10496_v41 }
 0x3e8   :  { %6786 = vmatpush1.bf16.msra.mxu1 %v6759_v13 }
 0x3e9   :  { %8931 = vmatprep.subr.bf16.mxu1 %v10494_v28 }
 0x3eb   :  { %6794 = vmatmul.mubr.bf16.vlgmr.msra.gmra.mrb[52].mxu1 %v10833_v1 }
 0x3ec   :  { %8947 = vmatprep.mubr.msk.bf16.mxu1 %vm10495_vm0, %v10494_v28 }
 0x3ed   :  { %v6302_v52 = vpop.f32.mrb[40].mxu0 }
 0x3ee   :  { %v6343_v46 = vpop.f32.mrb[40].mxu1  ;;  %v6303_v43 = vadd.f32 %v6302_v52, %v6262_v44  ;;  %v6304_v51 = vpop.f32.mrb[41].mxu0  ;;  %v10313_v44 = vld [vmem:[#allocation6 + $0x38] sm:$0xff]  }
 0x3ef   :  { %v6345_v54 = vpop.f32.mrb[41].mxu1  ;;  %v6305_v55 = vadd.f32 %v6304_v51, %v6264_v0  ;;  %v6306_v58 = vpop.f32.mrb[42].mxu0  ;;  %8874 = vmatpush3.bf16.msra.mxu0 %v10313_v44 }
 0x3f0   :  { %v6347_v49 = vpop.f32.mrb[42].mxu1  ;;  %v6344_v59 = vadd.f32 %v6343_v46, %v6303_v43  ;;  %v6307_v60 = vpop.f32.mrb[43].mxu0  ;;  %8951 = vmatprep.subr.bf16.mxu0 %v10494_v28 }
 0x3f1   :  { %v6348_v61 = vpop.f32.mrb[43].mxu1  ;;  %v6346_v37 = vadd.f32 %v6345_v54, %v6305_v55  ;;  %v7159_v0 = vpop.permute.xlu1 %7158 }
 0x3f2   :  { %6930 = vmatmul.mubr.bf16.vlgmr.msra.gmra.mrb[56].mxu0 %v10620_v16  ;;  %v7264_v46 = vpop.permute.xlu0 %7263 }
 0x3f3   :  { %8967 = vmatprep.mubr.msk.bf16.mxu0 %vm10495_vm0, %v10494_v28  ;;  %v7265_v61 = vsel %vm7052_vm3, %v7262_v32, %v7264_v46 }
 0x3f5   :  { %v7161_v52 = vpop.permute.xlu1 %7160 }
 0x3f6   :  { %v7162_v41 = vsel %vm7052_vm3, %v7159_v0, %v7161_v52  ;;  %v10315_v52 = vld [vmem:[%s11263_s5] sm:$0xff]  }
 0x3f7   :  { %8932 = vmatpush3.bf16.msra.mxu1 %v10315_v52 }
 0x3f8   :  { %8933 = vmatprep.subr.bf16.mxu1 %v10494_v28 }
 0x42d   :  { %v6384_v40 = vpop.f32.mrb[44].mxu0 }
 0x42e   :  { %v6425_v17 = vpop.f32.mrb[44].mxu1  ;;  %v6385_v24 = vadd.f32 %v6384_v40, %v6344_v59  ;;  %v6386_v25 = vpop.f32.mrb[45].mxu0  ;;  %v7218_v40 = vrot.slane %v10938_v23, %v10846_v5 }
 0x42f   :  { %v6427_v26 = vpop.f32.mrb[45].mxu1  ;;  %v6387_v29 = vadd.f32 %v6386_v25, %v6346_v37  ;;  %v6388_v9 = vpop.f32.mrb[46].mxu0 }
 0x430   :  { %v6429_v47 = vpop.f32.mrb[46].mxu1  ;;  %v6426_v30 = vadd.f32 %v6425_v17, %v6385_v24  ;;  %v6389_v31 = vpop.f32.mrb[47].mxu0  ;;  %v10953_v9 = vld [vmem:[#allocation9] ss:$0 sm:$0xff] }
 0x431   :  { %v6430_v33 = vpop.f32.mrb[47].mxu1  ;;  %v6428_v50 = vadd.f32 %v6427_v26, %v6387_v29  ;;  %v7228_v26 = vrot.slane %v7218_v40, %v10837_v21  ;;  %v7045_v29 = vrot.slane %v7035_v27, %v10837_v21  ;;  %v8809_v40 = vld [vmem:[#allocation9 + $0xc] ss:$0 sm:$0xff] }
 0x46d   :  { %v6466_v43 = vpop.f32.mrb[48].mxu0 }
 0x46e   :  { %v6507_v51 = vpop.f32.mrb[48].mxu1  ;;  %v6467_v54 = vadd.f32 %v6466_v43, %v6426_v30  ;;  %v6468_v55 = vpop.f32.mrb[49].mxu0  ;;  %v7315_v43 = vrot.slane %v7310_v19, %v10837_v21  ;;  %v10323_v19 = vld [vmem:[%s11263_s5 + $0x58] sm:$0xff]  }
 0x46f   :  { %v6509_v16 = vpop.f32.mrb[49].mxu1  ;;  %v6469_v58 = vadd.f32 %v6468_v55, %v6428_v50  ;;  %v6470_v49 = vpop.f32.mrb[50].mxu0 }
 0x470   :  { %v6511_v59 = vpop.f32.mrb[50].mxu1  ;;  %v6508_v60 = vadd.f32 %v6507_v51, %v6467_v54  ;;  %v6471_v1 = vpop.f32.mrb[51].mxu0  ;;  %v10316_v51 = vld [vmem:[%s11263_s5 + $0x8] sm:$0xff]   ;;  %v10317_v54 = vld [vmem:[%s11263_s5 + $0x40] sm:$0xff]   ;;  %v7214_v49 = vrot.slane %v10938_v23, %v10837_v21 }
 0x471   :  { %v6512_v37 = vpop.f32.mrb[51].mxu1  ;;  %v6510_v2 = vadd.f32 %v6509_v16, %v6469_v58  ;;  %8934 = vmatpush3.bf16.msra.mxu1 %v10316_v51  ;;  %8952 = vmatpush3.bf16.msra.mxu0 %v10317_v54  ;;  %v7325_v58 = vrot.slane %v7315_v43, %v10837_v21  ;;  %v10319_v1 = vld [vmem:[%s11263_s5 + $0x48] sm:$0xff]   ;;  %v10325_v23 = vld [vmem:[%s11263_s5 + $0x60] sm:$0xff]  }
 0x472   :  { %v7164_v62 = vadd.f32 %v7162_v41, %v6508_v60  ;;  %8935 = vmatprep.subr.bf16.mxu1 %v10494_v28  ;;  %8953 = vmatprep.subr.bf16.mxu0 %v10494_v28 }
 0x473   :  { %v7267_v42 = vadd.f32 %v7265_v61, %v6510_v2  ;;  %v10318_v61 = vld [vmem:[%s11263_s5 + $0x10] sm:$0xff]  }
 0x474   :  { %v7166_v14 = vsel %vm7165_vm4, %v7164_v62, 0.0 }
 0x475   :  { %7167 = vadd.xlane.f32.xlu1 %v7166_v14  ;;  %v7268_v3 = vsel %vm7165_vm4, %v7267_v42, 0.0  ;;  %8936 = vmatpush3.bf16.msra.mxu1 %v10318_v61 }
 0x476   :  { %7269 = vadd.xlane.f32.xlu0 %v7268_v3  ;;  %8954 = vmatpush3.bf16.msra.mxu0 %v10319_v1 }
 0x477   :  { %8937 = vmatprep.subr.bf16.mxu1 %v10494_v28  ;;  %8955 = vmatprep.subr.bf16.mxu0 %v10494_v28 }
 0x479   :  { %8938 = vmatpush3.bf16.msra.mxu1 %v10320_v6 }
 0x47a   :  { %8956 = vmatpush3.bf16.msra.mxu0 %v10321_v36  ;;  %8939 = vmatprep.subr.bf16.mxu1 %v10494_v28 }
 0x47b   :  { %8957 = vmatprep.subr.bf16.mxu0 %v10494_v28 }
 0x47d   :  { %8940 = vmatpush3.bf16.msra.mxu1 %v10322_v10 }
 0x47e   :  { %8958 = vmatpush3.bf16.msra.mxu0 %v10323_v19  ;;  %8941 = vmatprep.subr.bf16.mxu1 %v10494_v28 }
 0x47f   :  { %8959 = vmatprep.subr.bf16.mxu0 %v10494_v28 }
 0x481   :  { %8942 = vmatpush3.bf16.msra.mxu1 %v10324_v12 }
 0x482   :  { %8960 = vmatpush3.bf16.msra.mxu0 %v10325_v23  ;;  %8943 = vmatprep.subr.bf16.mxu1 %v10494_v28 }
 0x483   :  { %8961 = vmatprep.subr.bf16.mxu0 %v10494_v28 }
 0x486   :  { %7303 = vrot.lane.b32.xlu1 %v7296_v15, %s10493_s7 }
 0x48a   :  { %7202 = vrot.lane.b32.xlu1 %v7195_v56, %s10493_s7 }
 0x48c   :  { %7305 = vrot.lane.b32.xlu0 %v7300_v38, %s10493_s7  ;;  %v7511_v38 = vrot.slane %v11019_v34, %v10837_v21 }
 0x48d   :  { %v6612_v48 = vpop.f32.mrb[52].mxu0 }
 0x48e   :  { %7204 = vrot.lane.b32.xlu1 %v7199_v63, %s10493_s7  ;;  %v8929_v17 = vpop.f32.mrb[53].mxu0  ;;  %v10957_v47 = vadd.f32 %v10953_v9, %v6612_v48  ;;  %v7521_v63 = vrot.slane %v7511_v38, %v10837_v21  ;;  %v10326_v48 = vld [vmem:[%s11263_s5 + $0x30] sm:$0xff]  }
 0x48f   :  { %v6615_v24 = vpop.f32.mrb[54].mxu0  ;;  %8944 = vmatpush3.bf16.msra.mxu1 %v10326_v48  ;;  %v10328_v17 = vld [vmem:[%s11263_s5 + $0x38] sm:$0xff]  }
 0x490   :  { %v8930_v25 = vpop.f32.mrb[55].mxu0  ;;  %8945 = vmatprep.subr.bf16.mxu1 %v10494_v28  ;;  %v10330_v24 = vld [vmem:[%s11263_s5 + $0x78] sm:$0xff]  }
 0x492   :  { %7334 = vrot.lane.b32.xlu1 %v7329_v45, %s10493_s7  ;;  %v10327_v45 = vld [vmem:[%s11263_s5 + $0x68] sm:$0xff]  }
 0x493   :  { %8962 = vmatpush3.bf16.msra.mxu0 %v10327_v45  ;;  %8946 = vmatpush3.bf16.msra.mxu1 %v10328_v17 }
 0x494   :  { %8963 = vmatprep.subr.bf16.mxu0 %v10494_v28  ;;  %8971 = vmatprep.subr.bf16.mxu1 %v10494_v28 }
 0x496   :  { %7233 = vrot.lane.b32.xlu1 %v7228_v26, %s10493_s7 }
 0x49a   :  { %7050 = vrot.lane.b32.xlu1 %v7045_v29, %s10493_s7 }
 0x49e   :  { %6972 = vrot.lane.b32.xlu1 %v10957_v47, %s10497_s2 }
 0x4be   :  { %v6795_v41 = vpop.f32.mrb[52].mxu1 }
 0x4bf   :  { %v6797_v3 = vpop.f32.mrb[53].mxu1 }
 0x4c0   :  { %v6798_v4 = vpop.f32.mrb[54].mxu1 }
 0x4c1   :  { %v6799_v8 = vpop.f32.mrb[55].mxu1 }
 0x4c5   :  { %v8875_v59 = vpop.f32.mrb[56].mxu0 }
 0x4c6   :  { %v8876_v60 = vpop.f32.mrb[57].mxu0 }
 0x4c7   :  { %v8878_v37 = vpop.f32.mrb[58].mxu0  ;;  %v8877_v14 = vadd.f32 %v8876_v60, %v8875_v59 }
 0x4c8   :  { %v8879_v2 = vpop.f32.mrb[59].mxu0  ;;  %v7515_v37 = vrot.slane %v11019_v34, %v10846_v5 }
 0x4c9   :  { %v11017_v15 = vadd.f32 %v8877_v14, %v6795_v41  ;;  %v7077_v14 = vld [vmem:[#allocation9 + $0x1] sm:$0x11] }
 0x4ca   :  { %v7525_v41 = vrot.slane %v7515_v37, %v10837_v21  ;;  %v7082_v3 = vrot.slane %v7077_v14, %v10837_v21 }
 0x4cc   :  { %v7092_v4 = vrot.slane %v7082_v3, %v10837_v21  ;;  %v11152_v3 = vld [vmem:[#allocation9 + $0x1] ss:$0 sm:$0xff] }
 0x502   :  { %v7168_v30 = vpop.xlane.xlu1 %7167 }
 0x503   :  { %v7170_v31 = vmul.f32 0.0078125, %v7168_v30  ;;  %v7270_v33 = vpop.xlane.xlu0 %7269 }
 0x504   :  { %v7271_v11 = vmul.f32 0.0078125, %v7270_v33 }
 0x505   :  { %v10961_v50 = vsub.f32 %v7164_v62, %v7170_v31  ;;  %v7224_v62 = vrot.slane %v7214_v49, %v10837_v21 }
 0x506   :  { %v10963_v35 = vsub.f32 %v7267_v42, %v7271_v11  ;;  %v10965_v18 = vpop.permute.xlu1 %7303  ;;  %v7031_v42 = vrot.slane %v10945_v20, %v10837_v21  ;;  %v10329_v20 = vld [vmem:[%s11263_s5 + $0x70] sm:$0xff]  }
 0x507   :  { %v7172_v53 = vmul.f32 %v10961_v50, %v10961_v50  ;;  %8964 = vmatpush3.bf16.msra.mxu0 %v10329_v20  ;;  %v7306_v25 = vpop.permute.xlu0 %7305 }
 0x508   :  { %v7273_v7 = vmul.f32 %v10963_v35, %v10963_v35  ;;  %v7041_v56 = vrot.slane %v7031_v42, %v10837_v21  ;;  %8965 = vmatprep.subr.bf16.mxu0 %v10494_v28 }
 0x509   :  { %v7173_v39 = vsel %vm7165_vm4, %v7172_v53, 0.0 }
 0x50a   :  { %7174 = vadd.xlane.f32.xlu0 %v7173_v39  ;;  %v7203_v22 = vpop.permute.xlu1 %7202  ;;  %v7274_v44 = vsel %vm7165_vm4, %v7273_v7, 0.0 }
 0x50b   :  { %8966 = vmatpush3.bf16.msra.mxu0 %v10330_v24 }
 0x50c   :  { %8983 = vmatprep.subr.bf16.mxu0 %v10494_v28 }
 0x50e   :  { %7275 = vadd.xlane.f32.xlu0 %v7274_v44  ;;  %v7205_v57 = vpop.permute.xlu1 %7204 }
 0x50f   :  { %v10974_v13 = vsel %vm7052_vm3, %v7203_v22, %v7205_v57 }
 0x512   :  { %v10976_v0 = vpop.permute.xlu1 %7334 }
 0x516   :  { %v10978_v32 = vpop.permute.xlu1 %7233 }
 0x51a   :  { %v10983_v46 = vpop.permute.xlu1 %7050 }
 0x51e   :  { %v6973_v55 = vpop.permute.xlu1 %6972 }
 0x51f   :  { %v6975_v16 = vsel %vm6943_vm5, %v6973_v55, 0.0 }
 0x520   :  { %6976 = vadd.xlane.f32.xlu1 %v6975_v16 }
 0x524   :  { %7332 = vrot.lane.b32.xlu0 %v7325_v58, %s10493_s7 }
 0x528   :  { %7231 = vrot.lane.b32.xlu0 %v7224_v62, %s10493_s7 }
 0x52c   :  { %7048 = vrot.lane.b32.xlu0 %v7041_v56, %s10493_s7 }
 0x531   :  { %7576 = vrot.lane.b32.xlu1 %v7521_v63, %s10498_s22 }
 0x535   :  { %7411 = vrot.lane.b32.xlu1 %v8809_v40, %s10493_s7 }
 0x597   :  { %v7175_v26 = vpop.xlane.xlu0 %7174 }
 0x598   :  { %v7176_v27 = vmul.f32 0.0078125, %v7175_v26 }
 0x59a   :  { %v7177_v29 = vadd.f32 1e-05, %v7176_v27 }
 0x59b   :  { %v7276_v30 = vpop.xlane.xlu0 %7275 }
 0x59c   :  { %10331 = vrsqrt.f32 %v7177_v29  ;;  %v7277_v31 = vmul.f32 0.0078125, %v7276_v30  ;;  %v7086_v30 = vrot.slane %v7077_v14, %v10846_v5 }
 0x59e   :  { %v7278_v33 = vadd.f32 1e-05, %v7277_v31  ;;  %v7096_v31 = vrot.slane %v7086_v30, %v10837_v21 }
 0x59f   :  { %v7333_v11 = vpop.permute.xlu0 %7332 }
 0x5a0   :  { %10333 = vrsqrt.f32 %v7278_v33 }
 0x5a3   :  { %v7232_v53 = vpop.permute.xlu0 %7231 }
 0x5a4   :  { %v7235_v51 = vsel %vm7052_vm3, %v7232_v53, %v10978_v32 }
 0x5a6   :  { %v10332_v39 = vpop.eup %10331 }
 0x5a7   :  { %v7179_v7 = vmul.f32 %v10332_v39, %v10961_v50  ;;  %v7049_v22 = vpop.permute.xlu0 %7048  ;;  %v7307_v50 = vsel %vm7052_vm3, %v10965_v18, %v7306_v25 }
 0x5a8   :  { %v7053_v44 = vsel %vm7052_vm3, %v7049_v22, %v10983_v46  ;;  %v7665_v22 = vld [vmem:[#allocation9 + $0xe] sm:$0x11] }
 0x5a9   :  { %v7208_v57 = vmul.f32 %v10974_v13, %v7179_v7  ;;  %v7055_v52 = vadd.f32 %v7053_v44, %v11017_v15  ;;  %v7336_v13 = vsel %vm7052_vm3, %v7333_v11, %v10976_v0  ;;  %v7670_v44 = vrot.slane %v7665_v22, %v10837_v21 }
 0x5aa   :  { %v10334_v43 = vpop.eup %10333 }
 0x5ab   :  { %v7280_v54 = vmul.f32 %v10334_v43, %v10963_v35  ;;  %v7237_v55 = vadd.f32 %v7235_v51, %v7208_v57  ;;  %7057 = vrot.lane.b32.xlu0 %v7055_v52, %s10488_s28  ;;  %v11122_v57 = vld [vmem:[#allocation9 + $0x2] ss:$0 sm:$0xff]  ;;  %v7680_v43 = vrot.slane %v7670_v44, %v10837_v21 }
 0x5ad   :  { %v7309_v16 = vmul.f32 %v7307_v50, %v7280_v54  ;;  %10335 = vtanh.f32 %v7237_v55  ;;  %v6977_v58 = vpop.xlane.xlu1 %6976  ;;  %v7106_v54 = vld [vmem:[#allocation9 + $0x2] sm:$0x11] }
 0x5ae   :  { %v6978_v46 = vmul.f32 0.125, %v6977_v58  ;;  %v7111_v55 = vrot.slane %v7106_v54, %v10837_v21 }
 0x5af   :  { %v7338_v49 = vadd.f32 %v7336_v13, %v7309_v16  ;;  %6996 = vrot.lane.b32.xlu0 %v10953_v9, %s10493_s7  ;;  %v6944_v9 = vsel %vm6943_vm5, %v10957_v47, 0.0  ;;  %v7115_v16 = vrot.slane %v7106_v54, %v10846_v5 }
 0x5b0   :  { %v11083_v32 = vsub.f32 %v10957_v47, %v6978_v46  ;;  %v7121_v50 = vrot.slane %v7111_v55, %v10837_v21 }
 0x5b1   :  { %10337 = vtanh.f32 %v7338_v49  ;;  %v7577_v48 = vpop.permute.xlu1 %7576  ;;  %v7125_v58 = vrot.slane %v7115_v16, %v10837_v21 }
 0x5b2   :  { %v6980_v35 = vmul.f32 %v11083_v32, %v11083_v32 }
 0x5b4   :  { %6982 = vrot.lane.b32.xlu1 %v6980_v35, %s10497_s2 }
 0x5b5   :  { %v7412_v45 = vpop.permute.xlu1 %7411 }
 0x5b7   :  { %v10336_v18 = vpop.eup %10335 }
 0x5b8   :  { %v7340_v59 = vpack.c.bf16 %v10336_v18, %v10336_v18 }
 0x5ba   :  { %8948 = vmatmul.mubr.bf16.vlgmr.msra.gmra.mrb[56].mxu1 %v7340_v59 }
 0x5bb   :  { %v10338_v60 = vpop.eup %10337  ;;  %8979 = vmatprep.mubr.msk.bf16.mxu1 %vm10495_vm0, %v10494_v28 }
 0x5bc   :  { %v7488_v0 = vpack.c.bf16 %v10338_v60, %v10338_v60 }
 0x5be   :  { %8968 = vmatmul.mubr.bf16.vlgmr.msra.gmra.mrb[60].mxu0 %v7488_v0 }
 0x5bf   :  { %8985 = vmatprep.mubr.msk.bf16.mxu0 %vm10495_vm0, %v10494_v28 }
 0x5d8   :  { %6945 = vadd.xlane.f32.xlu1 %v6944_v9 }
 0x5e9   :  { %7099 = vrot.lane.b32.xlu1 %v7092_v4, %s10493_s7 }
 0x61d   :  { %v7058_v61 = vpop.permute.xlu0 %7057 }
 0x61e   :  { %v7060_v1 = vsel %vm7000_vm6, %v7058_v61, 0.0 }
 0x61f   :  { %7061 = vadd.xlane.f32.xlu0 %v7060_v1 }
 0x621   :  { %v6997_v2 = vpop.permute.xlu0 %6996 }
 0x622   :  { %v6999_v62 = vadd.f32 %v6997_v2, %v11017_v15  ;;  %v7636_v2 = vld [vmem:[#allocation9 + $0xd] sm:$0x11] }
 0x624   :  { %v7001_v42 = vsel %vm7000_vm6, %v6999_v62, 0.0 }
 0x626   :  { %v6983_v40 = vpop.permute.xlu1 %6982 }
 0x627   :  { %v6985_v24 = vsel %vm6943_vm5, %v6983_v40, 0.0  ;;  %v7722_v40 = vld [vmem:[%s11264_s6 + $0x38] sm:$0xff] }
 0x635   :  { %7578 = vrot.lane.b32.xlu0 %v7525_v41, %s10498_s22 }
 0x654   :  { %7002 = vadd.xlane.f32.xlu0 %v7001_v42  ;;  %v7641_v42 = vrot.slane %v7636_v2, %v10837_v21 }
 0x656   :  { %v7651_v4 = vrot.slane %v7641_v42, %v10837_v21 }
 0x665   :  { %v6946_v13 = vpop.xlane.xlu1 %6945 }
 0x666   :  { %v6948_v46 = vmul.f32 0.125, %v6946_v13 }
 0x668   :  { %v11136_v49 = vsub.f32 %v10957_v47, %v6948_v46 }
 0x66a   :  { %v6950_v35 = vmul.f32 %v11136_v49, %v11136_v49 }
 0x66c   :  { %v6951_v59 = vsel %vm6943_vm5, %v6950_v35, 0.0 }
 0x68d   :  { %v7448_v6 = vpop.f32.mrb[56].mxu1 }
 0x68e   :  { %v8949_v36 = vpop.f32.mrb[57].mxu1  ;;  %v7449_v20 = vadd.f32 %v7448_v6, %v7412_v45  ;;  %v7645_v6 = vrot.slane %v7636_v2, %v10846_v5 }
 0x68f   :  { %v7451_v8 = vpop.f32.mrb[58].mxu1 }
 0x690   :  { %v8950_v34 = vpop.f32.mrb[59].mxu1  ;;  %v7454_v26 = vsel %vm7000_vm6, %v7449_v20, 0.0  ;;  %v7655_v36 = vrot.slane %v7645_v6, %v10837_v21  ;;  %v7674_v8 = vrot.slane %v7665_v22, %v10846_v5  ;;  %v7717_v5 = vld [vmem:[%s11264_s6 + $0x10] sm:$0xff] }
 0x691   :  { %v7617_v56 = vpop.f32.mrb[60].mxu0 }
 0x692   :  { %v8969_v10 = vpop.f32.mrb[61].mxu0  ;;  %v7684_v34 = vrot.slane %v7674_v8, %v10837_v21  ;;  %v7718_v21 = vld [vmem:[%s11264_s6 + $0x18] sm:$0xff] }
 0x693   :  { %v7620_v19 = vpop.f32.mrb[62].mxu0  ;;  %v8819_v10 = vld [vmem:[#allocation9 + $0xe] ss:$0 sm:$0xff] }
 0x694   :  { %v8970_v38 = vpop.f32.mrb[63].mxu0  ;;  %v7716_v19 = vld [vmem:[%s11264_s6 + $0x8] sm:$0xff] }
 0x695   :  { %v7724_v38 = vpack.c.bf16 %v7717_v5, %v7716_v19 }
 0x697   :  { %8972 = vmatpush3.bf16.msra.mxu1 %v7724_v38 }
 0x698   :  { %8973 = vmatprep.subr.bf16.mxu1 %v10494_v28 }
 0x6ac   :  { %v7062_v63 = vpop.xlane.xlu0 %7061 }
 0x6ad   :  { %v7063_v15 = vmul.f32 0.015625, %v7062_v63  ;;  %v7719_v63 = vld [vmem:[%s11264_s6 + $0x20] sm:$0xff] }
 0x6af   :  { %v11104_v12 = vsub.f32 %v7055_v52, %v7063_v15  ;;  %v7725_v15 = vpack.c.bf16 %v7719_v63, %v7718_v21 }
 0x6b0   :  { %v7579_v17 = vpop.permute.xlu0 %7578 }
 0x6b1   :  { %v7065_v23 = vmul.f32 %v11104_v12, %v11104_v12  ;;  %v7581_v25 = vsel %vm7580_vm7, %v7577_v48, %v7579_v17  ;;  %v7721_v48 = vld [vmem:[%s11264_s6 + $0x30] sm:$0xff]  ;;  %8974 = vmatpush3.bf16.msra.mxu1 %v7725_v15  ;;  %v7723_v17 = vld [vmem:[%s11264_s6 + $0x40] sm:$0xff] }
 0x6b2   :  { %v7618_v27 = vadd.f32 %v7617_v56, %v7581_v25  ;;  %v8818_v56 = vld [vmem:[#allocation9 + $0xd] ss:$0 sm:$0xff]  ;;  %8975 = vmatprep.subr.bf16.mxu1 %v10494_v28 }
 0x6b3   :  { %7067 = vrot.lane.b32.xlu0 %v7065_v23, %s10488_s28  ;;  %v7720_v23 = vld [vmem:[%s11264_s6 + $0x28] sm:$0xff] }
 0x6b4   :  { %v7623_v29 = vsel %vm7000_vm6, %v7618_v27, 0.0  ;;  %v7726_v45 = vpack.c.bf16 %v7721_v48, %v7720_v23 }
 0x6b6   :  { %8976 = vmatpush3.bf16.msra.mxu1 %v7726_v45 }
 0x6b7   :  { %8977 = vmatprep.subr.bf16.mxu1 %v10494_v28 }
 0x6d2   :  { %6986 = vadd.xlane.f32.xlu0 %v6985_v24 }
 0x6d6   :  { %7455 = vadd.xlane.f32.xlu0 %v7454_v26  ;;  %v7100_v26 = vpop.permute.xlu1 %7099 }
 0x6da   :  { %7624 = vadd.xlane.f32.xlu0 %v7623_v29 }
 0x6e1   :  { %v7003_v33 = vpop.xlane.xlu0 %7002 }
 0x6e2   :  { %v7005_v11 = vmul.f32 0.015625, %v7003_v33 }
 0x6e4   :  { %v11116_v53 = vsub.f32 %v6999_v62, %v7005_v11 }
 0x6e6   :  { %v7007_v39 = vmul.f32 %v11116_v53, %v11116_v53 }
 0x6e8   :  { %v7008_v7 = vsel %vm7000_vm6, %v7007_v39, 0.0 }
 0x6f0   :  { %7101 = vrot.lane.b32.xlu0 %v7096_v31, %s10493_s7 }
 0x70f   :  { %7009 = vadd.xlane.f32.xlu0 %v7008_v7 }
 0x725   :  { %v7068_v52 = vpop.permute.xlu0 %7067  ;;  %7021 = vrot.lane.b32.xlu0 %v11122_v57, %s10493_s7 }
 0x726   :  { %v7070_v51 = vsel %vm7000_vm6, %v7068_v52, 0.0 }
 0x727   :  { %7071 = vadd.xlane.f32.xlu1 %v7070_v51 }
 0x729   :  { %7687 = vrot.lane.b32.xlu0 %v7680_v43, %s10498_s22 }
 0x738   :  { %7128 = vrot.lane.b32.xlu1 %v7121_v50, %s10493_s7 }
 0x73c   :  { %7130 = vrot.lane.b32.xlu1 %v7125_v58, %s10493_s7 }
 0x75f   :  { %v6987_v18 = vpop.xlane.xlu0 %6986 }
 0x760   :  { %6952 = vadd.xlane.f32.xlu1 %v6951_v59  ;;  %v6988_v24 = vmul.f32 0.125, %v6987_v18  ;;  %v8847_v18 = vld [vmem:[#allocation9 + $0x10] ss:$0 sm:$0xff] }
 0x762   :  { %v6989_v25 = vadd.f32 1e-05, %v6988_v24 }
 0x763   :  { %v7456_v60 = vpop.xlane.xlu0 %7455 }
 0x764   :  { %v7457_v0 = vmul.f32 0.015625, %v7456_v60  ;;  %10339 = vrsqrt.f32 %v6989_v25 }
 0x766   :  { %v11141_v9 = vsub.f32 %v7449_v20, %v7457_v0  ;;  %v7727_v20 = vpack.c.bf16 %v7723_v17, %v7722_v40 }
 0x767   :  { %v7625_v61 = vpop.xlane.xlu0 %7624 }
 0x768   :  { %v7626_v1 = vmul.f32 0.015625, %v7625_v61  ;;  %v7459_v37 = vmul.f32 %v11141_v9, %v11141_v9  ;;  %8978 = vmatpush3.bf16.msra.mxu1 %v7727_v20 }
 0x769   :  { %8989 = vmatprep.subr.bf16.mxu1 %v10494_v28 }
 0x76a   :  { %v11145_v41 = vsub.f32 %v7618_v27, %v7626_v1  ;;  %v7460_v47 = vsel %vm7000_vm6, %v7459_v37, 0.0 }
 0x76b   :  { %7461 = vadd.xlane.f32.xlu0 %v7460_v47  ;;  %v7102_v39 = vpop.permute.xlu0 %7101 }
 0x76c   :  { %v7628_v62 = vmul.f32 %v11145_v41, %v11145_v41  ;;  %v7103_v43 = vsel %vm7052_vm3, %v7100_v26, %v7102_v39  ;;  %v7822_v39 = vld [vmem:[%s11264_s6 + $0x58] sm:$0xff] }
 0x76e   :  { %v7629_v14 = vsel %vm7000_vm6, %v7628_v62, 0.0  ;;  %v10340_v31 = vpop.eup %10339 }
 0x76f   :  { %7630 = vadd.xlane.f32.xlu0 %v7629_v14  ;;  %v6991_v11 = vmul.f32 %v10340_v31, %v11083_v32  ;;  %v7714_v32 = vld [vmem:[%s11264_s6] sm:$0xff] }
 0x770   :  { %v7715_v16 = vpack.c.bf16 %v7714_v32, %v7714_v32 }
 0x771   :  { %7016 = vrot.lane.b32.xlu1 %v11152_v3, %s10493_s7  ;;  %v6992_v22 = vmul.f32 %v11152_v3, %v6991_v11 }
 0x772   :  { %v7778_v58 = vsel %vm7776_vm8, %v7715_v16, 0  ;;  %v7826_v16 = vld [vmem:[%s11264_s6 + $0x78] sm:$0xff] }
 0x773   :  { %v6993_v55 = vadd.f32 %v11122_v57, %v6992_v22  ;;  %8984 = vmatpush3.bf16.msra.mxu0 %v7778_v58  ;;  %v7827_v58 = vld [vmem:[%s11264_s6 + $0x80] sm:$0xff] }
 0x775   :  { %7658 = vrot.lane.b32.xlu1 %v7651_v4, %s10498_s22 }
 0x779   :  { %7660 = vrot.lane.b32.xlu1 %v7655_v36, %s10498_s22 }
 0x77d   :  { %7689 = vrot.lane.b32.xlu1 %v7684_v34, %s10498_s22 }
 0x785   :  { %7473 = vrot.lane.b32.xlu0 %v8818_v56, %s10493_s7 }
 0x789   :  { %7483 = vrot.lane.b32.xlu0 %v8819_v10, %s10493_s7 }
 0x78d   :  { %7882 = vrot.lane.b32.xlu0 %v8847_v18, %s10493_s7 }
 0x79c   :  { %v7010_v59 = vpop.xlane.xlu0 %7009 }
 0x79d   :  { %v7011_v37 = vmul.f32 0.015625, %v7010_v59 }
 0x79f   :  { %v7012_v62 = vadd.f32 1e-05, %v7011_v37 }
 0x7a0   :  { %v7022_v60 = vpop.permute.xlu0 %7021 }
 0x7a4   :  { %v7688_v0 = vpop.permute.xlu0 %7687 }
 0x7b4   :  { %v7072_v27 = vpop.xlane.xlu1 %7071 }
 0x7b5   :  { %v7073_v29 = vmul.f32 0.015625, %v7072_v27 }
 0x7b7   :  { %v7074_v30 = vadd.f32 1e-05, %v7073_v29 }
 0x7b8   :  { %v7129_v33 = vpop.permute.xlu1 %7128 }
 0x7b9   :  { %10341 = vrsqrt.f32 %v7074_v30 }
 0x7bc   :  { %v7131_v52 = vpop.permute.xlu1 %7130 }
 0x7bd   :  { %v7132_v54 = vsel %vm7052_vm3, %v7129_v33, %v7131_v52 }
 0x7c3   :  { %v10342_v7 = vpop.eup %10341 }
 0x7c4   :  { %v7076_v44 = vmul.f32 %v10342_v7, %v11104_v12  ;;  %v7823_v7 = vld [vmem:[%s11264_s6 + $0x60] sm:$0xff] }
 0x7c6   :  { %v7105_v51 = vmul.f32 %v7103_v43, %v7076_v44  ;;  %v7829_v43 = vpack.c.bf16 %v7823_v7, %v7822_v39 }
 0x7c8   :  { %v7134_v50 = vadd.f32 %v7132_v54, %v7105_v51  ;;  %v7824_v54 = vld [vmem:[%s11264_s6 + $0x68] sm:$0xff] }
 0x7ca   :  { %10343 = vtanh.f32 %v7134_v50 }
 0x7cb   :  { %10345 = vtanh.f32 %v6993_v55  ;;  %v7825_v55 = vld [vmem:[%s11264_s6 + $0x70] sm:$0xff] }
 0x7cc   :  { %10347 = vrsqrt.f32 %v7012_v62  ;;  %v7830_v32 = vpack.c.bf16 %v7825_v55, %v7824_v54 }
 0x7d4   :  { %v10344_v12 = vpop.eup %10343 }
 0x7d5   :  { %v7703_v13 = vrot.slane %v10344_v12, 6  ;;  %v10346_v46 = vpop.eup %10345 }
 0x7d6   :  { %v7696_v35 = vrot.slane %v10346_v46, 6  ;;  %v10348_v34 = vpop.eup %10347 }
 0x7d7   :  { %7704 = vrot.lane.b32.xlu1 %v7703_v13, %s10488_s28  ;;  %v7014_v19 = vmul.f32 %v10348_v34, %v11116_v53  ;;  %v7831_v13 = vpack.c.bf16 %v7827_v58, %v7826_v16 }
 0x7db   :  { %7697 = vrot.lane.b32.xlu1 %v7696_v35, %s10497_s2 }
 0x7ed   :  { %v6953_v1 = vpop.xlane.xlu1 %6952 }
 0x7ee   :  { %v6954_v47 = vmul.f32 0.125, %v6953_v1 }
 0x7f0   :  { %v6955_v42 = vadd.f32 1e-05, %v6954_v47 }
 0x7f1   :  { %v7017_v36 = vpop.permute.xlu1 %7016 }
 0x7f2   :  { %10349 = vrsqrt.f32 %v6955_v42  ;;  %v7019_v21 = vmul.f32 %v7017_v36, %v7014_v19 }
 0x7f4   :  { %v7024_v23 = vadd.f32 %v7022_v60, %v7019_v21 }
 0x7f5   :  { %v7659_v56 = vpop.permute.xlu1 %7658 }
 0x7f8   :  { %v7462_v61 = vpop.xlane.xlu0 %7461 }
 0x7f9   :  { %v7463_v6 = vmul.f32 0.015625, %v7462_v61  ;;  %v7661_v63 = vpop.permute.xlu1 %7660 }
 0x7fa   :  { %v7662_v45 = vsel %vm7580_vm7, %v7659_v56, %v7661_v63  ;;  %v8849_v56 = vld [vmem:[#allocation9 + $0x12] ss:$0 sm:$0xff]  ;;  %v8848_v63 = vld [vmem:[#allocation9 + $0x11] ss:$0 sm:$0xff] }
 0x7fb   :  { %v7464_v8 = vadd.f32 1e-05, %v7463_v6 }
 0x7fc   :  { %v7631_v2 = vpop.xlane.xlu0 %7630  ;;  %v10350_v10 = vpop.eup %10349 }
 0x7fd   :  { %v7632_v14 = vmul.f32 0.015625, %v7631_v2  ;;  %v6957_v5 = vmul.f32 %v10350_v10, %v11136_v49  ;;  %v7690_v24 = vpop.permute.xlu1 %7689 }
 0x7fe   :  { %v7691_v49 = vsel %vm7580_vm7, %v7688_v0, %v7690_v24 }
 0x7ff   :  { %v7633_v4 = vadd.f32 1e-05, %v7632_v14  ;;  %v6963_v15 = vmul.f32 %v11152_v3, %v6957_v5 }
 0x800   :  { %v7474_v25 = vpop.permute.xlu0 %7473 }
 0x801   :  { %10351 = vrsqrt.f32 %v7633_v4  ;;  %v6969_v17 = vadd.f32 %v11122_v57, %v6963_v15  ;;  %v7821_v57 = vld [vmem:[%s11264_s6 + $0x50] sm:$0xff] }
 0x802   :  { %10353 = vrsqrt.f32 %v7464_v8 }
 0x803   :  { %10355 = vtanh.f32 %v7024_v23 }
 0x804   :  { %10357 = vtanh.f32 %v6969_v17  ;;  %v7484_v3 = vpop.permute.xlu0 %7483 }
 0x808   :  { %v7883_v14 = vpop.permute.xlu0 %7882 }
 0x80b   :  { %v10352_v38 = vpop.eup %10351 }
 0x80c   :  { %v7635_v48 = vmul.f32 %v10352_v38, %v11145_v41  ;;  %v10354_v40 = vpop.eup %10353  ;;  %v7820_v41 = vld [vmem:[%s11264_s6 + $0x48] sm:$0xff] }
 0x80d   :  { %v7466_v53 = vmul.f32 %v10354_v40, %v11141_v9  ;;  %v10356_v29 = vpop.eup %10355  ;;  %v7828_v33 = vpack.c.bf16 %v7821_v57, %v7820_v41 }
 0x80e   :  { %v7664_v20 = vmul.f32 %v7662_v45, %v7635_v48  ;;  %v10358_v22 = vpop.eup %10357 }
 0x80f   :  { %v7476_v27 = vmul.f32 %v7474_v25, %v7466_v53 }
 0x810   :  { %v7693_v26 = vadd.f32 %v7691_v49, %v7664_v20 }
 0x811   :  { %v7486_v30 = vadd.f32 %v7484_v3, %v7476_v27 }
 0x812   :  { %10359 = vtanh.f32 %v7693_v26 }
 0x813   :  { %10361 = vtanh.f32 %v7486_v30 }
 0x81c   :  { %v10360_v50 = vpop.eup %10359 }
 0x81d   :  { %v7710_v12 = vrot.slane %v10360_v50, 6  ;;  %v10362_v46 = vpop.eup %10361 }
 0x81f   :  { %v7712_v35 = vsel %vm7165_vm4, %v10362_v46, %v7710_v12 }
 0x820   :  { %v7713_v18 = vpack.c.bf16 %v7712_v35, %v7712_v35 }
 0x849   :  { %v7705_v31 = vpop.permute.xlu1 %7704 }
 0x84a   :  { %v7707_v9 = vsel %vm7165_vm4, %v10356_v29, %v7705_v31 }
 0x84b   :  { %v7708_v11 = vpack.c.bf16 %v7707_v9, %v7707_v9 }
 0x84d   :  { %8980 = vmatmul.mubr.msk.bf16.vlgmr.msra.gmra.mrb[60].mxu1 %vm7728_vm9, %v7708_v11  ;;  %v7698_v44 = vpop.permute.xlu1 %7697 }
 0x84e   :  { %8990 = vmatpush3.bf16.msra.mxu1 %v7828_v33  ;;  %v7700_v52 = vsel %vm7165_vm4, %v10358_v22, %v7698_v44  ;;  %8997 = vmatprep.mubr.msk.bf16.mxu1 %vm10495_vm0, %v10494_v28 }
 0x84f   :  { %v7701_v51 = vpack.c.bf16 %v7700_v52, %v7700_v52  ;;  %8991 = vmatprep.subr.bf16.mxu1 %v10494_v28 }
 0x851   :  { %8986 = vmatmul.mubr.msk.bf16.vlgmr.msra.gmra.mrb[64].mxu0 %vm7772_vm10, %v7701_v51 }
 0x852   :  { %8992 = vmatpush3.bf16.msra.mxu1 %v7829_v43 }
 0x853   :  { %8993 = vmatprep.subr.bf16.mxu1 %v10494_v28 }
 0x856   :  { %8994 = vmatpush3.bf16.msra.mxu1 %v7830_v32 }
 0x857   :  { %8995 = vmatprep.subr.bf16.mxu1 %v10494_v28 }
 0x85a   :  { %8996 = vmatpush3.bf16.msra.mxu1 %v7831_v13 }
 0x85d   :  { %8998 = vmatmul.mubr.msk.bf16.vlgmr.msra.gmra.mrb[64].mxu1 %vm7728_vm9, %v7713_v18 }
 0x920   :  { %v7766_v59 = vpop.f32.mrb[60].mxu1 }
 0x921   :  { %v8981_v60 = vpop.f32.mrb[61].mxu1 }
 0x922   :  { %v7769_v0 = vpop.f32.mrb[62].mxu1 }
 0x923   :  { %v8982_v61 = vpop.f32.mrb[63].mxu1 }
 0x924   :  { %v7814_v1 = vpop.f32.mrb[64].mxu0 }
 0x925   :  { %v7815_v37 = vadd.f32 %v7814_v1, %v7766_v59  ;;  %v8987_v47 = vpop.f32.mrb[65].mxu0 }
 0x926   :  { %v7817_v2 = vpop.f32.mrb[66].mxu0 }
 0x927   :  { %v8988_v62 = vpop.f32.mrb[67].mxu0 }
 0x930   :  { %v7869_v42 = vpop.f32.mrb[64].mxu1 }
 0x931   :  { %v7875_v4 = vadd.f32 %v7869_v42, %v7815_v37  ;;  %v8999_v6 = vpop.f32.mrb[65].mxu1 }
 0x932   :  { %v7872_v28 = vpop.f32.mrb[66].mxu1 }
 0x933   :  { %v7885_v36 = vadd.f32 %v7883_v14, %v7875_v4  ;;  %v9000_v8 = vpop.f32.mrb[67].mxu1 }
 0x935   :  { %v7887_v34 = vsel %vm7886_vm11, %v7885_v36, 0.0 }
 0x936   :  { %7888 = vadd.xlane.f32.xlu1 %v7887_v34 }
 0x947   :  { %7916 = vrot.lane.b32.xlu1 %v8849_v56, %s10493_s7 }
 0x9c3   :  { %v7889_v10 = vpop.xlane.xlu1 %7888 }
 0x9c4   :  { %v7890_v19 = vmul.f32 0.015625, %v7889_v10 }
 0x9c6   :  { %v7891_v5 = vsub.f32 %v7885_v36, %v7890_v19 }
 0x9c7   :  { %v7917_v20 = vpop.permute.xlu1 %7916 }
 0x9c8   :  { %v7892_v21 = vmul.f32 %v7891_v5, %v7891_v5 }
 0x9ca   :  { %v7893_v38 = vsel %vm7886_vm11, %v7892_v21, 0.0 }
 0x9cb   :  { %7894 = vadd.xlane.f32.xlu0 %v7893_v38 }
 0x9e1   :  { %7906 = vrot.lane.b32.xlu0 %v8848_v63, %s10493_s7 }
 0xa58   :  { %v7895_v15 = vpop.xlane.xlu0 %7894 }
 0xa59   :  { %v7896_v23 = vmul.f32 0.015625, %v7895_v15 }
 0xa5b   :  { %v7897_v48 = vadd.f32 1e-05, %v7896_v23 }
 0xa5c   :  { %v7907_v40 = vpop.permute.xlu0 %7906 }
 0xa5d   :  { %10363 = vrsqrt.f32 %v7897_v48 }
 0xa67   :  { %v10364_v45 = vpop.eup %10363 }
 0xa68   :  { %v7899_v17 = vmul.f32 %v10364_v45, %v7891_v5 }
 0xa6a   :  { %v7909_v24 = vmul.f32 %v7907_v40, %v7899_v17 }
 0xa6c   :  { %v7919_v25 = vadd.f32 %v7917_v20, %v7909_v24 }
 0xa6e   :  { %10365 = vtanh.f32 %v7919_v25 }
 0xa78   :  { %v10366_v53 = vpop.eup %10365 }
 0xa79   :  { %7921 = vst.msk [vmem:[%s11266_s8] sm:$0x3] %vm7000_vm6, %v10366_v53  ;;  %7923 = vrot.lane.b32.xlu1 %v10366_v53, %s10488_s28 }
 0xaeb   :  { %v7924_v49 = vpop.permute.xlu1 %7923 }
 0xaec   :  { %7927 = vst.msk [vmem:[%s11266_s8 - $0x2] sm:$0xc] %vm7926_vm12, %v7924_v49 }
 0xaed   :  { %7932 = vsyncpa [#allocation3], 1 }
 0xaee   :  { %7933 = vsyncpa [#allocation5], 1 }
 0xaef   :  { %7934 = vsyncpa [#allocation8], 1 }

</bundles_post_ra>
